<compile_context>
chip_gen: v7x
topology: tpu7x:2x2x1
jax: 0.10.0
libtpu: 0.0.40
codegen_flags: <defaults>
</compile_context>

<pallas_src>
import jax
import jax.numpy as jnp
from jax.experimental import pallas as pl
from jax.experimental.pallas import tpu as pltpu


def _ceil_to(x, m):
    return -(-x // m) * m


# ----------------------------- kernel -----------------------------
def make_lossnet_kernel(hws, interm_dim):
    """hws: tuple of H*W per feature level (compile-time constants)."""
    D = interm_dim
    inv_hws = tuple(1.0 / float(hw) for hw in hws)

    def kernel(f1_ref, f2_ref, f3_ref, f4_ref,
               w1_ref, b1_ref, w2_ref, b2_ref,
               w3_ref, b3_ref, w4_ref, b4_ref,
               wf_ref, bf_ref, out_ref):
        f_refs = (f1_ref, f2_ref, f3_ref, f4_ref)
        w_refs = (w1_ref, w2_ref, w3_ref, w4_ref)
        b_refs = (b1_ref, b2_ref, b3_ref, b4_ref)

        tb = out_ref.shape[0]
        acc = jnp.zeros((tb, D), jnp.float32)
        for i in range(4):
            # Global average pool fused in: f32-accumulated sum over the
            # spatial (lane) axis of the (TB, C, HW) block, then scale.
            pooled = jnp.sum(f_refs[i][...].astype(jnp.float32),
                             axis=-1) * inv_hws[i]                      # (TB, C)
            # FC_i in f32 on the MXU (hidden under DMA); bias + ReLU on VPU.
            h = jnp.dot(pooled, w_refs[i][...],
                        preferred_element_type=jnp.float32)             # (TB, D)
            h = jnp.maximum(h + b_refs[i][...], 0.0)
            # Final Linear(4D -> 1) folded per branch into one accumulator.
            acc = acc + h * wf_ref[:, i * D:(i + 1) * D]                # (TB, D)
        out_ref[...] = jnp.sum(acc, axis=-1, keepdims=True) + bf_ref[...]

    return kernel


# ----------------------------- wrapper -----------------------------
def prepare_lossnet_params(params, interm_dim=128):
    """One-time weight prep (hoisted out of the forward path)."""
    D = interm_dim
    prepped = {}
    for i in range(1, 5):
        # PyTorch Linear weights are (out, in): transpose once to (in, out).
        prepped[f"fc{i}_w"] = jnp.asarray(params[f"fc{i}_w"], jnp.float32).T
        prepped[f"fc{i}_b"] = jnp.asarray(params[f"fc{i}_b"],
                                          jnp.float32).reshape(1, D)
    prepped["lin_w"] = jnp.asarray(params["lin_w"], jnp.float32).reshape(1, 4 * D)
    prepped["lin_b"] = jnp.asarray(params["lin_b"], jnp.float32).reshape(1, 1)
    return prepped


def lossnet_pallas(features_nchw, prepped, interm_dim=128):
    """Fused LossNet forward. features_nchw: list of 4 (B, C_i, H_i, W_i)."""
    B = features_nchw[0].shape[0]
    D = interm_dim

    # Free reshape (contiguous), no transpose, no dtype change.
    feats, hws, chans = [], [], []
    for f in features_nchw:
        _, C, H, W = f.shape
        feats.append(f.reshape(B, C, H * W))
        hws.append(H * W)
        chans.append(C)

    # ---- batch-tile selection from padded VMEM footprint (generation aware)
    try:
        vmem_cap = int(pltpu.get_tpu_info().vmem_capacity_bytes)
    except Exception:                       # conservative fallback (v7x per-TC)
        vmem_cap = 64 * 1024 * 1024
    # Padded VMEM bytes per sample for the four feature blocks
    # (sublanes pad to 8, lanes pad to 128).
    feat_bytes = sum(_ceil_to(C, 8) * _ceil_to(hw, 128) * f.dtype.itemsize
                     for f, C, hw in zip(feats, chans, hws))
    budget = int(0.55 * vmem_cap)           # double-buffered feature budget
    tb_cap = max(8, min(128, (budget // max(1, 2 * feat_bytes)) // 8 * 8))
    if B >= 16:
        # keep grid length >= 2 so the parallel batch axis can use both
        # TensorCores on v7x (negligible cost on single-TC chips).
        tb_cap = min(tb_cap, max(8, (B // 2) // 8 * 8))
    TB = B if B <= tb_cap else tb_cap
    grid = (pl.cdiv(B, TB),)

    # ---- specs
    args, in_specs = [], []
    for f, C, hw in zip(feats, chans, hws):
        args.append(f)
        in_specs.append(pl.BlockSpec((TB, C, hw), lambda g: (g, 0, 0)))
    for i in range(1, 5):
        args += [prepped[f"fc{i}_w"], prepped[f"fc{i}_b"]]
        in_specs += [pl.BlockSpec(prepped[f"fc{i}_w"].shape, lambda g: (0, 0)),
                     pl.BlockSpec((1, D), lambda g: (0, 0))]
    args += [prepped["lin_w"], prepped["lin_b"]]
    in_specs += [pl.BlockSpec((1, 4 * D), lambda g: (0, 0)),
                 pl.BlockSpec((1, 1), lambda g: (0, 0))]
    out_spec = pl.BlockSpec((TB, 1), lambda g: (g, 0))

    # ---- scoped VMEM sized to the actual working set (no hard clamp)
    param_bytes = sum(int(v.size) * v.dtype.itemsize for v in prepped.values())
    need = 2 * TB * feat_bytes + 2 * param_bytes + (2 << 20)
    vmem_limit = int(max(16 * 1024 * 1024,
                         min(need, vmem_cap - (2 << 20))))

    kernel = make_lossnet_kernel(tuple(hws), D)
    return pl.pallas_call(
        kernel,
        out_shape=jax.ShapeDtypeStruct((B, 1), jnp.float32),
        grid=grid,
        in_specs=in_specs,
        out_specs=out_spec,
        compiler_params=pltpu.CompilerParams(
            dimension_semantics=("parallel",),
            vmem_limit_bytes=vmem_limit),
    )(*args)


# ------------------- pure-JAX reference (for checking) -------------------
def lossnet_ref(features_nchw, params, interm_dim=128):
    D = interm_dim
    hs = []
    for i, f in enumerate(features_nchw, start=1):
        pooled = jnp.mean(f.astype(jnp.float32), axis=(2, 3))          # (B, C)
        w = jnp.asarray(params[f"fc{i}_w"], jnp.float32)               # (D, C)
        b = jnp.asarray(params[f"fc{i}_b"], jnp.float32).reshape(1, D)
        h = jnp.dot(pooled, w.T, precision=jax.lax.Precision.HIGHEST) + b
        hs.append(jnp.maximum(h, 0.0))
    h = jnp.concatenate(hs, axis=1)                                    # (B, 4D)
    wf = jnp.asarray(params["lin_w"], jnp.float32)                     # (1, 4D)
    bf = jnp.asarray(params["lin_b"], jnp.float32).reshape(1, 1)
    return jnp.dot(h, wf.T, precision=jax.lax.Precision.HIGHEST) + bf


def init_params(key, num_channels=(64, 128, 256, 512), interm_dim=128):
    D = interm_dim
    keys = jax.random.split(key, 10)
    p = {}
    for i, C in enumerate(num_channels, start=1):
        p[f"fc{i}_w"] = 0.1 * jax.random.normal(keys[2 * (i - 1)], (D, C), jnp.float32)
        p[f"fc{i}_b"] = 0.1 * jax.random.normal(keys[2 * (i - 1) + 1], (D,), jnp.float32)
    p["lin_w"] = 0.1 * jax.random.normal(keys[8], (1, 4 * D), jnp.float32)
    p["lin_b"] = 0.1 * jax.random.normal(keys[9], (1,), jnp.float32)
    return p


if __name__ == "__main__":
    key = jax.random.PRNGKey(0)
    kf = jax.random.split(key, 5)

    B = 2
    feature_sizes = [28, 14, 7, 4]
    num_channels = [64, 128, 256, 512]
    interm_dim = 128

    features = [
        jax.random.normal(
            kf[i], (B, num_channels[i], feature_sizes[i], feature_sizes[i]),
            jnp.float32)
        for i in range(4)
    ]
    params = init_params(kf[4], tuple(num_channels), interm_dim)
    prepped = prepare_lossnet_params(params, interm_dim)

    out = lossnet_pallas(features, prepped, interm_dim)
    jax.block_until_ready(out)

    ref = lossnet_ref(features, params, interm_dim)
    err = float(jnp.max(jnp.abs(out - ref)))

    # f32 MXU emulation is expected to be near-exact (~1e-6); the tolerance
    # only leaves headroom for any internal reduced-precision matmul passes.
    if out.shape == (B, 1) and err < 1e-2:
        print("KERNEL_OK")
    else:
        print(f"MISMATCH: shape={out.shape} max abs err={err}")
</pallas_src>

<mosaic_0001>
module attributes {stable_mosaic.version = 11 : i64} {
  func.func @kernel(%arg0: i32, %arg1: memref<2x64x784xf32, #tpu.memory_space<vmem>>, %arg2: memref<2x128x196xf32, #tpu.memory_space<vmem>>, %arg3: memref<2x256x49xf32, #tpu.memory_space<vmem>>, %arg4: memref<2x512x16xf32, #tpu.memory_space<vmem>>, %arg5: memref<64x128xf32, #tpu.memory_space<vmem>>, %arg6: memref<1x128xf32, #tpu.memory_space<vmem>>, %arg7: memref<128x128xf32, #tpu.memory_space<vmem>>, %arg8: memref<1x128xf32, #tpu.memory_space<vmem>>, %arg9: memref<256x128xf32, #tpu.memory_space<vmem>>, %arg10: memref<1x128xf32, #tpu.memory_space<vmem>>, %arg11: memref<512x128xf32, #tpu.memory_space<vmem>>, %arg12: memref<1x128xf32, #tpu.memory_space<vmem>>, %arg13: memref<1x512xf32, #tpu.memory_space<vmem>>, %arg14: memref<1x1xf32, #tpu.memory_space<vmem>>, %arg15: memref<2x1xf32, #tpu.memory_space<vmem>>) attributes {dimension_semantics = [#tpu.dimension_semantics<parallel>], iteration_bounds = array<i64: 1>, scalar_prefetch = 0 : i64, scratch_operands = 0 : i64, tpu.core_type = #tpu.core_type<tc>, window_params = [{transform_indices = @transform_0, window_bounds = array<i64: 2, 64, 784>}, {transform_indices = @transform_1, window_bounds = array<i64: 2, 128, 196>}, {transform_indices = @transform_2, window_bounds = array<i64: 2, 256, 49>}, {transform_indices = @transform_3, window_bounds = array<i64: 2, 512, 16>}, {pipeline_mode = #tpu.pipeline_mode<synchronous>, transform_indices = @transform_4, window_bounds = array<i64: 64, 128>}, {pipeline_mode = #tpu.pipeline_mode<synchronous>, transform_indices = @transform_5, window_bounds = array<i64: 1, 128>}, {pipeline_mode = #tpu.pipeline_mode<synchronous>, transform_indices = @transform_6, window_bounds = array<i64: 128, 128>}, {pipeline_mode = #tpu.pipeline_mode<synchronous>, transform_indices = @transform_7, window_bounds = array<i64: 1, 128>}, {pipeline_mode = #tpu.pipeline_mode<synchronous>, transform_indices = @transform_8, window_bounds = array<i64: 256, 128>}, {pipeline_mode = #tpu.pipeline_mode<synchronous>, transform_indices = @transform_9, window_bounds = array<i64: 1, 128>}, {pipeline_mode = #tpu.pipeline_mode<synchronous>, transform_indices = @transform_10, window_bounds = array<i64: 512, 128>}, {pipeline_mode = #tpu.pipeline_mode<synchronous>, transform_indices = @transform_11, window_bounds = array<i64: 1, 128>}, {pipeline_mode = #tpu.pipeline_mode<synchronous>, transform_indices = @transform_12, window_bounds = array<i64: 1, 512>}, {pipeline_mode = #tpu.pipeline_mode<synchronous>, transform_indices = @transform_13, window_bounds = array<i64: 1, 1>}, {transform_indices = @transform_14, window_bounds = array<i64: 2, 1>}]} {
    %cst = arith.constant 0.000000e+00 : f32
    %0 = vector.broadcast %cst : f32 to vector<2x128xf32>
    %c0 = arith.constant 0 : index
    %c0_0 = arith.constant 0 : index
    %c0_1 = arith.constant 0 : index
    %1 = vector.load %arg1[%c0, %c0_0, %c0_1] : memref<2x64x784xf32, #tpu.memory_space<vmem>>, vector<2x64x784xf32>
    %cst_2 = arith.constant dense<0.000000e+00> : vector<2x64xf32>
    %2 = vector.multi_reduction <add>, %1, %cst_2 [2] : vector<2x64x784xf32> to vector<2x64xf32>
    %cst_3 = arith.constant 0.00127551018 : f32
    %3 = vector.broadcast %cst_3 : f32 to vector<2x64xf32>
    %4 = arith.mulf %2, %3 : vector<2x64xf32>
    %c0_4 = arith.constant 0 : index
    %c0_5 = arith.constant 0 : index
    %5 = vector.load %arg5[%c0_4, %c0_5] : memref<64x128xf32, #tpu.memory_space<vmem>>, vector<64x128xf32>
    %cst_6 = arith.constant dense<0.000000e+00> : vector<2x128xf32>
    %6 = tpu.matmul %4, %5, %cst_6 {dimension_numbers = #tpu.dot_dimension_numbers<[1], [0], [0], [1], [0, 0, 1, 1], [], []>} : vector<2x64xf32>, vector<64x128xf32>, vector<2x128xf32> -> vector<2x128xf32>
    %c0_7 = arith.constant 0 : index
    %c0_8 = arith.constant 0 : index
    %7 = vector.load %arg6[%c0_7, %c0_8] : memref<1x128xf32, #tpu.memory_space<vmem>>, vector<1x128xf32>
    %8 = vector.broadcast %7 : vector<1x128xf32> to vector<2x128xf32>
    %9 = arith.addf %6, %8 : vector<2x128xf32>
    %cst_9 = arith.constant 0.000000e+00 : f32
    %10 = vector.broadcast %cst_9 : f32 to vector<2x128xf32>
    %11 = arith.maximumf %9, %10 : vector<2x128xf32>
    %c0_10 = arith.constant 0 : index
    %c0_11 = arith.constant 0 : index
    %12 = vector.load %arg13[%c0_10, %c0_11] : memref<1x512xf32, #tpu.memory_space<vmem>>, vector<1x128xf32>
    %13 = vector.broadcast %12 : vector<1x128xf32> to vector<2x128xf32>
    %14 = arith.mulf %11, %13 : vector<2x128xf32>
    %15 = arith.addf %0, %14 : vector<2x128xf32>
    %c0_12 = arith.constant 0 : index
    %c0_13 = arith.constant 0 : index
    %c0_14 = arith.constant 0 : index
    %16 = vector.load %arg2[%c0_12, %c0_13, %c0_14] : memref<2x128x196xf32, #tpu.memory_space<vmem>>, vector<2x128x196xf32>
    %cst_15 = arith.constant dense<0.000000e+00> : vector<2x128xf32>
    %17 = vector.multi_reduction <add>, %16, %cst_15 [2] : vector<2x128x196xf32> to vector<2x128xf32>
    %cst_16 = arith.constant 0.00510204071 : f32
    %18 = vector.broadcast %cst_16 : f32 to vector<2x128xf32>
    %19 = arith.mulf %17, %18 : vector<2x128xf32>
    %c0_17 = arith.constant 0 : index
    %c0_18 = arith.constant 0 : index
    %20 = vector.load %arg7[%c0_17, %c0_18] : memref<128x128xf32, #tpu.memory_space<vmem>>, vector<128x128xf32>
    %cst_19 = arith.constant dense<0.000000e+00> : vector<2x128xf32>
    %21 = tpu.matmul %19, %20, %cst_19 {dimension_numbers = #tpu.dot_dimension_numbers<[1], [0], [0], [1], [0, 0, 1, 1], [], []>} : vector<2x128xf32>, vector<128x128xf32>, vector<2x128xf32> -> vector<2x128xf32>
    %c0_20 = arith.constant 0 : index
    %c0_21 = arith.constant 0 : index
    %22 = vector.load %arg8[%c0_20, %c0_21] : memref<1x128xf32, #tpu.memory_space<vmem>>, vector<1x128xf32>
    %23 = vector.broadcast %22 : vector<1x128xf32> to vector<2x128xf32>
    %24 = arith.addf %21, %23 : vector<2x128xf32>
    %cst_22 = arith.constant 0.000000e+00 : f32
    %25 = vector.broadcast %cst_22 : f32 to vector<2x128xf32>
    %26 = arith.maximumf %24, %25 : vector<2x128xf32>
    %c0_23 = arith.constant 0 : index
    %c128 = arith.constant 128 : index
    %27 = vector.load %arg13[%c0_23, %c128] : memref<1x512xf32, #tpu.memory_space<vmem>>, vector<1x128xf32>
    %28 = vector.broadcast %27 : vector<1x128xf32> to vector<2x128xf32>
    %29 = arith.mulf %26, %28 : vector<2x128xf32>
    %30 = arith.addf %15, %29 : vector<2x128xf32>
    %c0_24 = arith.constant 0 : index
    %c0_25 = arith.constant 0 : index
    %c0_26 = arith.constant 0 : index
    %31 = vector.load %arg3[%c0_24, %c0_25, %c0_26] : memref<2x256x49xf32, #tpu.memory_space<vmem>>, vector<2x256x49xf32>
    %cst_27 = arith.constant dense<0.000000e+00> : vector<2x256xf32>
    %32 = vector.multi_reduction <add>, %31, %cst_27 [2] : vector<2x256x49xf32> to vector<2x256xf32>
    %cst_28 = arith.constant 0.0204081628 : f32
    %33 = vector.broadcast %cst_28 : f32 to vector<2x256xf32>
    %34 = arith.mulf %32, %33 : vector<2x256xf32>
    %c0_29 = arith.constant 0 : index
    %c0_30 = arith.constant 0 : index
    %35 = vector.load %arg9[%c0_29, %c0_30] : memref<256x128xf32, #tpu.memory_space<vmem>>, vector<256x128xf32>
    %cst_31 = arith.constant dense<0.000000e+00> : vector<2x128xf32>
    %36 = tpu.matmul %34, %35, %cst_31 {dimension_numbers = #tpu.dot_dimension_numbers<[1], [0], [0], [1], [0, 0, 1, 1], [], []>} : vector<2x256xf32>, vector<256x128xf32>, vector<2x128xf32> -> vector<2x128xf32>
    %c0_32 = arith.constant 0 : index
    %c0_33 = arith.constant 0 : index
    %37 = vector.load %arg10[%c0_32, %c0_33] : memref<1x128xf32, #tpu.memory_space<vmem>>, vector<1x128xf32>
    %38 = vector.broadcast %37 : vector<1x128xf32> to vector<2x128xf32>
    %39 = arith.addf %36, %38 : vector<2x128xf32>
    %cst_34 = arith.constant 0.000000e+00 : f32
    %40 = vector.broadcast %cst_34 : f32 to vector<2x128xf32>
    %41 = arith.maximumf %39, %40 : vector<2x128xf32>
    %c0_35 = arith.constant 0 : index
    %c256 = arith.constant 256 : index
    %42 = vector.load %arg13[%c0_35, %c256] : memref<1x512xf32, #tpu.memory_space<vmem>>, vector<1x128xf32>
    %43 = vector.broadcast %42 : vector<1x128xf32> to vector<2x128xf32>
    %44 = arith.mulf %41, %43 : vector<2x128xf32>
    %45 = arith.addf %30, %44 : vector<2x128xf32>
    %c0_36 = arith.constant 0 : index
    %c0_37 = arith.constant 0 : index
    %c0_38 = arith.constant 0 : index
    %46 = vector.load %arg4[%c0_36, %c0_37, %c0_38] : memref<2x512x16xf32, #tpu.memory_space<vmem>>, vector<2x512x16xf32>
    %cst_39 = arith.constant dense<0.000000e+00> : vector<2x512xf32>
    %47 = vector.multi_reduction <add>, %46, %cst_39 [2] : vector<2x512x16xf32> to vector<2x512xf32>
    %cst_40 = arith.constant 6.250000e-02 : f32
    %48 = vector.broadcast %cst_40 : f32 to vector<2x512xf32>
    %49 = arith.mulf %47, %48 : vector<2x512xf32>
    %c0_41 = arith.constant 0 : index
    %c0_42 = arith.constant 0 : index
    %50 = vector.load %arg11[%c0_41, %c0_42] : memref<512x128xf32, #tpu.memory_space<vmem>>, vector<512x128xf32>
    %cst_43 = arith.constant dense<0.000000e+00> : vector<2x128xf32>
    %51 = tpu.matmul %49, %50, %cst_43 {dimension_numbers = #tpu.dot_dimension_numbers<[1], [0], [0], [1], [0, 0, 1, 1], [], []>} : vector<2x512xf32>, vector<512x128xf32>, vector<2x128xf32> -> vector<2x128xf32>
    %c0_44 = arith.constant 0 : index
    %c0_45 = arith.constant 0 : index
    %52 = vector.load %arg12[%c0_44, %c0_45] : memref<1x128xf32, #tpu.memory_space<vmem>>, vector<1x128xf32>
    %53 = vector.broadcast %52 : vector<1x128xf32> to vector<2x128xf32>
    %54 = arith.addf %51, %53 : vector<2x128xf32>
    %cst_46 = arith.constant 0.000000e+00 : f32
    %55 = vector.broadcast %cst_46 : f32 to vector<2x128xf32>
    %56 = arith.maximumf %54, %55 : vector<2x128xf32>
    %c0_47 = arith.constant 0 : index
    %c384 = arith.constant 384 : index
    %57 = vector.load %arg13[%c0_47, %c384] : memref<1x512xf32, #tpu.memory_space<vmem>>, vector<1x128xf32>
    %58 = vector.broadcast %57 : vector<1x128xf32> to vector<2x128xf32>
    %59 = arith.mulf %56, %58 : vector<2x128xf32>
    %60 = arith.addf %45, %59 : vector<2x128xf32>
    %cst_48 = arith.constant dense<0.000000e+00> : vector<2xf32>
    %61 = vector.multi_reduction <add>, %60, %cst_48 [1] : vector<2x128xf32> to vector<2xf32>
    %62 = vector.shape_cast %61 : vector<2xf32> to vector<2x1xf32>
    %c0_49 = arith.constant 0 : index
    %c0_50 = arith.constant 0 : index
    %63 = vector.load %arg14[%c0_49, %c0_50] : memref<1x1xf32, #tpu.memory_space<vmem>>, vector<1x1xf32>
    %64 = vector.broadcast %63 : vector<1x1xf32> to vector<2x1xf32>
    %65 = arith.addf %62, %64 : vector<2x1xf32>
    %c0_51 = arith.constant 0 : index
    %c0_52 = arith.constant 0 : index
    %66 = vector.load %arg15[%c0_51, %c0_52] : memref<2x1xf32, #tpu.memory_space<vmem>>, vector<2x1xf32>
    tpu.vector_store %arg15[%c0_51, %c0_52], %65 {strides = array<i32>} : memref<2x1xf32, #tpu.memory_space<vmem>>, vector<2x1xf32>,
    return
  }
  func.func @transform_0(%arg0: i32) -> (i32, i32, i32) {
    %c0_i32 = arith.constant 0 : i32
    %c0_i32_0 = arith.constant 0 : i32
    %c0_i32_1 = arith.constant 0 : i32
    return %arg0, %c0_i32, %c0_i32_0 : i32, i32, i32
  }
  func.func @transform_1(%arg0: i32) -> (i32, i32, i32) {
    %c0_i32 = arith.constant 0 : i32
    %c0_i32_0 = arith.constant 0 : i32
    %c0_i32_1 = arith.constant 0 : i32
    return %arg0, %c0_i32, %c0_i32_0 : i32, i32, i32
  }
  func.func @transform_2(%arg0: i32) -> (i32, i32, i32) {
    %c0_i32 = arith.constant 0 : i32
    %c0_i32_0 = arith.constant 0 : i32
    %c0_i32_1 = arith.constant 0 : i32
    return %arg0, %c0_i32, %c0_i32_0 : i32, i32, i32
  }
  func.func @transform_3(%arg0: i32) -> (i32, i32, i32) {
    %c0_i32 = arith.constant 0 : i32
    %c0_i32_0 = arith.constant 0 : i32
    %c0_i32_1 = arith.constant 0 : i32
    return %arg0, %c0_i32, %c0_i32_0 : i32, i32, i32
  }
  func.func @transform_4(%arg0: i32) -> (i32, i32) {
    %c0_i32 = arith.constant 0 : i32
    %c0_i32_0 = arith.constant 0 : i32
    %c0_i32_1 = arith.constant 0 : i32
    return %c0_i32, %c0_i32_0 : i32, i32
  }
  func.func @transform_5(%arg0: i32) -> (i32, i32) {
    %c0_i32 = arith.constant 0 : i32
    %c0_i32_0 = arith.constant 0 : i32
    %c0_i32_1 = arith.constant 0 : i32
    return %c0_i32, %c0_i32_0 : i32, i32
  }
  func.func @transform_6(%arg0: i32) -> (i32, i32) {
    %c0_i32 = arith.constant 0 : i32
    %c0_i32_0 = arith.constant 0 : i32
    %c0_i32_1 = arith.constant 0 : i32
    return %c0_i32, %c0_i32_0 : i32, i32
  }
  func.func @transform_7(%arg0: i32) -> (i32, i32) {
    %c0_i32 = arith.constant 0 : i32
    %c0_i32_0 = arith.constant 0 : i32
    %c0_i32_1 = arith.constant 0 : i32
    return %c0_i32, %c0_i32_0 : i32, i32
  }
  func.func @transform_8(%arg0: i32) -> (i32, i32) {
    %c0_i32 = arith.constant 0 : i32
    %c0_i32_0 = arith.constant 0 : i32
    %c0_i32_1 = arith.constant 0 : i32
    return %c0_i32, %c0_i32_0 : i32, i32
  }
  func.func @transform_9(%arg0: i32) -> (i32, i32) {
    %c0_i32 = arith.constant 0 : i32
    %c0_i32_0 = arith.constant 0 : i32
    %c0_i32_1 = arith.constant 0 : i32
    return %c0_i32, %c0_i32_0 : i32, i32
  }
  func.func @transform_10(%arg0: i32) -> (i32, i32) {
    %c0_i32 = arith.constant 0 : i32
    %c0_i32_0 = arith.constant 0 : i32
    %c0_i32_1 = arith.constant 0 : i32
    return %c0_i32, %c0_i32_0 : i32, i32
  }
  func.func @transform_11(%arg0: i32) -> (i32, i32) {
    %c0_i32 = arith.constant 0 : i32
    %c0_i32_0 = arith.constant 0 : i32
    %c0_i32_1 = arith.constant 0 : i32
    return %c0_i32, %c0_i32_0 : i32, i32
  }
  func.func @transform_12(%arg0: i32) -> (i32, i32) {
    %c0_i32 = arith.constant 0 : i32
    %c0_i32_0 = arith.constant 0 : i32
    %c0_i32_1 = arith.constant 0 : i32
    return %c0_i32, %c0_i32_0 : i32, i32
  }
  func.func @transform_13(%arg0: i32) -> (i32, i32) {
    %c0_i32 = arith.constant 0 : i32
    %c0_i32_0 = arith.constant 0 : i32
    %c0_i32_1 = arith.constant 0 : i32
    return %c0_i32, %c0_i32_0 : i32, i32
  }
  func.func @transform_14(%arg0: i32) -> (i32, i32) {
    %c0_i32 = arith.constant 0 : i32
    %c0_i32_0 = arith.constant 0 : i32
    return %arg0, %c0_i32 : i32, i32
  }
}

</mosaic_0001>

<bundles_post_ra>
// kernel: tpu_custom_call.1
= control target key start
LH: loop header
LB: loop body
LE: loop exit
PB: predicated region body
PF: predicated region fallthrough
CT: control target
= control target key end

     0   :  { %vm166_vm0 = vcmask 130048   ;;  %vm596_vm1 = vcmask 556032   ;;  %vm1132_vm2 = vcmask 400384   ;;  %vm3870_vm3 = vmmov 0   ;;  %s6697_s0 = inlined_call_operand.vmem [shape: f32[2,64,784], index: 0, kind: input, shape index: {}]   ;;  %s6698_s1 = inlined_call_operand.vmem [shape: f32[2,128,196], index: 1, kind: input, shape index: {}]   ;;  %s6699_s2 = inlined_call_operand.vmem [shape: f32[2,256,49], index: 2, kind: input, shape index: {}]   ;;  %s6700_s4 = inlined_call_operand.vmem [shape: f32[64,128], index: 4, kind: input, shape index: {}]   ;;  %s6701_s6 = inlined_call_operand.vmem [shape: f32[128,128], index: 6, kind: input, shape index: {}]   ;;  %s6702_s8 = inlined_call_operand.vmem [shape: f32[256,128], index: 8, kind: input, shape index: {}]   ;;  %s6703_s3 = inlined_call_operand.vmem [shape: f32[2,512,16], index: 3, kind: input, shape index: {}]   ;;  %s6704_s10 = inlined_call_operand.vmem [shape: f32[512,128], index: 10, kind: input, shape index: {}]   ;;  %s6705_s5 = inlined_call_operand.vmem [shape: f32[1,128], index: 5, kind: input, shape index: {}]   ;;  %s6706_s7 = inlined_call_operand.vmem [shape: f32[1,128], index: 7, kind: input, shape index: {}]   ;;  %s6707_s12 = inlined_call_operand.vmem [shape: f32[1,512], index: 12, kind: input, shape index: {}]   ;;  %s6708_s9 = inlined_call_operand.vmem [shape: f32[1,128], index: 9, kind: input, shape index: {}]   ;;  %s6709_s13 = inlined_call_operand.<no memory space> [shape: f32[1,1], index: 13, kind: input, shape index: {}]   ;;  %s6710_s11 = inlined_call_operand.vmem [shape: f32[1,128], index: 11, kind: input, shape index: {}]   ;;  %s6711_s14 = inlined_call_operand.vmem [shape: f32[2,1], index: 14, kind: output, shape index: {}]  }
   0x1   :  { %v63_v0 = vld [vmem:[%s6697_s0 + $0x70] sm:$0xff]  ;;  %v64_v1 = vld [vmem:[%s6697_s0 + $0x78] sm:$0xff]  ;;  %v65_v2 = vld [vmem:[%s6697_s0 + $0x80] sm:$0xff]  ;;  %vm364_vm4 = vcmask 130112   ;;  %vm371_vm5 = vcmask 195712   ;;  %vm378_vm6 = vcmask 261312  }
   0x2   :  { %v180_v3 = vadd.f32 %v64_v1, %v63_v0  ;;  %v66_v4 = vld [vmem:[%s6697_s0 + $0x88] sm:$0xff]  ;;  %v49_v5 = vld [vmem:[%s6697_s0] sm:$0xff]  ;;  %v67_v7 = vld [vmem:[%s6697_s0 + $0x90] sm:$0xff]  ;;  %vm385_vm7 = vcmask 326912   ;;  %vm392_vm8 = vcmask 392512   ;;  %vm399_vm9 = vcmask 458112  }
   0x3   :  { %v50_v6 = vld [vmem:[%s6697_s0 + $0x8] sm:$0xff]  ;;  %v51_v9 = vld [vmem:[%s6697_s0 + $0x10] sm:$0xff]  ;;  %v68_v11 = vld [vmem:[%s6697_s0 + $0x98] sm:$0xff]  ;;  %vm6712_vm10 = vcmask 523712   ;;  %vm447_vm11 = vcmask 1041409   ;;  %vm449_vm12 = vcmask 523264  }
   0x4   :  { %v181_v8 = vadd.f32 %v180_v3, %v65_v2  ;;  %v161_v10 = vadd.f32 %v50_v6, %v49_v5  ;;  %v52_v12 = vld [vmem:[%s6697_s0 + $0x18] sm:$0xff]  ;;  %v70_v13 = vld [vmem:[%s6697_s0 + $0xa8] sm:$0xff]  ;;  %v69_v14 = vld [vmem:[%s6697_s0 + $0xa0] sm:$0xff]  ;;  %vm856_vm13 = vcmask 589312   ;;  %vm863_vm14 = vcmask 654912  }
   0x5   :  { %v71_v17 = vld [vmem:[%s6697_s0 + $0xb0] sm:$0xff]  ;;  %v72_v18 = vld [vmem:[%s6697_s0 + $0xb8] sm:$0xff]  ;;  %v53_v19 = vld [vmem:[%s6697_s0 + $0x20] sm:$0xff]  ;;  %v185_v28 = vsel %vm166_vm0, %v69_v14, 0.0  ;;  %vm870_vm15 = vcmask 720512  }
   0x6   :  { %v182_v15 = vadd.f32 %v181_v8, %v66_v4  ;;  %v162_v16 = vadd.f32 %v161_v10, %v51_v9  ;;  %v55_v20 = vld [vmem:[%s6697_s0 + $0x30] sm:$0xff]  ;;  %v73_v21 = vld [vmem:[%s6697_s0 + $0xc0] sm:$0xff]  ;;  %v189_v22 = vadd.f32 %v71_v17, %v70_v13  ;;  %v56_v25 = vld [vmem:[%s6697_s0 + $0x38] sm:$0xff] }
   0x7   :  { %v57_v26 = vld [vmem:[%s6697_s0 + $0x40] sm:$0xff]  ;;  %v58_v27 = vld [vmem:[%s6697_s0 + $0x48] sm:$0xff]  ;;  %v75_v35 = vld [vmem:[%s6697_s0 + $0xd0] sm:$0xff]  ;;  %v167_v39 = vsel %vm166_vm0, %v55_v20, 0.0 }
   0x8   :  { %v183_v23 = vadd.f32 %v182_v15, %v67_v7  ;;  %v163_v24 = vadd.f32 %v162_v16, %v52_v12  ;;  %v54_v29 = vld [vmem:[%s6697_s0 + $0x28] sm:$0xff]  ;;  %v190_v31 = vadd.f32 %v189_v22, %v72_v18  ;;  %v171_v32 = vadd.f32 %v57_v26, %v56_v25  ;;  %v59_v36 = vld [vmem:[%s6697_s0 + $0x50] sm:$0xff]  ;;  %v84_v37 = vld [vmem:[%s6697_s0 + $0x118] sm:$0xff] }
   0x9   :  { %v74_v30 = vld [vmem:[%s6697_s0 + $0xc8] sm:$0xff]  ;;  %v85_v38 = vld [vmem:[%s6697_s0 + $0x120] sm:$0xff]  ;;  %v76_v40 = vld [vmem:[%s6697_s0 + $0xd8] sm:$0xff] }
   0xa   :  { %v184_v33 = vadd.f32 %v183_v23, %v68_v11  ;;  %v164_v34 = vadd.f32 %v163_v24, %v53_v19  ;;  %v191_v41 = vadd.f32 %v190_v31, %v73_v21  ;;  %v60_v42 = vld [vmem:[%s6697_s0 + $0x58] sm:$0xff]  ;;  %v172_v43 = vadd.f32 %v171_v32, %v58_v27  ;;  %v86_v44 = vld [vmem:[%s6697_s0 + $0x128] sm:$0xff]  ;;  %v61_v48 = vld [vmem:[%s6697_s0 + $0x60] sm:$0xff] }
   0xb   :  { %v207_v45 = vadd.f32 %v85_v38, %v84_v37  ;;  %v87_v49 = vld [vmem:[%s6697_s0 + $0x130] sm:$0xff]  ;;  %v77_v50 = vld [vmem:[%s6697_s0 + $0xe0] sm:$0xff]  ;;  %v62_v52 = vld [vmem:[%s6697_s0 + $0x68] sm:$0xff]  ;;  %v194_v58 = vsel %vm166_vm0, %v76_v40, 0.0 }
   0xc   :  { %v186_v46 = vadd.f32 %v185_v28, %v184_v33  ;;  %v165_v47 = vadd.f32 %v164_v34, %v54_v29  ;;  %v192_v51 = vadd.f32 %v191_v41, %v74_v30  ;;  %v173_v53 = vadd.f32 %v172_v43, %v59_v36  ;;  %v78_v55 = vld [vmem:[%s6697_s0 + $0xe8] sm:$0xff]  ;;  %v79_v56 = vld [vmem:[%s6697_s0 + $0xf0] sm:$0xff]  ;;  %v88_v59 = vld [vmem:[%s6697_s0 + $0x138] sm:$0xff] }
   0xd   :  { %v208_v54 = vadd.f32 %v207_v45, %v86_v44  ;;  %v90_v60 = vld [vmem:[%s6697_s0 + $0x148] sm:$0xff]  ;;  %v80_v61 = vld [vmem:[%s6697_s0 + $0xf8] sm:$0xff]  ;;  %v198_v62 = vadd.f32 %v78_v55, %v77_v50  ;;  %v99_v3 = vld [vmem:[%s6697_s0 + $0x190] sm:$0xff]  ;;  %v176_v5 = vsel %vm166_vm0, %v62_v52, 0.0 }
   0xe   :  { %187 = vadd.xlane.f32.xlu1 %v186_v46  ;;  %v168_v57 = vadd.f32 %v167_v39, %v165_v47  ;;  %v193_v63 = vadd.f32 %v192_v51, %v75_v35  ;;  %v174_v0 = vadd.f32 %v173_v53, %v60_v42  ;;  %v98_v2 = vld [vmem:[%s6697_s0 + $0x188] sm:$0xff]  ;;  %v100_v4 = vld [vmem:[%s6697_s0 + $0x198] sm:$0xff]  ;;  %v89_v6 = vld [vmem:[%s6697_s0 + $0x140] sm:$0xff]  ;;  %v212_v17 = vsel %vm166_vm0, %v90_v60, 0.0 }
   0xf   :  { %v209_v1 = vadd.f32 %v208_v54, %v87_v49  ;;  %v81_v7 = vld [vmem:[%s6697_s0 + $0x100] sm:$0xff]  ;;  %v199_v8 = vadd.f32 %v198_v62, %v79_v56  ;;  %v225_v9 = vadd.f32 %v99_v3, %v98_v2  ;;  %v82_v13 = vld [vmem:[%s6697_s0 + $0x108] sm:$0xff]  ;;  %v91_v15 = vld [vmem:[%s6697_s0 + $0x150] sm:$0xff] }
  0x10   :  { %169 = vadd.xlane.f32.xlu0 %v168_v57  ;;  %v195_v10 = vadd.f32 %v194_v58, %v193_v63  ;;  %v175_v11 = vadd.f32 %v174_v0, %v61_v48  ;;  %v101_v14 = vld [vmem:[%s6697_s0 + $0x1a0] sm:$0xff]  ;;  %v92_v16 = vld [vmem:[%s6697_s0 + $0x158] sm:$0xff]  ;;  %v83_v18 = vld [vmem:[%s6697_s0 + $0x110] sm:$0xff] }
  0x11   :  { %v210_v12 = vadd.f32 %v209_v1, %v88_v59  ;;  %v200_v19 = vadd.f32 %v199_v8, %v80_v61  ;;  %v102_v20 = vld [vmem:[%s6697_s0 + $0x1a8] sm:$0xff]  ;;  %v226_v21 = vadd.f32 %v225_v9, %v100_v4  ;;  %v93_v22 = vld [vmem:[%s6697_s0 + $0x160] sm:$0xff]  ;;  %v216_v23 = vadd.f32 %v92_v16, %v91_v15  ;;  %v103_v26 = vld [vmem:[%s6697_s0 + $0x1b0] sm:$0xff] }
  0x12   :  { %196 = vadd.xlane.f32.xlu1 %v195_v10  ;;  %v177_v24 = vadd.f32 %v176_v5, %v175_v11  ;;  %v94_v27 = vld [vmem:[%s6697_s0 + $0x168] sm:$0xff]  ;;  %v112_v28 = vld [vmem:[%s6697_s0 + $0x1f8] sm:$0xff]  ;;  %v113_v33 = vld [vmem:[%s6697_s0 + $0x200] sm:$0xff]  ;;  %v203_v36 = vsel %vm166_vm0, %v83_v18, 0.0 }
  0x13   :  { %v211_v25 = vadd.f32 %v210_v12, %v89_v6  ;;  %v201_v29 = vadd.f32 %v200_v19, %v81_v7  ;;  %v104_v30 = vld [vmem:[%s6697_s0 + $0x1b8] sm:$0xff]  ;;  %v227_v31 = vadd.f32 %v226_v21, %v101_v14  ;;  %v217_v32 = vadd.f32 %v216_v23, %v93_v22  ;;  %v114_v34 = vld [vmem:[%s6697_s0 + $0x208] sm:$0xff]  ;;  %v95_v37 = vld [vmem:[%s6697_s0 + $0x170] sm:$0xff] }
  0x14   :  { %178 = vadd.xlane.f32.xlu0 %v177_v24  ;;  %v97_v38 = vld [vmem:[%s6697_s0 + $0x180] sm:$0xff]  ;;  %v115_v39 = vld [vmem:[%s6697_s0 + $0x210] sm:$0xff]  ;;  %v243_v40 = vadd.f32 %v113_v33, %v112_v28  ;;  %v106_v45 = vld [vmem:[%s6697_s0 + $0x1c8] sm:$0xff]  ;;  %v230_v47 = vsel %vm166_vm0, %v104_v30, 0.0 }
  0x15   :  { %v213_v35 = vadd.f32 %v212_v17, %v211_v25  ;;  %v202_v41 = vadd.f32 %v201_v29, %v82_v13  ;;  %v228_v42 = vadd.f32 %v227_v31, %v102_v20  ;;  %v218_v43 = vadd.f32 %v217_v32, %v94_v27  ;;  %v105_v44 = vld [vmem:[%s6697_s0 + $0x1c0] sm:$0xff]  ;;  %v107_v46 = vld [vmem:[%s6697_s0 + $0x1d0] sm:$0xff]  ;;  %v96_v48 = vld [vmem:[%s6697_s0 + $0x178] sm:$0xff] }
  0x16   :  { %v116_v49 = vld [vmem:[%s6697_s0 + $0x218] sm:$0xff]  ;;  %v244_v50 = vadd.f32 %v243_v40, %v114_v34  ;;  %v234_v51 = vadd.f32 %v106_v45, %v105_v44  ;;  %v117_v55 = vld [vmem:[%s6697_s0 + $0x220] sm:$0xff]  ;;  %v126_v57 = vld [vmem:[%s6697_s0 + $0x268] sm:$0xff]  ;;  %v221_v59 = vsel %vm166_vm0, %v97_v38, 0.0 }
  0x17   :  { %214 = vadd.xlane.f32.xlu1 %v213_v35  ;;  %v204_v52 = vadd.f32 %v203_v36, %v202_v41  ;;  %v229_v53 = vadd.f32 %v228_v42, %v103_v26  ;;  %v219_v54 = vadd.f32 %v218_v43, %v95_v37  ;;  %v108_v56 = vld [vmem:[%s6697_s0 + $0x1d8] sm:$0xff]  ;;  %v127_v58 = vld [vmem:[%s6697_s0 + $0x270] sm:$0xff]  ;;  %v118_v60 = vld [vmem:[%s6697_s0 + $0x228] sm:$0xff] }
  0x18   :  { %v245_v61 = vadd.f32 %v244_v50, %v115_v39  ;;  %v109_v62 = vld [vmem:[%s6697_s0 + $0x1e0] sm:$0xff]  ;;  %v235_v63 = vadd.f32 %v234_v51, %v107_v46  ;;  %v128_v0 = vld [vmem:[%s6697_s0 + $0x278] sm:$0xff]  ;;  %v261_v1 = vadd.f32 %v127_v58, %v126_v57  ;;  %v110_v4 = vld [vmem:[%s6697_s0 + $0x1e8] sm:$0xff]  ;;  %v248_v14 = vsel %vm166_vm0, %v118_v60, 0.0 }
  0x19   :  { %205 = vadd.xlane.f32.xlu0 %v204_v52  ;;  %v231_v2 = vadd.f32 %v230_v47, %v229_v53  ;;  %v220_v3 = vadd.f32 %v219_v54, %v96_v48  ;;  %v129_v5 = vld [vmem:[%s6697_s0 + $0x280] sm:$0xff]  ;;  %v119_v6 = vld [vmem:[%s6697_s0 + $0x230] sm:$0xff]  ;;  %v120_v11 = vld [vmem:[%s6697_s0 + $0x238] sm:$0xff] }
  0x1a   :  { %v246_v7 = vadd.f32 %v245_v61, %v116_v49  ;;  %v111_v8 = vld [vmem:[%s6697_s0 + $0x1f0] sm:$0xff]  ;;  %v236_v9 = vadd.f32 %v235_v63, %v108_v56  ;;  %v262_v10 = vadd.f32 %v261_v1, %v128_v0  ;;  %v121_v12 = vld [vmem:[%s6697_s0 + $0x240] sm:$0xff]  ;;  %v130_v15 = vld [vmem:[%s6697_s0 + $0x288] sm:$0xff]  ;;  %v252_v18 = vadd.f32 %v120_v11, %v119_v6 }
  0x1b   :  { %232 = vadd.xlane.f32.xlu1 %v231_v2  ;;  %v222_v13 = vadd.f32 %v221_v59, %v220_v3  ;;  %v132_v16 = vld [vmem:[%s6697_s0 + $0x298] sm:$0xff]  ;;  %v122_v17 = vld [vmem:[%s6697_s0 + $0x248] sm:$0xff]  ;;  %v141_v23 = vld [vmem:[%s6697_s0 + $0x2e0] sm:$0xff]  ;;  %v239_v25 = vsel %vm166_vm0, %v111_v8, 0.0 }
  0x1c   :  { %v247_v19 = vadd.f32 %v246_v7, %v117_v55  ;;  %v237_v20 = vadd.f32 %v236_v9, %v109_v62  ;;  %v263_v21 = vadd.f32 %v262_v10, %v129_v5  ;;  %v140_v22 = vld [vmem:[%s6697_s0 + $0x2d8] sm:$0xff]  ;;  %v142_v24 = vld [vmem:[%s6697_s0 + $0x2e8] sm:$0xff]  ;;  %v131_v26 = vld [vmem:[%s6697_s0 + $0x290] sm:$0xff]  ;;  %v253_v28 = vadd.f32 %v252_v18, %v121_v12 }
  0x1d   :  { %223 = vadd.xlane.f32.xlu0 %v222_v13  ;;  %v123_v27 = vld [vmem:[%s6697_s0 + $0x250] sm:$0xff]  ;;  %v279_v29 = vadd.f32 %v141_v23, %v140_v22  ;;  %v124_v33 = vld [vmem:[%s6697_s0 + $0x258] sm:$0xff]  ;;  %v133_v35 = vld [vmem:[%s6697_s0 + $0x2a0] sm:$0xff]  ;;  %v266_v37 = vsel %vm166_vm0, %v132_v16, 0.0 }
  0x1e   :  { %v249_v30 = vadd.f32 %v248_v14, %v247_v19  ;;  %v238_v31 = vadd.f32 %v237_v20, %v110_v4  ;;  %v264_v32 = vadd.f32 %v263_v21, %v130_v15  ;;  %v143_v34 = vld [vmem:[%s6697_s0 + $0x2f0] sm:$0xff]  ;;  %v134_v36 = vld [vmem:[%s6697_s0 + $0x2a8] sm:$0xff]  ;;  %v125_v38 = vld [vmem:[%s6697_s0 + $0x260] sm:$0xff]  ;;  %v254_v39 = vadd.f32 %v253_v28, %v122_v17 }
  0x1f   :  { %v144_v40 = vld [vmem:[%s6697_s0 + $0x2f8] sm:$0xff]  ;;  %v280_v41 = vadd.f32 %v279_v29, %v142_v24  ;;  %v135_v42 = vld [vmem:[%s6697_s0 + $0x2b0] sm:$0xff]  ;;  %v270_v43 = vadd.f32 %v134_v36, %v133_v35  ;;  %v145_v46 = vld [vmem:[%s6697_s0 + $0x300] sm:$0xff]  ;;  %v257_v56 = vsel %vm166_vm0, %v125_v38, 0.0 }
  0x20   :  { %250 = vadd.xlane.f32.xlu1 %v249_v30  ;;  %v240_v44 = vadd.f32 %v239_v25, %v238_v31  ;;  %v265_v45 = vadd.f32 %v264_v32, %v131_v26  ;;  %v136_v47 = vld [vmem:[%s6697_s0 + $0x2b8] sm:$0xff]  ;;  %v154_v48 = vld [vmem:[%s6697_s0 + $0x348] sm:$0xff]  ;;  %v255_v49 = vadd.f32 %v254_v39, %v123_v27  ;;  %v155_v53 = vld [vmem:[%s6697_s0 + $0x350] sm:$0xff] }
  0x21   :  { %v146_v50 = vld [vmem:[%s6697_s0 + $0x308] sm:$0xff]  ;;  %v281_v51 = vadd.f32 %v280_v41, %v143_v34  ;;  %v271_v52 = vadd.f32 %v270_v43, %v135_v42  ;;  %v156_v54 = vld [vmem:[%s6697_s0 + $0x358] sm:$0xff]  ;;  %v137_v57 = vld [vmem:[%s6697_s0 + $0x2c0] sm:$0xff]  ;;  %v297_v60 = vadd.f32 %v155_v53, %v154_v48 }
  0x22   :  { %241 = vadd.xlane.f32.xlu0 %v240_v44  ;;  %v267_v55 = vadd.f32 %v266_v37, %v265_v45  ;;  %v139_v58 = vld [vmem:[%s6697_s0 + $0x2d0] sm:$0xff]  ;;  %v157_v59 = vld [vmem:[%s6697_s0 + $0x360] sm:$0xff]  ;;  %v256_v61 = vadd.f32 %v255_v49, %v124_v33  ;;  %v148_v1 = vld [vmem:[%s6697_s0 + $0x318] sm:$0xff]  ;;  %v284_v3 = vsel %vm166_vm0, %v146_v50, 0.0 }
  0x23   :  { %v282_v62 = vadd.f32 %v281_v51, %v144_v40  ;;  %v272_v63 = vadd.f32 %v271_v52, %v136_v47  ;;  %v147_v0 = vld [vmem:[%s6697_s0 + $0x310] sm:$0xff]  ;;  %v149_v2 = vld [vmem:[%s6697_s0 + $0x320] sm:$0xff]  ;;  %v138_v4 = vld [vmem:[%s6697_s0 + $0x2c8] sm:$0xff]  ;;  %v298_v5 = vadd.f32 %v297_v60, %v156_v54  ;;  %v275_v12 = vsel %vm166_vm0, %v139_v58, 0.0 }
  0x24   :  { %268 = vadd.xlane.f32.xlu1 %v267_v55  ;;  %v288_v6 = vadd.f32 %v148_v1, %v147_v0  ;;  %v258_v7 = vadd.f32 %v257_v56, %v256_v61  ;;  %v158_v10 = vld [vmem:[%s6697_s0 + $0x368] sm:$0xff]  ;;  %v160_v13 = vld [vmem:[%s6697_s0 + $0x378] sm:$0xff]  ;;  %v159_v18 = vld [vmem:[%s6697_s0 + $0x370] sm:$0xff] }
  0x25   :  { %v283_v8 = vadd.f32 %v282_v62, %v145_v46  ;;  %v273_v9 = vadd.f32 %v272_v63, %v137_v57  ;;  %v150_v11 = vld [vmem:[%s6697_s0 + $0x328] sm:$0xff]  ;;  %v299_v14 = vadd.f32 %v298_v5, %v157_v59  ;;  %v151_v19 = vld [vmem:[%s6697_s0 + $0x330] sm:$0xff]  ;;  %v153_v21 = vld [vmem:[%s6697_s0 + $0x340] sm:$0xff]  ;;  %v302_v25 = vsel %vm166_vm0, %v160_v13, 0.0 }
  0x26   :  { %v289_v15 = vadd.f32 %v288_v6, %v149_v2  ;;  %259 = vadd.xlane.f32.xlu0 %v258_v7  ;;  %v535_v23 = vld [vmem:[%s6698_s1 + $0x18] sm:$0xff]  ;;  %v533_v29 = vld [vmem:[%s6698_s1 + $0x8] sm:$0xff]  ;;  %v293_v30 = vsel %vm166_vm0, %v153_v21, 0.0  ;;  %v534_v31 = vld [vmem:[%s6698_s1 + $0x10] sm:$0xff] }
  0x27   :  { %v285_v16 = vadd.f32 %v284_v3, %v283_v8  ;;  %v274_v17 = vadd.f32 %v273_v9, %v138_v4  ;;  %v300_v20 = vadd.f32 %v299_v14, %v158_v10  ;;  %v152_v26 = vld [vmem:[%s6697_s0 + $0x338] sm:$0xff]  ;;  %v601_v32 = vsel %vm596_vm1, %v535_v23, 0.0  ;;  %v532_v36 = vld [vmem:[%s6698_s1] sm:$0xff]  ;;  %v537_v40 = vld [vmem:[%s6698_s1 + $0x28] sm:$0xff] }
  0x28   :  { %v290_v22 = vadd.f32 %v289_v15, %v150_v11  ;;  %v539_v35 = vld [vmem:[%s6698_s1 + $0x38] sm:$0xff]  ;;  %v597_v37 = vsel %vm596_vm1, %v533_v29, 0.0  ;;  %v602_v39 = vadd.f32 %v601_v32, %v534_v31  ;;  %v538_v41 = vld [vmem:[%s6698_s1 + $0x30] sm:$0xff]  ;;  %v536_v45 = vld [vmem:[%s6698_s1 + $0x20] sm:$0xff]  ;;  %v605_v46 = vsel %vm596_vm1, %v537_v40, 0.0 }
  0x29   :  { %286 = vadd.xlane.f32.xlu1 %v285_v16  ;;  %v276_v24 = vadd.f32 %v275_v12, %v274_v17  ;;  %v301_v27 = vadd.f32 %v300_v20, %v159_v18  ;;  %v609_v42 = vsel %vm596_vm1, %v539_v35, 0.0  ;;  %v598_v43 = vadd.f32 %v597_v37, %v532_v36  ;;  %v543_v44 = vld [vmem:[%s6698_s1 + $0x58] sm:$0xff]  ;;  %v541_v48 = vld [vmem:[%s6698_s1 + $0x48] sm:$0xff]  ;;  %v542_v49 = vld [vmem:[%s6698_s1 + $0x50] sm:$0xff] }
  0x2a   :  { %v291_v28 = vadd.f32 %v290_v22, %v151_v19  ;;  %v610_v47 = vadd.f32 %v609_v42, %v538_v41  ;;  %v617_v50 = vsel %vm596_vm1, %v543_v44, 0.0  ;;  %v606_v51 = vadd.f32 %v605_v46, %v536_v45  ;;  %v547_v52 = vld [vmem:[%s6698_s1 + $0x78] sm:$0xff]  ;;  %v540_v53 = vld [vmem:[%s6698_s1 + $0x40] sm:$0xff]  ;;  %v545_v56 = vld [vmem:[%s6698_s1 + $0x68] sm:$0xff] }
  0x2b   :  { %277 = vadd.xlane.f32.xlu0 %v276_v24  ;;  %v303_v33 = vadd.f32 %v302_v25, %v301_v27  ;;  %v613_v54 = vsel %vm596_vm1, %v541_v48, 0.0  ;;  %v618_v55 = vadd.f32 %v617_v50, %v542_v49  ;;  %v574_v57 = vld [vmem:[%s6698_s1 + $0x150] sm:$0xff]  ;;  %v575_v58 = vld [vmem:[%s6698_s1 + $0x158] sm:$0xff]  ;;  %v625_v60 = vsel %vm596_vm1, %v547_v52, 0.0  ;;  %v549_v0 = vld [vmem:[%s6698_s1 + $0x88] sm:$0xff] }
  0x2c   :  { %v292_v34 = vadd.f32 %v291_v28, %v152_v26  ;;  %v546_v59 = vld [vmem:[%s6698_s1 + $0x70] sm:$0xff]  ;;  %v681_v61 = vsel %vm596_vm1, %v575_v58, 0.0  ;;  %v614_v62 = vadd.f32 %v613_v54, %v540_v53  ;;  %v551_v63 = vld [vmem:[%s6698_s1 + $0x98] sm:$0xff]  ;;  %v544_v2 = vld [vmem:[%s6698_s1 + $0x60] sm:$0xff]  ;;  %v621_v3 = vsel %vm596_vm1, %v545_v56, 0.0 }
  0x2d   :  { %304 = vadd.xlane.f32.xlu1 %v303_v33  ;;  %v4364_v1 = vadd.f32 %v681_v61, %v574_v57  ;;  %v576_v4 = vld [vmem:[%s6698_s1 + $0x160] sm:$0xff]  ;;  %v577_v5 = vld [vmem:[%s6698_s1 + $0x168] sm:$0xff]  ;;  %v626_v6 = vadd.f32 %v625_v60, %v546_v59  ;;  %v555_v7 = vld [vmem:[%s6698_s1 + $0xb8] sm:$0xff]  ;;  %v633_v12 = vsel %vm596_vm1, %v551_v63, 0.0  ;;  %v629_v14 = vsel %vm596_vm1, %v549_v0, 0.0 }
  0x2e   :  { %v294_v38 = vadd.f32 %v293_v30, %v292_v34  ;;  %v685_v8 = vsel %vm596_vm1, %v577_v5, 0.0  ;;  %v578_v9 = vld [vmem:[%s6698_s1 + $0x170] sm:$0xff]  ;;  %v579_v10 = vld [vmem:[%s6698_s1 + $0x178] sm:$0xff]  ;;  %v548_v13 = vld [vmem:[%s6698_s1 + $0x80] sm:$0xff]  ;;  %v622_v17 = vadd.f32 %v621_v3, %v544_v2  ;;  %v641_v22 = vsel %vm596_vm1, %v555_v7, 0.0 }
  0x2f   :  { %v550_v11 = vld [vmem:[%s6698_s1 + $0x90] sm:$0xff]  ;;  %v4394_v15 = vadd.f32 %v685_v8, %v576_v4  ;;  %v689_v16 = vsel %vm596_vm1, %v579_v10, 0.0  ;;  %v553_v18 = vld [vmem:[%s6698_s1 + $0xa8] sm:$0xff]  ;;  %v559_v23 = vld [vmem:[%s6698_s1 + $0xd8] sm:$0xff]  ;;  %v630_v29 = vadd.f32 %v629_v14, %v548_v13  ;;  %v3869_v14 = vmov 0.0|0.0  }
  0x30   :  { %295 = vadd.xlane.f32.xlu0 %v294_v38  ;;  %v4400_v19 = vadd.f32 %v689_v16, %v578_v9  ;;  %v1074_v20 = vld [vmem:[%s6699_s2 + $0x30] sm:$0xff]  ;;  %v580_v25 = vld [vmem:[%s6698_s1 + $0x180] sm:$0xff]  ;;  %v581_v26 = vld [vmem:[%s6698_s1 + $0x188] sm:$0xff]  ;;  %v634_v28 = vadd.f32 %v633_v12, %v550_v11  ;;  %v637_v37 = vsel %vm596_vm1, %v553_v18, 0.0  ;;  %v649_v59 = vsel %vm596_vm1, %v559_v23, 0.0  ;;  %3734 = vmatprep.subr.bf16.mxu0 %v3869_v14 }
  0x31   :  { %603 = vadd.xlane.f32.xlu1 %v602_v39  ;;  %v554_v21 = vld [vmem:[%s6698_s1 + $0xb0] sm:$0xff]  ;;  %v4413_v24 = vsel %vm1132_vm2, %v1074_v20, 0.0  ;;  %v557_v30 = vld [vmem:[%s6698_s1 + $0xc8] sm:$0xff]  ;;  %v693_v31 = vsel %vm596_vm1, %v581_v26, 0.0  ;;  %v1091_v33 = vld [vmem:[%s6699_s2 + $0xb8] sm:$0xff]  ;;  %3746 = vmatprep.subr.bf16.mxu1 %v3869_v14 }
  0x32   :  { %v1106_v27 = vld [vmem:[%s6699_s2 + $0x130] sm:$0xff]  ;;  %v583_v35 = vld [vmem:[%s6698_s1 + $0x198] sm:$0xff]  ;;  %v552_v36 = vld [vmem:[%s6698_s1 + $0xa0] sm:$0xff]  ;;  %v4444_v38 = vadd.f32 %v693_v31, %v580_v25  ;;  %v4447_v39 = vsel %vm1132_vm2, %v1091_v33, 0.0  ;;  %v642_v58 = vadd.f32 %v641_v22, %v554_v21  ;;  %v645_v3 = vsel %vm596_vm1, %v557_v30, 0.0 }
  0x33   :  { %v4429_v32 = vsel %vm1132_vm2, %v1106_v27, 0.0  ;;  %v582_v34 = vld [vmem:[%s6698_s1 + $0x190] sm:$0xff]  ;;  %v697_v40 = vsel %vm596_vm1, %v583_v35, 0.0  ;;  %v1123_v41 = vld [vmem:[%s6699_s2 + $0x1b8] sm:$0xff]  ;;  %v1092_v42 = vld [vmem:[%s6699_s2 + $0xc0] sm:$0xff]  ;;  %v638_v9 = vadd.f32 %v637_v37, %v552_v36 }
  0x34   :  { %599 = vadd.xlane.f32.xlu0 %v598_v43  ;;  %v1075_v43 = vld [vmem:[%s6699_s2 + $0x38] sm:$0xff]  ;;  %v4459_v44 = vadd.f32 %v697_v40, %v582_v34  ;;  %v4462_v45 = vsel %vm1132_vm2, %v1123_v41, 0.0  ;;  %v4465_v46 = vsel %vm1132_vm2, %v1092_v42, 0.0  ;;  %v1124_v48 = vld [vmem:[%s6699_s2 + $0x1c0] sm:$0xff]  ;;  %v585_v56 = vld [vmem:[%s6698_s1 + $0x1a8] sm:$0xff] }
  0x35   :  { %611 = vadd.xlane.f32.xlu1 %v610_v47  ;;  %v4468_v47 = vsel %vm1132_vm2, %v1075_v43, 0.0  ;;  %v1107_v49 = vld [vmem:[%s6699_s2 + $0x138] sm:$0xff]  ;;  %v1076_v50 = vld [vmem:[%s6699_s2 + $0x40] sm:$0xff]  ;;  %v4483_v52 = vsel %vm1132_vm2, %v1124_v48, 0.0  ;;  %v701_v61 = vsel %vm596_vm1, %v585_v56, 0.0  ;;  %v1093_v63 = vld [vmem:[%s6699_s2 + $0xc8] sm:$0xff] }
  0x36   :  { %v4486_v53 = vsel %vm1132_vm2, %v1107_v49, 0.0  ;;  %v4489_v54 = vsel %vm1132_vm2, %v1076_v50, 0.0  ;;  %v1108_v57 = vld [vmem:[%s6699_s2 + $0x140] sm:$0xff]  ;;  %v567_v60 = vld [vmem:[%s6698_s1 + $0x118] sm:$0xff]  ;;  %v586_v0 = vld [vmem:[%s6698_s1 + $0x1b0] sm:$0xff]  ;;  %v4521_v5 = vsel %vm1132_vm2, %v1093_v63, 0.0 }
  0x37   :  { %v556_v2 = vld [vmem:[%s6698_s1 + $0xc0] sm:$0xff]  ;;  %v1125_v7 = vld [vmem:[%s6699_s2 + $0x1c8] sm:$0xff]  ;;  %v1094_v8 = vld [vmem:[%s6699_s2 + $0xd0] sm:$0xff]  ;;  %v665_v35 = vsel %vm596_vm1, %v567_v60, 0.0  ;;  %v3871_v43 = vmov 0.0  }
  0x38   :  { %607 = vadd.xlane.f32.xlu0 %v606_v51  ;;  %v558_v51 = vld [vmem:[%s6698_s1 + $0xd0] sm:$0xff]  ;;  %v565_v10 = vld [vmem:[%s6698_s1 + $0x108] sm:$0xff]  ;;  %v4537_v12 = vsel %vm1132_vm2, %v1125_v7, 0.0  ;;  %v322_v16 = vld [vmem:[%s6700_s4] sm:$0xff]  ;;  %v4555_v21 = vsel %vm1132_vm2, %v1094_v8, 0.0  ;;  %3696 = vmatprep.mubr.msk.f32.mxu0 %vm3870_vm3, %v3871_v43  ;;  %v646_v48 = vadd.f32 %v645_v3, %v556_v2 }
  0x39   :  { %619 = vadd.xlane.f32.xlu1 %v618_v55  ;;  %v584_v55 = vld [vmem:[%s6698_s1 + $0x1a0] sm:$0xff]  ;;  %v1077_v13 = vld [vmem:[%s6699_s2 + $0x48] sm:$0xff]  ;;  %v566_v18 = vld [vmem:[%s6698_s1 + $0x110] sm:$0xff]  ;;  %v661_v56 = vsel %vm596_vm1, %v565_v10, 0.0  ;;  %3731 = vmatprep.mubr.msk.f32.mxu1 %vm3870_vm3, %v3871_v43  ;;  %vm891_vm3 = vcmask 917312  }
  0x3a   :  { %v4518_v4 = vadd.f32 %v701_v61, %v584_v55  ;;  %v4558_v22 = vsel %vm1132_vm2, %v1077_v13, 0.0  ;;  %v1126_v25 = vld [vmem:[%s6699_s2 + $0x1d0] sm:$0xff]  ;;  %v1109_v26 = vld [vmem:[%s6699_s2 + $0x148] sm:$0xff]  ;;  %v325_v31 = vld [vmem:[%s6700_s4 + $0x18] sm:$0xff] }
  0x3b   :  { %v324_v27 = vld [vmem:[%s6700_s4 + $0x10] sm:$0xff]  ;;  %v4574_v30 = vsel %vm1132_vm2, %v1109_v26, 0.0  ;;  %v588_v34 = vld [vmem:[%s6698_s1 + $0x1c0] sm:$0xff]  ;;  %v589_v40 = vld [vmem:[%s6698_s1 + $0x1c8] sm:$0xff] }
  0x3c   :  { %615 = vadd.xlane.f32.xlu0 %v614_v62  ;;  %v4506_v62 = vsel %vm1132_vm2, %v1108_v57, 0.0  ;;  %v1078_v33 = vld [vmem:[%s6699_s2 + $0x50] sm:$0xff]  ;;  %v3738_v36 = vpack.c.bf16 %v325_v31, %v324_v27  ;;  %v326_v41 = vld [vmem:[%s6700_s4 + $0x20] sm:$0xff]  ;;  %v327_v42 = vld [vmem:[%s6700_s4 + $0x28] sm:$0xff]  ;;  %v709_v50 = vsel %vm596_vm1, %v589_v40, 0.0 }
  0x3d   :  { %627 = vadd.xlane.f32.xlu1 %v626_v6  ;;  %v587_v6 = vld [vmem:[%s6698_s1 + $0x1b8] sm:$0xff]  ;;  %v4587_v37 = vsel %vm1132_vm2, %v1078_v33, 0.0  ;;  %v564_v49 = vld [vmem:[%s6698_s1 + $0x100] sm:$0xff]  ;;  %v569_v57 = vld [vmem:[%s6698_s1 + $0x128] sm:$0xff]  ;;  %v3741_v3 = vpack.c.bf16 %v327_v42, %v326_v41 }
  0x3e   :  { %v705_v11 = vsel %vm596_vm1, %v587_v6, 0.0  ;;  %v1095_v55 = vld [vmem:[%s6699_s2 + $0xd8] sm:$0xff]  ;;  %v590_v61 = vld [vmem:[%s6698_s1 + $0x1d0] sm:$0xff]  ;;  %v1084_v2 = vld [vmem:[%s6699_s2 + $0x80] sm:$0xff] }
  0x3f   :  { %v4552_v20 = vadd.f32 %v705_v11, %v586_v0  ;;  %v4620_v60 = vsel %vm1132_vm2, %v1095_v55, 0.0  ;;  %v591_v63 = vld [vmem:[%s6698_s1 + $0x1d8] sm:$0xff]  ;;  %v666_v0 = vadd.f32 %v665_v35, %v566_v18  ;;  %v1096_v8 = vld [vmem:[%s6699_s2 + $0xe0] sm:$0xff]  ;;  %v328_v10 = vld [vmem:[%s6700_s4 + $0x30] sm:$0xff]  ;;  %v669_v35 = vsel %vm596_vm1, %v569_v57, 0.0 }
  0x40   :  { %623 = vadd.xlane.f32.xlu0 %v622_v17  ;;  %v323_v17 = vld [vmem:[%s6700_s4 + $0x8] sm:$0xff]  ;;  %v713_v6 = vsel %vm596_vm1, %v591_v63, 0.0  ;;  %v1127_v7 = vld [vmem:[%s6699_s2 + $0x1d8] sm:$0xff]  ;;  %v1128_v18 = vld [vmem:[%s6699_s2 + $0x1e0] sm:$0xff] }
  0x41   :  { %635 = vadd.xlane.f32.xlu1 %v634_v28  ;;  %v3735_v23 = vpack.c.bf16 %v323_v17, %v322_v16  ;;  %v650_v28 = vadd.f32 %v649_v59, %v558_v51  ;;  %v1110_v51 = vld [vmem:[%s6699_s2 + $0x150] sm:$0xff]  ;;  %v4645_v11 = vadd.f32 %v713_v6, %v590_v61  ;;  %v4648_v13 = vsel %vm1132_vm2, %v1127_v7, 0.0  ;;  %v329_v26 = vld [vmem:[%s6700_s4 + $0x38] sm:$0xff]  ;;  %v593_v31 = vld [vmem:[%s6698_s1 + $0x1e8] sm:$0xff] }
  0x42   :  { %v4617_v59 = vsel %vm1132_vm2, %v1110_v51, 0.0  ;;  %v4651_v16 = vsel %vm1132_vm2, %v1096_v8, 0.0  ;;  %v4667_v27 = vsel %vm1132_vm2, %v1128_v18, 0.0  ;;  %v561_v33 = vld [vmem:[%s6698_s1 + $0xe8] sm:$0xff]  ;;  %v717_v40 = vsel %vm596_vm1, %v593_v31, 0.0  ;;  %v560_v41 = vld [vmem:[%s6698_s1 + $0xe0] sm:$0xff] }
  0x43   :  { %3736 = vmatpush3.bf16.msra.mxu0 %v3735_v23  ;;  %v1111_v23 = vld [vmem:[%s6699_s2 + $0x158] sm:$0xff]  ;;  %v653_v42 = vsel %vm596_vm1, %v561_v33, 0.0  ;;  %v1116_v55 = vld [vmem:[%s6699_s2 + $0x180] sm:$0xff]  ;;  %v1085_v57 = vld [vmem:[%s6699_s2 + $0x88] sm:$0xff] }
  0x44   :  { %631 = vadd.xlane.f32.xlu0 %v630_v29  ;;  %v4571_v29 = vsel %vm1132_vm2, %v1126_v25, 0.0  ;;  %3737 = vmatprep.subr.bf16.mxu0 %v3869_v14  ;;  %v662_v25 = vadd.f32 %v661_v56, %v564_v49  ;;  %v1181_v49 = vsel %vm1132_vm2, %v1084_v2, 0.0  ;;  %v571_v56 = vld [vmem:[%s6698_s1 + $0x138] sm:$0xff]  ;;  %v1097_v61 = vld [vmem:[%s6699_s2 + $0xe8] sm:$0xff]  ;;  %v1080_v63 = vld [vmem:[%s6699_s2 + $0x60] sm:$0xff]  ;;  %v1184_v8 = vsel %vm1132_vm2, %v1085_v57, 0.0 }
  0x45   :  { %643 = vadd.xlane.f32.xlu1 %v642_v58  ;;  %v4614_v58 = vadd.f32 %v709_v50, %v588_v34  ;;  %v568_v34 = vld [vmem:[%s6698_s1 + $0x120] sm:$0xff]  ;;  %v3744_v50 = vpack.c.bf16 %v329_v26, %v328_v10  ;;  %v570_v2 = vld [vmem:[%s6698_s1 + $0x130] sm:$0xff]  ;;  %v4717_v6 = vsel %vm1132_vm2, %v1097_v61, 0.0  ;;  %v4720_v7 = vsel %vm1132_vm2, %v1080_v63, 0.0  ;;  %v1117_v10 = vld [vmem:[%s6699_s2 + $0x188] sm:$0xff] }
  0x46   :  { %v670_v51 = vadd.f32 %v669_v35, %v568_v34  ;;  %v1129_v18 = vld [vmem:[%s6699_s2 + $0x1e8] sm:$0xff]  ;;  %v595_v33 = vld [vmem:[%s6698_s1 + $0x1f8] sm:$0xff]  ;;  %v1280_v35 = vsel %vm1132_vm2, %v1117_v10, 0.0  ;;  %v1086_v61 = vld [vmem:[%s6699_s2 + $0x90] sm:$0xff] }
  0x47   :  { %3739 = vmatpush3.bf16.msra.mxu0 %v3738_v36  ;;  %v592_v36 = vld [vmem:[%s6698_s1 + $0x1e0] sm:$0xff]  ;;  %v1069_v31 = vld [vmem:[%s6699_s2 + $0x8] sm:$0xff]  ;;  %v563_v34 = vld [vmem:[%s6698_s1 + $0xf8] sm:$0xff]  ;;  %v1187_v10 = vsel %vm1132_vm2, %v1086_v61, 0.0 }
  0x48   :  { %639 = vadd.xlane.f32.xlu0 %v638_v9  ;;  %v1079_v9 = vld [vmem:[%s6699_s2 + $0x58] sm:$0xff]  ;;  %3740 = vmatprep.subr.bf16.mxu0 %v3869_v14  ;;  %v4690_v43 = vadd.f32 %v717_v40, %v592_v36  ;;  %v594_v36 = vld [vmem:[%s6698_s1 + $0x1f0] sm:$0xff]  ;;  %v721_v40 = vsel %vm596_vm1, %v595_v33, 0.0  ;;  %v1113_v33 = vld [vmem:[%s6699_s2 + $0x168] sm:$0xff] }
  0x49   :  { %651 = vadd.xlane.f32.xlu1 %v650_v28  ;;  %v4654_v17 = vsel %vm1132_vm2, %v1079_v9, 0.0  ;;  %v4670_v28 = vsel %vm1132_vm2, %v1111_v23, 0.0  ;;  %v1112_v23 = vld [vmem:[%s6699_s2 + $0x160] sm:$0xff]  ;;  %v1098_v63 = vld [vmem:[%s6699_s2 + $0xf0] sm:$0xff] }
  0x4a   :  { %v4736_v26 = vsel %vm1132_vm2, %v1112_v23, 0.0  ;;  %v573_v23 = vld [vmem:[%s6698_s1 + $0x148] sm:$0xff] }
  0x4b   :  { %3742 = vmatpush3.bf16.msra.mxu0 %v3741_v3  ;;  %v673_v3 = vsel %vm596_vm1, %v571_v56, 0.0  ;;  %v1100_v56 = vld [vmem:[%s6699_s2 + $0x100] sm:$0xff] }
  0x4c   :  { %647 = vadd.xlane.f32.xlu0 %v646_v48  ;;  %v4692_v48 = vadd.f32 %v653_v42, %v560_v41  ;;  %3743 = vmatprep.subr.bf16.mxu0 %v3869_v14  ;;  %v674_v9 = vadd.f32 %v673_v3, %v570_v2  ;;  %v562_v41 = vld [vmem:[%s6698_s1 + $0xf0] sm:$0xff]  ;;  %v657_v42 = vsel %vm596_vm1, %v563_v34, 0.0  ;;  %v1229_v2 = vsel %vm1132_vm2, %v1100_v56, 0.0 }
  0x4d   :  { %667 = vadd.xlane.f32.xlu1 %v666_v0  ;;  %v1277_v0 = vsel %vm1132_vm2, %v1116_v55, 0.0  ;;  %v4762_v55 = vadd.f32 %v657_v42, %v562_v41  ;;  %v4779_v3 = vsel %vm1132_vm2, %v1098_v63, 0.0  ;;  %v572_v42 = vld [vmem:[%s6698_s1 + $0x140] sm:$0xff]  ;;  %v1082_v56 = vld [vmem:[%s6699_s2 + $0x70] sm:$0xff] }
  0x4e   :  { %v4826_v63 = vsel %vm1132_vm2, %v1082_v56, 0.0  ;;  %v1088_v56 = vld [vmem:[%s6699_s2 + $0xa0] sm:$0xff] }
  0x4f   :  { %3745 = vmatpush3.bf16.msra.mxu0 %v3744_v50  ;;  %v4759_v50 = vadd.f32 %v721_v40, %v594_v36  ;;  %v4805_v36 = vsel %vm1132_vm2, %v1113_v33, 0.0  ;;  %v1070_v40 = vld [vmem:[%s6699_s2 + $0x10] sm:$0xff] }
  0x50   :  { %663 = vadd.xlane.f32.xlu0 %v662_v25  ;;  %v4733_v25 = vsel %vm1132_vm2, %v1129_v18, 0.0  ;;  %v1101_v18 = vld [vmem:[%s6699_s2 + $0x108] sm:$0xff] }
  0x51   :  { %1182 = vadd.xlane.f32.xlu1 %v1181_v49  ;;  %v1068_v49 = vld [vmem:[%s6699_s2] sm:$0xff]  ;;  %v1232_v41 = vsel %vm1132_vm2, %v1101_v18, 0.0  ;;  %v1114_v18 = vld [vmem:[%s6699_s2 + $0x170] sm:$0xff] }
  0x52   :  { %v1133_v57 = vsel %vm1132_vm2, %v1068_v49, 0.0  ;;  %v677_v49 = vsel %vm596_vm1, %v573_v23, 0.0  ;;  %v4845_v33 = vsel %vm1132_vm2, %v1114_v18, 0.0  ;;  %v1103_v18 = vld [vmem:[%s6699_s2 + $0x118] sm:$0xff]  ;;  %vm877_vm1 = vcmask 786112  }
  0x54   :  { %671 = vadd.xlane.f32.xlu0 %v670_v51  ;;  %v1136_v51 = vsel %vm1132_vm2, %v1069_v31, 0.0  ;;  %v1130_v31 = vld [vmem:[%s6699_s2 + $0x1f0] sm:$0xff] }
  0x55   :  { %1278 = vadd.xlane.f32.xlu1 %v1277_v0  ;;  %v1081_v0 = vld [vmem:[%s6699_s2 + $0x68] sm:$0xff] }
  0x58   :  { %1185 = vadd.xlane.f32.xlu0 %v1184_v8  ;;  %v4782_v8 = vsel %vm1132_vm2, %v1081_v0, 0.0  ;;  %v678_v0 = vadd.f32 %v677_v49, %v572_v42  ;;  %v1083_v42 = vld [vmem:[%s6699_s2 + $0x78] sm:$0xff] }
  0x59   :  { %675 = vadd.xlane.f32.xlu1 %v674_v9  ;;  %v1118_v9 = vld [vmem:[%s6699_s2 + $0x190] sm:$0xff] }
  0x5a   :  { %v1283_v34 = vsel %vm1132_vm2, %v1118_v9, 0.0  ;;  %v1087_v9 = vld [vmem:[%s6699_s2 + $0x98] sm:$0xff] }
  0x5c   :  { %1281 = vadd.xlane.f32.xlu0 %v1280_v35  ;;  %v4802_v35 = vsel %vm1132_vm2, %v1130_v31, 0.0 }
  0x5d   :  { %1137 = vadd.xlane.f32.xlu1 %v1136_v51  ;;  %v1099_v51 = vld [vmem:[%s6699_s2 + $0xf8] sm:$0xff] }
  0x5e   :  { %v4823_v61 = vsel %vm1132_vm2, %v1099_v51, 0.0  ;;  %v4861_v51 = vsel %vm1132_vm2, %v1083_v42, 0.0  ;;  %v1089_v42 = vld [vmem:[%s6699_s2 + $0xa8] sm:$0xff] }
  0x60   :  { %1134 = vadd.xlane.f32.xlu0 %v1133_v57  ;;  %v1139_v57 = vsel %vm1132_vm2, %v1070_v40, 0.0  ;;  %v1119_v40 = vld [vmem:[%s6699_s2 + $0x198] sm:$0xff] }
  0x61   :  { %1230 = vadd.xlane.f32.xlu1 %v1229_v2  ;;  %v1102_v2 = vld [vmem:[%s6699_s2 + $0x110] sm:$0xff] }
  0x62   :  { %v1235_v23 = vsel %vm1132_vm2, %v1102_v2, 0.0  ;;  %v1193_v2 = vsel %vm1132_vm2, %v1088_v56, 0.0 }
  0x64   :  { %1188 = vadd.xlane.f32.xlu0 %v1187_v10  ;;  %v1131_v10 = vld [vmem:[%s6699_s2 + $0x1f8] sm:$0xff] }
  0x65   :  { %1284 = vadd.xlane.f32.xlu1 %v1283_v34  ;;  %v4842_v31 = vsel %vm1132_vm2, %v1131_v10, 0.0  ;;  %v1190_v34 = vsel %vm1132_vm2, %v1087_v9, 0.0  ;;  %v1120_v9 = vld [vmem:[%s6699_s2 + $0x1a0] sm:$0xff] }
  0x68   :  { %1233 = vadd.xlane.f32.xlu0 %v1232_v41  ;;  %v1115_v41 = vld [vmem:[%s6699_s2 + $0x178] sm:$0xff] }
  0x69   :  { %1140 = vadd.xlane.f32.xlu1 %v1139_v57  ;;  %v4858_v49 = vsel %vm1132_vm2, %v1115_v41, 0.0  ;;  %v1286_v57 = vsel %vm1132_vm2, %v1119_v40, 0.0  ;;  %v1104_v41 = vld [vmem:[%s6699_s2 + $0x120] sm:$0xff] }
  0x6a   :  { %v1241_v56 = vsel %vm1132_vm2, %v1104_v41, 0.0 }
  0x6c   :  { %679 = vadd.xlane.f32.xlu0 %v678_v0  ;;  %v1071_v0 = vld [vmem:[%s6699_s2 + $0x18] sm:$0xff] }
  0x6d   :  { %1236 = vadd.xlane.f32.xlu1 %v1235_v23  ;;  %v1142_v10 = vsel %vm1132_vm2, %v1071_v0, 0.0  ;;  %v1072_v23 = vld [vmem:[%s6699_s2 + $0x20] sm:$0xff]  ;;  %v1121_v0 = vld [vmem:[%s6699_s2 + $0x1a8] sm:$0xff] }
  0x6e   :  { %v1145_v40 = vsel %vm1132_vm2, %v1072_v23, 0.0  ;;  %v1105_v23 = vld [vmem:[%s6699_s2 + $0x128] sm:$0xff] }
  0x70   :  { %1191 = vadd.xlane.f32.xlu0 %v1190_v34  ;;  %v1238_v34 = vsel %vm1132_vm2, %v1103_v18, 0.0  ;;  %v1122_v18 = vld [vmem:[%s6699_s2 + $0x1b0] sm:$0xff] }
  0x71   :  { %683 = vadd.xlane.f32.xlu1 %v4364_v1  ;;  %v1289_v1 = vsel %vm1132_vm2, %v1120_v9, 0.0  ;;  %v1292_v9 = vsel %vm1132_vm2, %v1121_v0, 0.0 }
  0x74   :  { %1287 = vadd.xlane.f32.xlu0 %v1286_v57  ;;  %v1196_v57 = vsel %vm1132_vm2, %v1089_v42, 0.0  ;;  %v353_v42 = vlaneseq }
  0x75   :  { %1194 = vadd.xlane.f32.xlu1 %v1193_v2  ;;  %v1090_v2 = vld [vmem:[%s6699_s2 + $0xb0] sm:$0xff] }
  0x78   :  { %1143 = vadd.xlane.f32.xlu0 %v1142_v10  ;;  %v1199_v10 = vsel %vm1132_vm2, %v1090_v2, 0.0 }
  0x79   :  { %1290 = vadd.xlane.f32.xlu1 %v1289_v1 }
  0x7c   :  { %1239 = vadd.xlane.f32.xlu0 %v1238_v34  ;;  %v1244_v34 = vsel %vm1132_vm2, %v1105_v23, 0.0 }
  0x7d   :  { %1146 = vadd.xlane.f32.xlu1 %v1145_v40 }
  0x80   :  { %687 = vadd.xlane.f32.xlu0 %v4394_v15  ;;  %v1073_v15 = vld [vmem:[%s6699_s2 + $0x28] sm:$0xff] }
  0x81   :  { %1242 = vadd.xlane.f32.xlu1 %v1241_v56  ;;  %v1148_v1 = vsel %vm1132_vm2, %v1073_v15, 0.0 }
  0x84   :  { %1197 = vadd.xlane.f32.xlu0 %v1196_v57 }
  0x85   :  { %691 = vadd.xlane.f32.xlu1 %v4400_v19  ;;  %v1295_v19 = vsel %vm1132_vm2, %v1122_v18, 0.0  ;;  %vm884_vm2 = vcmask 851712  }
  0x88   :  { %1293 = vadd.xlane.f32.xlu0 %v1292_v9 }
  0x89   :  { %1200 = vadd.xlane.f32.xlu1 %v1199_v10 }
  0x8c   :  { %1149 = vadd.xlane.f32.xlu0 %v1148_v1 }
  0x8d   :  { %1296 = vadd.xlane.f32.xlu1 %v1295_v19 }
  0x90   :  { %1245 = vadd.xlane.f32.xlu0 %v1244_v34 }
  0x91   :  { %1152 = vadd.xlane.f32.xlu1 %v4413_v24  ;;  %v4924_v24 = vand.u32 127, %v353_v42 }
  0x93   :  { %v373_v10 = vadd.s32 4294967272, %v4924_v24  ;;  %v380_v1 = vadd.s32 4294967264, %v4924_v24 }
  0x94   :  { %695 = vadd.xlane.f32.xlu0 %v4444_v38  ;;  %v359_v38 = vadd.s32 4294967288, %v4924_v24 }
  0x95   :  { %1248 = vadd.xlane.f32.xlu1 %v4429_v32 }
  0x98   :  { %1203 = vadd.xlane.f32.xlu0 %v4447_v39 }
  0x99   :  { %699 = vadd.xlane.f32.xlu1 %v4459_v44  ;;  %v4929_v44 = vshrl.u32 %v353_v42, 7 }
  0x9b   :  { %v188_v40 = vpop.xlane.xlu1 %187  ;;  %v4941_v0 = vsub.s32 %v4924_v24, %v4929_v44 }
  0x9c   :  { %1299 = vadd.xlane.f32.xlu0 %v4462_v45  ;;  %v308_v15 = vmul.f32 0.0012755102, %v188_v40 }
  0x9d   :  { %v170_v41 = vpop.xlane.xlu0 %169  ;;  %1206 = vadd.xlane.f32.xlu1 %v4465_v46  ;;  %v4935_v46 = vsub.s32 %v359_v38, %v4929_v44  ;;  %6727 = vst [vmem:[#allocation3_spill] sm:$0xff] %v4941_v0 }
  0x9f   :  { %v197_v56 = vpop.xlane.xlu1 %196 }
  0xa0   :  { %1155 = vadd.xlane.f32.xlu0 %v4468_v47  ;;  %v309_v42 = vmul.f32 0.0012755102, %v197_v56 }
  0xa1   :  { %v179_v57 = vpop.xlane.xlu0 %178  ;;  %1302 = vadd.xlane.f32.xlu1 %v4483_v52  ;;  %v366_v52 = vadd.s32 4294967280, %v4924_v24 }
  0xa2   :  { %v307_v47 = vmul.f32 0.0012755102, %v179_v57 }
  0xa3   :  { %v4946_v9 = vsub.s32 %v366_v52, %v4929_v44 }
  0xa4   :  { %v215_v32 = vpop.xlane.xlu1 %214  ;;  %1251 = vadd.xlane.f32.xlu0 %v4486_v53 }
  0xa5   :  { %1158 = vadd.xlane.f32.xlu1 %v4489_v54  ;;  %v306_v54 = vmul.f32 0.0012755102, %v170_v41  ;;  %6728 = vst [vmem:[#allocation4_spill] sm:$0xff] %v4946_v9  ;;  %v370_v40 = vrot.slane %v308_v15, %v4946_v9  ;;  %v4956_v41 = vsub.s32 %v373_v10, %v4929_v44 }
  0xa6   :  { %v206_v39 = vpop.xlane.xlu0 %205 }
  0xa7   :  { %6729 = vst [vmem:[#allocation5_spill] sm:$0xff] %v4956_v41  ;;  %v310_v38 = vmul.f32 0.0012755102, %v206_v39  ;;  %v311_v39 = vmul.f32 0.0012755102, %v215_v32 }
  0xa8   :  { %703 = vadd.xlane.f32.xlu0 %v4518_v4  ;;  %v4932_v45 = vpop.xlane.xlu1 %232  ;;  %v363_v4 = vrot.slane %v307_v47, %v4935_v46  ;;  %v394_v47 = vadd.s32 4294967248, %v4924_v24 }
  0xa9   :  { %1254 = vadd.xlane.f32.xlu1 %v4506_v62  ;;  %v358_v62 = vrot.slane %v306_v54, %v4941_v0 }
  0xaa   :  { %v224_v53 = vpop.xlane.xlu0 %223 }
  0xac   :  { %1209 = vadd.xlane.f32.xlu0 %v4521_v5  ;;  %v365_v5 = vsel %vm364_vm4, %v363_v4, %v358_v62  ;;  %v401_v62 = vadd.s32 4294967240, %v4924_v24 }
  0xad   :  { %v251_v2 = vpop.xlane.xlu1 %250  ;;  %707 = vadd.xlane.f32.xlu1 %v4552_v20  ;;  %v387_v20 = vadd.s32 4294967256, %v4924_v24  ;;  %v372_v57 = vsel %vm371_vm5, %v370_v40, %v365_v5  ;;  %v4978_v5 = vsub.s32 %v394_v47, %v4929_v44 }
  0xae   :  { %v315_v23 = vmul.f32 0.0012755102, %v251_v2 }
  0xaf   :  { %v242_v18 = vpop.xlane.xlu0 %241  ;;  %v4970_v15 = vsub.s32 %v387_v20, %v4929_v44  ;;  %6732 = vst [vmem:[#allocation8_spill] sm:$0xff] %v4978_v5 }
  0xb0   :  { %1305 = vadd.xlane.f32.xlu0 %v4537_v12  ;;  %v314_v19 = vmul.f32 0.0012755102, %v242_v18  ;;  %v4962_v12 = vsub.s32 %v380_v1, %v4929_v44  ;;  %v415_v54 = vrot.slane %v315_v23, %v4935_v46  ;;  %v312_v23 = vmul.f32 0.0012755102, %v224_v53 }
  0xb1   :  { %v269_v34 = vpop.xlane.xlu1 %268  ;;  %1212 = vadd.xlane.f32.xlu1 %v4555_v21  ;;  %v377_v21 = vrot.slane %v309_v42, %v4956_v41  ;;  %6731 = vst [vmem:[#allocation7_spill] sm:$0xff] %v4970_v15  ;;  %v391_v20 = vrot.slane %v311_v39, %v4970_v15  ;;  %v313_v53 = vmul.f32 0.0012755102, %v4932_v45 }
  0xb2   :  { %6730 = vst [vmem:[#allocation6_spill] sm:$0xff] %v4962_v12  ;;  %v411_v56 = vrot.slane %v314_v19, %v4941_v0  ;;  %v317_v4 = vmul.f32 0.0012755102, %v269_v34  ;;  %v384_v1 = vrot.slane %v310_v38, %v4962_v12 }
  0xb3   :  { %v260_v52 = vpop.xlane.xlu0 %259  ;;  %v379_v18 = vsel %vm378_vm6, %v377_v21, %v372_v57  ;;  %v4987_v57 = vsub.s32 %v401_v62, %v4929_v44 }
  0xb4   :  { %1161 = vadd.xlane.f32.xlu0 %v4558_v22  ;;  %v316_v2 = vmul.f32 0.0012755102, %v260_v52  ;;  %v425_v32 = vrot.slane %v317_v4, %v4956_v41  ;;  %v386_v47 = vsel %vm385_vm7, %v384_v1, %v379_v18  ;;  %v398_v52 = vrot.slane %v312_v23, %v4978_v5 }
  0xb5   :  { %1308 = vadd.xlane.f32.xlu1 %v4571_v29  ;;  %v416_v29 = vsel %vm364_vm4, %v415_v54, %v411_v56  ;;  %6733 = vst [vmem:[#allocation9_spill] sm:$0xff] %v4987_v57  ;;  %v405_v21 = vrot.slane %v313_v53, %v4987_v57 }
  0xb6   :  { %v287_v10 = vpop.xlane.xlu1 %286  ;;  %v420_v22 = vrot.slane %v316_v2, %v4946_v9 }
  0xb7   :  { %v319_v34 = vmul.f32 0.0012755102, %v287_v10 }
  0xb8   :  { %1257 = vadd.xlane.f32.xlu0 %v4574_v30  ;;  %v278_v19 = vpop.xlane.xlu0 %277  ;;  %v421_v42 = vsel %vm371_vm5, %v420_v22, %v416_v29 }
  0xb9   :  { %v318_v40 = vmul.f32 0.0012755102, %v278_v19  ;;  %1164 = vadd.xlane.f32.xlu1 %v4587_v37  ;;  %v435_v37 = vrot.slane %v319_v34, %v4970_v15  ;;  %v426_v56 = vsel %vm378_vm6, %v425_v32, %v421_v42 }
  0xba   :  { %v305_v38 = vpop.xlane.xlu1 %304 }
  0xbb   :  { %v430_v30 = vrot.slane %v318_v40, %v4962_v12  ;;  %v321_v54 = vmul.f32 0.0012755102, %v305_v38 }
  0xbc   :  { %711 = vadd.xlane.f32.xlu0 %v4614_v58  ;;  %v393_v58 = vsel %vm392_vm8, %v391_v20, %v386_v47 }
  0xbd   :  { %v296_v4 = vpop.xlane.xlu0 %295  ;;  %v431_v2 = vsel %vm385_vm7, %v430_v30, %v426_v56  ;;  %1260 = vadd.xlane.f32.xlu1 %v4617_v59  ;;  %v445_v10 = vrot.slane %v321_v54, %v4987_v57  ;;  %v400_v18 = vsel %vm399_vm9, %v398_v52, %v393_v58 }
  0xbe   :  { %v320_v45 = vmul.f32 0.0012755102, %v296_v4  ;;  %v604_v39 = vpop.xlane.xlu1 %603  ;;  %v436_v23 = vsel %vm392_vm8, %v435_v37, %v431_v2  ;;  %v407_v34 = vsel %vm6712_vm10, %v405_v21, %v400_v18 }
  0xbf   :  { %v726_v22 = vmul.f32 0.0051020407, %v604_v39 }
  0xc0   :  { %v440_v62 = vrot.slane %v320_v45, %v4978_v5  ;;  %1215 = vadd.xlane.f32.xlu0 %v4620_v60 }
  0xc1   :  { %v600_v1 = vpop.xlane.xlu0 %599  ;;  %v819_v59 = vrot.slane %v726_v22, %v4935_v46  ;;  %715 = vadd.xlane.f32.xlu1 %v4645_v11  ;;  %v757_v22 = vld [vmem:[%s6701_s6] sm:$0xff] }
  0xc2   :  { %v725_v19 = vmul.f32 0.0051020407, %v600_v1  ;;  %v441_v29 = vsel %vm399_vm9, %v440_v62, %v436_v23  ;;  %v612_v32 = vpop.xlane.xlu1 %611 }
  0xc3   :  { %v446_v60 = vsel %vm6712_vm10, %v445_v10, %v441_v29  ;;  %v728_v42 = vmul.f32 0.0051020407, %v612_v32 }
  0xc4   :  { %v815_v40 = vrot.slane %v725_v19, %v4941_v0  ;;  %1311 = vadd.xlane.f32.xlu0 %v4648_v13  ;;  %v448_v20 = vsel %vm447_vm11, %v446_v60, %v407_v34 }
  0xc5   :  { %3697 = vmatmul.mubr.msk.f32.vlgmr.msra.gmra.mrb[0].mxu0 %vm449_vm12, %v448_v20  ;;  %v608_v53 = vpop.xlane.xlu0 %607  ;;  %1218 = vadd.xlane.f32.xlu1 %v4651_v16  ;;  %v829_v38 = vrot.slane %v728_v42, %v4956_v41  ;;  %v858_v16 = vadd.s32 4294967224, %v4924_v24  ;;  %vm898_vm12 = vcmask 982912  }
  0xc6   :  { %v820_v30 = vsel %vm364_vm4, %v819_v59, %v815_v40  ;;  %v727_v11 = vmul.f32 0.0051020407, %v608_v53  ;;  %v620_v47 = vpop.xlane.xlu1 %619  ;;  %v865_v59 = vadd.s32 4294967216, %v4924_v24 }
  0xc7   :  { %v730_v54 = vmul.f32 0.0051020407, %v620_v47  ;;  %v886_v47 = vadd.s32 4294967192, %v4924_v24 }
  0xc8   :  { %v824_v52 = vrot.slane %v727_v11, %v4946_v9  ;;  %1167 = vadd.xlane.f32.xlu0 %v4654_v17  ;;  %v851_v17 = vadd.s32 4294967232, %v4924_v24 }
  0xc9   :  { %v616_v37 = vpop.xlane.xlu0 %615  ;;  %1314 = vadd.xlane.f32.xlu1 %v4667_v27  ;;  %v839_v4 = vrot.slane %v730_v54, %v4970_v15  ;;  %v872_v27 = vadd.s32 4294967208, %v4924_v24 }
  0xca   :  { %v825_v13 = vsel %vm371_vm5, %v824_v52, %v820_v30  ;;  %v729_v56 = vmul.f32 0.0051020407, %v616_v37  ;;  %v628_v45 = vpop.xlane.xlu1 %627  ;;  %v5044_v32 = vsub.s32 %v851_v17, %v4929_v44  ;;  %v879_v37 = vadd.s32 4294967200, %v4924_v24 }
  0xcb   :  { %v830_v2 = vsel %vm378_vm6, %v829_v38, %v825_v13  ;;  %v732_v10 = vmul.f32 0.0051020407, %v628_v45  ;;  %v5049_v20 = vsub.s32 %v872_v27, %v4929_v44  ;;  %v5057_v38 = vsub.s32 %v865_v59, %v4929_v44  ;;  %v761_v45 = vld [vmem:[%s6701_s6 + $0x20] sm:$0xff] }
  0xcc   :  { %v834_v21 = vrot.slane %v729_v56, %v4962_v12  ;;  %1263 = vadd.xlane.f32.xlu0 %v4670_v28  ;;  %v5035_v28 = vsub.s32 %v858_v16, %v4929_v44 }
  0xcd   :  { %v624_v39 = vpop.xlane.xlu0 %623  ;;  %719 = vadd.xlane.f32.xlu1 %v4690_v43  ;;  %v849_v18 = vrot.slane %v732_v10, %v4987_v57  ;;  %v758_v43 = vld [vmem:[%s6701_s6 + $0x8] sm:$0xff] }
  0xce   :  { %v835_v58 = vsel %vm385_vm7, %v834_v21, %v830_v2  ;;  %v731_v62 = vmul.f32 0.0051020407, %v624_v39  ;;  %v636_v23 = vpop.xlane.xlu1 %635  ;;  %v3747_v34 = vpack.c.bf16 %v758_v43, %v757_v22  ;;  %v5075_v21 = vsub.s32 %v886_v47, %v4929_v44  ;;  %v764_v43 = vld [vmem:[%s6701_s6 + $0x38] sm:$0xff] }
  0xcf   :  { %v840_v1 = vsel %vm392_vm8, %v839_v4, %v835_v58  ;;  %v734_v29 = vmul.f32 0.0051020407, %v636_v23  ;;  %v5084_v58 = vsub.s32 %v879_v37, %v4929_v44 }
  0xd0   :  { %v844_v19 = vrot.slane %v731_v62, %v4978_v5  ;;  %655 = vadd.xlane.f32.xlu0 %v4692_v48  ;;  %3748 = vmatpush3.bf16.msra.mxu1 %v3747_v34  ;;  %v759_v48 = vld [vmem:[%s6701_s6 + $0x10] sm:$0xff] }
  0xd1   :  { %v632_v60 = vpop.xlane.xlu0 %631  ;;  %1221 = vadd.xlane.f32.xlu1 %v4717_v6  ;;  %v862_v53 = vrot.slane %v734_v29, %v5035_v28  ;;  %3749 = vmatprep.subr.bf16.mxu1 %v3869_v14  ;;  %v760_v6 = vld [vmem:[%s6701_s6 + $0x18] sm:$0xff] }
  0xd2   :  { %v845_v40 = vsel %vm399_vm9, %v844_v19, %v840_v1  ;;  %v733_v42 = vmul.f32 0.0051020407, %v632_v60  ;;  %v644_v11 = vpop.xlane.xlu1 %643  ;;  %v3750_v13 = vpack.c.bf16 %v760_v6, %v759_v48  ;;  %v763_v1 = vld [vmem:[%s6701_s6 + $0x30] sm:$0xff]  ;;  %v765_v48 = vld [vmem:[%s6701_s6 + $0x40] sm:$0xff] }
  0xd3   :  { %v850_v30 = vsel %vm6712_vm10, %v849_v18, %v845_v40  ;;  %v736_v54 = vmul.f32 0.0051020407, %v644_v11  ;;  %v3756_v29 = vpack.c.bf16 %v764_v43, %v763_v1  ;;  %v1405_v6 = vld [vmem:[%s6702_s8 + $0x80] sm:$0xff] }
  0xd4   :  { %v855_v52 = vrot.slane %v733_v42, %v5044_v32  ;;  %1170 = vadd.xlane.f32.xlu0 %v4720_v7  ;;  %3751 = vmatpush3.bf16.msra.mxu1 %v3750_v13 }
  0xd5   :  { %v640_v56 = vpop.xlane.xlu0 %639  ;;  %1317 = vadd.xlane.f32.xlu1 %v4733_v25  ;;  %v876_v16 = vrot.slane %v736_v54, %v5049_v20  ;;  %3752 = vmatprep.subr.bf16.mxu1 %v3869_v14  ;;  %v762_v25 = vld [vmem:[%s6701_s6 + $0x28] sm:$0xff] }
  0xd6   :  { %v857_v4 = vsel %vm856_vm13, %v855_v52, %v850_v30  ;;  %v735_v2 = vmul.f32 0.0051020407, %v640_v56  ;;  %v652_v10 = vpop.xlane.xlu1 %651  ;;  %v3753_v62 = vpack.c.bf16 %v762_v25, %v761_v45  ;;  %v1406_v52 = vld [vmem:[%s6702_s8 + $0x88] sm:$0xff] }
  0xd7   :  { %v864_v7 = vsel %vm863_vm14, %v862_v53, %v857_v4  ;;  %v738_v39 = vmul.f32 0.0051020407, %v652_v10  ;;  %v3770_v13 = vpack.c.bf16 %v1406_v52, %v1405_v6  ;;  %v768_v4 = vld [vmem:[%s6701_s6 + $0x58] sm:$0xff]  ;;  %v1394_v6 = vld [vmem:[%s6702_s8 + $0x28] sm:$0xff] }
  0xd8   :  { %v869_v17 = vrot.slane %v735_v2, %v5057_v38  ;;  %1266 = vadd.xlane.f32.xlu0 %v4736_v26  ;;  %3754 = vmatpush3.bf16.msra.mxu1 %v3753_v62  ;;  %v1389_v2 = vld [vmem:[%s6702_s8] sm:$0xff] }
  0xd9   :  { %v648_v27 = vpop.xlane.xlu0 %647  ;;  %723 = vadd.xlane.f32.xlu1 %v4759_v50  ;;  %v890_v23 = vrot.slane %v738_v39, %v5075_v21  ;;  %3755 = vmatprep.subr.bf16.mxu1 %v3869_v14  ;;  %v1408_v39 = vld [vmem:[%s6702_s8 + $0x98] sm:$0xff] }
  0xda   :  { %v871_v22 = vsel %vm870_vm15, %v869_v17, %v864_v7  ;;  %v737_v18 = vmul.f32 0.0051020407, %v648_v27  ;;  %v668_v59 = vpop.xlane.xlu1 %667  ;;  %3771 = vmatprep.subr.bf16.mxu0 %v3770_v13  ;;  %v1407_v17 = vld [vmem:[%s6702_s8 + $0x90] sm:$0xff] }
  0xdb   :  { %v878_v26 = vsel %vm877_vm1, %v876_v16, %v871_v22  ;;  %v742_v50 = vmul.f32 0.0051020407, %v668_v59  ;;  %v3774_v22 = vpack.c.bf16 %v1408_v39, %v1407_v17  ;;  %v1396_v39 = vld [vmem:[%s6702_s8 + $0x38] sm:$0xff] }
  0xdc   :  { %v883_v19 = vrot.slane %v737_v18, %v5084_v58  ;;  %659 = vadd.xlane.f32.xlu0 %v4762_v55  ;;  %3757 = vmatpush3.bf16.msra.mxu1 %v3756_v29  ;;  %v766_v55 = vld [vmem:[%s6701_s6 + $0x48] sm:$0xff] }
  0xdd   :  { %v664_v34 = vpop.xlane.xlu0 %663  ;;  %v914_v40 = vrot.slane %v742_v50, %v4935_v46  ;;  %1224 = vadd.xlane.f32.xlu1 %v4779_v3  ;;  %3758 = vmatprep.subr.bf16.mxu1 %v3869_v14  ;;  %v3759_v3 = vpack.c.bf16 %v766_v55, %v765_v48 }
  0xde   :  { %v885_v60 = vsel %vm884_vm2, %v883_v19, %v878_v26  ;;  %v741_v42 = vmul.f32 0.0051020407, %v664_v34  ;;  %v1183_v53 = vpop.xlane.xlu1 %1182  ;;  %v1391_v26 = vld [vmem:[%s6702_s8 + $0x10] sm:$0xff] }
  0xdf   :  { %v5110_v30 = vsel %vm891_vm3, %v890_v23, %v885_v60  ;;  %v1341_v45 = vmul.f32 0.020408163, %v1183_v53  ;;  %v770_v23 = vld [vmem:[%s6701_s6 + $0x68] sm:$0xff]  ;;  %v1409_v60 = vld [vmem:[%s6702_s8 + $0xa0] sm:$0xff] }
  0xe0   :  { %v910_v11 = vrot.slane %v741_v42, %v4941_v0  ;;  %1173 = vadd.xlane.f32.xlu0 %v4782_v8  ;;  %3760 = vmatpush3.bf16.msra.mxu1 %v3759_v3  ;;  %v767_v8 = vld [vmem:[%s6701_s6 + $0x50] sm:$0xff] }
  0xe1   :  { %v672_v47 = vpop.xlane.xlu0 %671  ;;  %1320 = vadd.xlane.f32.xlu1 %v4802_v35  ;;  %3761 = vmatprep.subr.bf16.mxu1 %v3869_v14  ;;  %v1390_v35 = vld [vmem:[%s6702_s8 + $0x8] sm:$0xff]  ;;  %v3762_v7 = vpack.c.bf16 %v768_v4, %v767_v8  ;;  %v1574_v59 = vrot.slane %v1341_v45, %v4941_v0  ;;  %v1411_v4 = vld [vmem:[%s6702_s8 + $0xb0] sm:$0xff] }
  0xe2   :  { %v915_v54 = vsel %vm364_vm4, %v914_v40, %v910_v11  ;;  %v743_v37 = vmul.f32 0.0051020407, %v672_v47  ;;  %v1279_v56 = vpop.xlane.xlu1 %1278  ;;  %v3772_v10 = vpack.c.bf16 %v1390_v35, %v1389_v2  ;;  %v1410_v40 = vld [vmem:[%s6702_s8 + $0xa8] sm:$0xff]  ;;  %v772_v47 = vld [vmem:[%s6701_s6 + $0x78] sm:$0xff] }
  0xe3   :  { %v1373_v18 = vmul.f32 0.020408163, %v1279_v56  ;;  %v3778_v3 = vpack.c.bf16 %v1410_v40, %v1409_v60  ;;  %v1412_v2 = vld [vmem:[%s6702_s8 + $0xb8] sm:$0xff]  ;;  %v1893_v40 = vld [vmem:[%s6703_s3 + $0x8] sm:$0xff] }
  0xe4   :  { %v919_v16 = vrot.slane %v743_v37, %v4946_v9  ;;  %1269 = vadd.xlane.f32.xlu0 %v4805_v36  ;;  %3763 = vmatpush3.bf16.msra.mxu1 %v3762_v7  ;;  %v769_v36 = vld [vmem:[%s6701_s6 + $0x60] sm:$0xff]  ;;  %v1909_v37 = vld [vmem:[%s6703_s3 + $0x88] sm:$0xff]  ;;  %v3782_v7 = vpack.c.bf16 %v1412_v2, %v1411_v4 }
  0xe5   :  { %v1186_v25 = vpop.xlane.xlu0 %1185  ;;  %1227 = vadd.xlane.f32.xlu1 %v4823_v61  ;;  %3773 = vmatpush3.bf16.msra.mxu0 %v3772_v10  ;;  %v1392_v61 = vld [vmem:[%s6702_s8 + $0x18] sm:$0xff]  ;;  %v3765_v50 = vpack.c.bf16 %v770_v23, %v769_v36  ;;  %v1732_v55 = vrot.slane %v1373_v18, %v4941_v0  ;;  %v1395_v10 = vld [vmem:[%s6702_s8 + $0x30] sm:$0xff]  ;;  %v2071_v17 = vsel %vm166_vm0, %v1909_v37, 0.0  ;;  %v1413_v18 = vld [vmem:[%s6702_s8 + $0xc0] sm:$0xff] }
  0xe6   :  { %v920_v62 = vsel %vm371_vm5, %v919_v16, %v915_v54  ;;  %v1342_v27 = vmul.f32 0.020408163, %v1186_v25  ;;  %v676_v1 = vpop.xlane.xlu1 %675  ;;  %3764 = vmatprep.subr.bf16.mxu1 %v3869_v14  ;;  %3775 = vmatprep.subr.bf16.mxu0 %v3774_v22  ;;  %v3776_v34 = vpack.c.bf16 %v1392_v61, %v1391_v26  ;;  %v1908_v16 = vld [vmem:[%s6703_s3 + $0x80] sm:$0xff] }
  0xe7   :  { %v744_v19 = vmul.f32 0.0051020407, %v676_v1  ;;  %v2068_v36 = vsel %vm166_vm0, %v1908_v16, 0.0  ;;  %v1414_v1 = vld [vmem:[%s6702_s8 + $0xc8] sm:$0xff]  ;;  %v1972_v26 = vld [vmem:[%s6703_s3 + $0x280] sm:$0xff] }
  0xe8   :  { %v1578_v43 = vrot.slane %v1342_v27, %v4935_v46  ;;  %1176 = vadd.xlane.f32.xlu0 %v4826_v63  ;;  %3766 = vmatpush3.bf16.msra.mxu1 %v3765_v50  ;;  %v771_v63 = vld [vmem:[%s6701_s6 + $0x70] sm:$0xff]  ;;  %v3784_v27 = vpack.c.bf16 %v1396_v39, %v1395_v10  ;;  %v3786_v61 = vpack.c.bf16 %v1414_v1, %v1413_v18  ;;  %v1417_v10 = vld [vmem:[%s6702_s8 + $0xe0] sm:$0xff]  ;;  %v1402_v18 = vld [vmem:[%s6702_s8 + $0x68] sm:$0xff] }
  0xe9   :  { %v1282_v29 = vpop.xlane.xlu0 %1281  ;;  %v924_v48 = vrot.slane %v744_v19, %v4956_v41  ;;  %1323 = vadd.xlane.f32.xlu1 %v4842_v31  ;;  %3777 = vmatpush3.bf16.msra.mxu0 %v3776_v34  ;;  %v1393_v31 = vld [vmem:[%s6702_s8 + $0x20] sm:$0xff]  ;;  %v3768_v13 = vpack.c.bf16 %v772_v47, %v771_v63  ;;  %v2260_v63 = vsel %vm166_vm0, %v1972_v26, 0.0 }
  0xea   :  { %v5168_v42 = vsel %vm364_vm4, %v1578_v43, %v1574_v59  ;;  %v1374_v53 = vmul.f32 0.020408163, %v1282_v29  ;;  %v1138_v11 = vpop.xlane.xlu1 %1137  ;;  %3767 = vmatprep.subr.bf16.mxu1 %v3869_v14  ;;  %3779 = vmatprep.subr.bf16.mxu0 %v3778_v3  ;;  %v3780_v56 = vpack.c.bf16 %v1394_v6, %v1393_v31  ;;  %v1397_v59 = vld [vmem:[%s6702_s8 + $0x40] sm:$0xff]  ;;  %v1398_v29 = vld [vmem:[%s6702_s8 + $0x48] sm:$0xff] }
  0xeb   :  { %v5187_v52 = vsel %vm378_vm6, %v924_v48, %v920_v62  ;;  %v1326_v14 = vmul.f32 0.020408163, %v1138_v11  ;;  %v1973_v62 = vld [vmem:[%s6703_s3 + $0x288] sm:$0xff]  ;;  %v3788_v48 = vpack.c.bf16 %v1398_v29, %v1397_v59  ;;  %v1416_v11 = vld [vmem:[%s6702_s8 + $0xd8] sm:$0xff]  ;;  %v1892_v6 = vld [vmem:[%s6703_s3] sm:$0xff] }
  0xec   :  { %v1736_v54 = vrot.slane %v1374_v53, %v4935_v46  ;;  %1272 = vadd.xlane.f32.xlu0 %v4845_v33  ;;  %3769 = vmatpush3.bf16.msra.mxu1 %v3768_v13  ;;  %v2263_v50 = vsel %vm166_vm0, %v1973_v62, 0.0 }
  0xed   :  { %v1135_v8 = vpop.xlane.xlu0 %1134  ;;  %v1499_v33 = vrot.slane %v1326_v14, %v4935_v46  ;;  %1275 = vadd.xlane.f32.xlu1 %v4858_v49  ;;  %3781 = vmatpush3.bf16.msra.mxu0 %v3780_v56  ;;  %v1399_v14 = vld [vmem:[%s6702_s8 + $0x50] sm:$0xff] }
  0xee   :  { %v1737_v35 = vsel %vm364_vm4, %v1736_v54, %v1732_v55  ;;  %v1325_v45 = vmul.f32 0.020408163, %v1135_v8  ;;  %v1231_v25 = vpop.xlane.xlu1 %1230  ;;  %3783 = vmatprep.subr.bf16.mxu0 %v3782_v7  ;;  %v1415_v55 = vld [vmem:[%s6702_s8 + $0xd0] sm:$0xff]  ;;  %v2023_v8 = vsel %vm166_vm0, %v1893_v40, 0.0  ;;  %v2020_v7 = vsel %vm166_vm0, %v1892_v6, 0.0  ;;  %v1957_v40 = vld [vmem:[%s6703_s3 + $0x208] sm:$0xff] }
  0xef   :  { %v1357_v43 = vmul.f32 0.020408163, %v1231_v25  ;;  %v3790_v54 = vpack.c.bf16 %v1416_v11, %v1415_v55  ;;  %v1911_v6 = vld [vmem:[%s6703_s3 + $0x98] sm:$0xff] }
  0xf0   :  { %v1495_v49 = vrot.slane %v1325_v45, %v4941_v0  ;;  %1179 = vadd.xlane.f32.xlu0 %v4861_v51 }
  0xf1   :  { %v1189_v22 = vpop.xlane.xlu0 %1188  ;;  %2072 = vadd.xlane.f32.xlu1 %v2071_v17  ;;  %3785 = vmatpush3.bf16.msra.mxu0 %v3784_v27  ;;  %v1653_v37 = vrot.slane %v1357_v43, %v4941_v0  ;;  %v1401_v27 = vld [vmem:[%s6702_s8 + $0x60] sm:$0xff] }
  0xf2   :  { %v1500_v23 = vsel %vm364_vm4, %v1499_v33, %v1495_v49  ;;  %v1343_v51 = vmul.f32 0.020408163, %v1189_v22  ;;  %v1285_v19 = vpop.xlane.xlu1 %1284  ;;  %3787 = vmatprep.subr.bf16.mxu0 %v3786_v61  ;;  %v1956_v33 = vld [vmem:[%s6703_s3 + $0x200] sm:$0xff]  ;;  %v1910_v49 = vld [vmem:[%s6703_s3 + $0x90] sm:$0xff]  ;;  %v3796_v59 = vpack.c.bf16 %v1402_v18, %v1401_v27 }
  0xf3   :  { %v1375_v60 = vmul.f32 0.020408163, %v1285_v19  ;;  %v1974_v61 = vld [vmem:[%s6703_s3 + $0x290] sm:$0xff]  ;;  %v2074_v19 = vsel %vm166_vm0, %v1910_v49, 0.0  ;;  %v1940_v49 = vld [vmem:[%s6703_s3 + $0x180] sm:$0xff] }
  0xf4   :  { %v1583_v34 = vrot.slane %v1343_v51, %v4946_v9  ;;  %2069 = vadd.xlane.f32.xlu0 %v2068_v36  ;;  %v2212_v36 = vsel %vm166_vm0, %v1956_v33, 0.0  ;;  %v2266_v55 = vsel %vm166_vm0, %v1974_v61, 0.0  ;;  %v2077_v33 = vsel %vm166_vm0, %v1911_v6, 0.0 }
  0xf5   :  { %v1234_v53 = vpop.xlane.xlu0 %1233  ;;  %v1741_v47 = vrot.slane %v1375_v60, %v4946_v9  ;;  %2264 = vadd.xlane.f32.xlu1 %v2263_v50  ;;  %3789 = vmatpush3.bf16.msra.mxu0 %v3788_v48  ;;  %v1419_v50 = vld [vmem:[%s6702_s8 + $0xf0] sm:$0xff] }
  0xf6   :  { %v5249_v3 = vsel %vm371_vm5, %v1583_v34, %v5168_v42  ;;  %v1358_v31 = vmul.f32 0.020408163, %v1234_v53  ;;  %v1141_v13 = vpop.xlane.xlu1 %1140  ;;  %v1400_v42 = vld [vmem:[%s6702_s8 + $0x58] sm:$0xff]  ;;  %3791 = vmatprep.subr.bf16.mxu0 %v3790_v54  ;;  %v1403_v53 = vld [vmem:[%s6702_s8 + $0x70] sm:$0xff] }
  0xf7   :  { %v5264_v56 = vsel %vm371_vm5, %v1741_v47, %v1737_v35  ;;  %v1327_v2 = vmul.f32 0.020408163, %v1141_v13  ;;  %v3792_v45 = vpack.c.bf16 %v1400_v42, %v1399_v14  ;;  %v1418_v35 = vld [vmem:[%s6702_s8 + $0xe8] sm:$0xff] }
  0xf8   :  { %v1657_v4 = vrot.slane %v1358_v31, %v4935_v46  ;;  %2261 = vadd.xlane.f32.xlu0 %v2260_v63  ;;  %v3794_v62 = vpack.c.bf16 %v1418_v35, %v1417_v10 }
  0xf9   :  { %v680_v16 = vpop.xlane.xlu0 %679  ;;  %v1504_v17 = vrot.slane %v1327_v2, %v4946_v9  ;;  %2024 = vadd.xlane.f32.xlu1 %v2023_v8  ;;  %3793 = vmatpush3.bf16.msra.mxu0 %v3792_v45 }
  0xfa   :  { %v1658_v25 = vsel %vm364_vm4, %v1657_v4, %v1653_v37  ;;  %v745_v39 = vmul.f32 0.0051020407, %v680_v16  ;;  %v1237_v22 = vpop.xlane.xlu1 %1236  ;;  %3795 = vmatprep.subr.bf16.mxu0 %v3794_v62  ;;  %v2215_v37 = vsel %vm166_vm0, %v1957_v40, 0.0  ;;  %v1894_v4 = vld [vmem:[%s6703_s3 + $0x10] sm:$0xff] }
  0xfb   :  { %v1505_v1 = vsel %vm371_vm5, %v1504_v17, %v1500_v23  ;;  %v1359_v26 = vmul.f32 0.020408163, %v1237_v22  ;;  %v1420_v23 = vld [vmem:[%s6702_s8 + $0xf8] sm:$0xff]  ;;  %v2026_v35 = vsel %vm166_vm0, %v1894_v4, 0.0 }
  0xfc   :  { %v929_v51 = vrot.slane %v745_v39, %v4962_v12  ;;  %2021 = vadd.xlane.f32.xlu0 %v2020_v7  ;;  %v3798_v48 = vpack.c.bf16 %v1420_v23, %v1419_v50 }
  0xfd   :  { %v1192_v43 = vpop.xlane.xlu0 %1191  ;;  %v1662_v34 = vrot.slane %v1359_v26, %v4946_v9  ;;  %2213 = vadd.xlane.f32.xlu1 %v2212_v36  ;;  %3797 = vmatpush3.bf16.msra.mxu0 %v3796_v59  ;;  %v2164_v26 = vsel %vm166_vm0, %v1940_v49, 0.0 }
  0xfe   :  { %v930_v29 = vsel %vm385_vm7, %v929_v51, %v5187_v52  ;;  %v1344_v60 = vmul.f32 0.020408163, %v1192_v43  ;;  %v684_v63 = vpop.xlane.xlu1 %683  ;;  %v1404_v52 = vld [vmem:[%s6702_s8 + $0x78] sm:$0xff]  ;;  %3799 = vmatprep.subr.bf16.mxu0 %v3798_v48 }
  0xff   :  { %v1663_v11 = vsel %vm371_vm5, %v1662_v34, %v1658_v25  ;;  %v746_v31 = vmul.f32 0.0051020407, %v684_v63  ;;  %v3800_v54 = vpack.c.bf16 %v1404_v52, %v1403_v53  ;;  %v2004_v52 = vld [vmem:[%s6703_s3 + $0x380] sm:$0xff] }
 0x100   :  { %v1588_v47 = vrot.slane %v1344_v60, %v4956_v41  ;;  %2075 = vadd.xlane.f32.xlu0 %v2074_v19  ;;  %v1958_v19 = vld [vmem:[%s6703_s3 + $0x210] sm:$0xff] }
 0x101   :  { %v1288_v14 = vpop.xlane.xlu0 %1287  ;;  %v934_v8 = vrot.slane %v746_v31, %v4970_v15  ;;  %2267 = vadd.xlane.f32.xlu1 %v2266_v55  ;;  %3801 = vmatpush3.bf16.msra.mxu0 %v3800_v54  ;;  %v2218_v48 = vsel %vm166_vm0, %v1958_v19, 0.0 }
 0x102   :  { %v1589_v13 = vsel %vm378_vm6, %v1588_v47, %v5249_v3  ;;  %v1376_v42 = vmul.f32 0.020408163, %v1288_v14  ;;  %v1195_v2 = vpop.xlane.xlu1 %1194  ;;  %v1941_v3 = vld [vmem:[%s6703_s3 + $0x188] sm:$0xff] }
 0x103   :  { %v935_v45 = vsel %vm392_vm8, %v934_v8, %v930_v29  ;;  %v1345_v7 = vmul.f32 0.020408163, %v1195_v2  ;;  %v2167_v27 = vsel %vm166_vm0, %v1941_v3, 0.0  ;;  %v1895_v2 = vld [vmem:[%s6703_s3 + $0x18] sm:$0xff] }
 0x104   :  { %v1746_v16 = vrot.slane %v1376_v42, %v4956_v41  ;;  %2216 = vadd.xlane.f32.xlu0 %v2215_v37 }
 0x105   :  { %v1144_v10 = vpop.xlane.xlu0 %1143  ;;  %v1593_v17 = vrot.slane %v1345_v7, %v4962_v12  ;;  %2078 = vadd.xlane.f32.xlu1 %v2077_v33 }
 0x106   :  { %v1747_v25 = vsel %vm378_vm6, %v1746_v16, %v5264_v56  ;;  %v1328_v39 = vmul.f32 0.020408163, %v1144_v10  ;;  %v1291_v62 = vpop.xlane.xlu1 %1290  ;;  %v1975_v56 = vld [vmem:[%s6703_s3 + $0x298] sm:$0xff] }
 0x107   :  { %v1594_v22 = vsel %vm385_vm7, %v1593_v17, %v1589_v13  ;;  %v1377_v18 = vmul.f32 0.020408163, %v1291_v62  ;;  %v2269_v23 = vsel %vm166_vm0, %v1975_v56, 0.0  ;;  %v2356_v13 = vsel %vm166_vm0, %v2004_v52, 0.0  ;;  %v1924_v62 = vld [vmem:[%s6703_s3 + $0x100] sm:$0xff] }
 0x108   :  { %v1509_v36 = vrot.slane %v1328_v39, %v4956_v41  ;;  %2027 = vadd.xlane.f32.xlu0 %v2026_v35 }
 0x109   :  { %v1240_v51 = vpop.xlane.xlu0 %1239  ;;  %v1751_v59 = vrot.slane %v1377_v18, %v4962_v12  ;;  %2168 = vadd.xlane.f32.xlu1 %v2167_v27 }
 0x10a   :  { %v1510_v61 = vsel %vm378_vm6, %v1509_v36, %v1505_v1  ;;  %v1360_v43 = vmul.f32 0.020408163, %v1240_v51  ;;  %v1147_v50 = vpop.xlane.xlu1 %1146  ;;  %v2005_v1 = vld [vmem:[%s6703_s3 + $0x388] sm:$0xff] }
 0x10b   :  { %v1752_v29 = vsel %vm385_vm7, %v1751_v59, %v1747_v25  ;;  %v1329_v60 = vmul.f32 0.020408163, %v1147_v50  ;;  %v2359_v31 = vsel %vm166_vm0, %v2005_v1, 0.0  ;;  %v2029_v25 = vsel %vm166_vm0, %v1895_v2, 0.0  ;;  %v1942_v50 = vld [vmem:[%s6703_s3 + $0x190] sm:$0xff] }
 0x10c   :  { %v1667_v34 = vrot.slane %v1360_v43, %v4956_v41  ;;  %2165 = vadd.xlane.f32.xlu0 %v2164_v26 }
 0x10d   :  { %v688_v40 = vpop.xlane.xlu0 %687  ;;  %v1514_v63 = vrot.slane %v1329_v60, %v4962_v12  ;;  %2270 = vadd.xlane.f32.xlu1 %v2269_v23 }
 0x10e   :  { %v1668_v53 = vsel %vm378_vm6, %v1667_v34, %v1663_v11  ;;  %v747_v55 = vmul.f32 0.0051020407, %v688_v40  ;;  %v1243_v47 = vpop.xlane.xlu1 %1242  ;;  %v1912_v11 = vld [vmem:[%s6703_s3 + $0xa0] sm:$0xff] }
 0x10f   :  { %v1515_v6 = vsel %vm385_vm7, %v1514_v63, %v1510_v61  ;;  %v1361_v14 = vmul.f32 0.020408163, %v1243_v47  ;;  %v2080_v16 = vsel %vm166_vm0, %v1912_v11, 0.0  ;;  %v2116_v61 = vsel %vm166_vm0, %v1924_v62, 0.0  ;;  %v1976_v47 = vld [vmem:[%s6703_s3 + $0x2a0] sm:$0xff] }
 0x110   :  { %v939_v54 = vrot.slane %v747_v55, %v4978_v5  ;;  %2219 = vadd.xlane.f32.xlu0 %v2218_v48 }
 0x111   :  { %v1198_v37 = vpop.xlane.xlu0 %1197  ;;  %v1672_v42 = vrot.slane %v1361_v14, %v4962_v12  ;;  %2360 = vadd.xlane.f32.xlu1 %v2359_v31 }
 0x112   :  { %v940_v8 = vsel %vm399_vm9, %v939_v54, %v935_v45  ;;  %v1346_v4 = vmul.f32 0.020408163, %v1198_v37  ;;  %v692_v33 = vpop.xlane.xlu1 %691  ;;  %v1925_v45 = vld [vmem:[%s6703_s3 + $0x108] sm:$0xff] }
 0x113   :  { %v1673_v7 = vsel %vm385_vm7, %v1672_v42, %v1668_v53  ;;  %v748_v10 = vmul.f32 0.0051020407, %v692_v33  ;;  %v2119_v36 = vsel %vm166_vm0, %v1925_v45, 0.0  ;;  %v2170_v53 = vsel %vm166_vm0, %v1942_v50, 0.0  ;;  %v1989_v33 = vld [vmem:[%s6703_s3 + $0x308] sm:$0xff] }
 0x114   :  { %v1598_v3 = vrot.slane %v1346_v4, %v4970_v15  ;;  %2357 = vadd.xlane.f32.xlu0 %v2356_v13 }
 0x115   :  { %v1294_v35 = vpop.xlane.xlu0 %1293  ;;  %v944_v39 = vrot.slane %v748_v10, %v4987_v57  ;;  %2081 = vadd.xlane.f32.xlu1 %v2080_v16 }
 0x116   :  { %v1599_v17 = vsel %vm392_vm8, %v1598_v3, %v1594_v22  ;;  %v1378_v49 = vmul.f32 0.020408163, %v1294_v35  ;;  %v1201_v27 = vpop.xlane.xlu1 %1200  ;;  %v1959_v22 = vld [vmem:[%s6703_s3 + $0x218] sm:$0xff] }
 0x117   :  { %v945_v18 = vsel %vm6712_vm10, %v944_v39, %v940_v8  ;;  %v1347_v51 = vmul.f32 0.020408163, %v1201_v27  ;;  %v2221_v34 = vsel %vm166_vm0, %v1959_v22, 0.0  ;;  %v2272_v8 = vsel %vm166_vm0, %v1976_v47, 0.0  ;;  %v1896_v27 = vld [vmem:[%s6703_s3 + $0x20] sm:$0xff] }
 0x118   :  { %v1756_v56 = vrot.slane %v1378_v49, %v4970_v15  ;;  %2030 = vadd.xlane.f32.xlu0 %v2029_v25 }
 0x119   :  { %v1150_v26 = vpop.xlane.xlu0 %1149  ;;  %v1603_v43 = vrot.slane %v1347_v51, %v4978_v5  ;;  %2120 = vadd.xlane.f32.xlu1 %v2119_v36 }
 0x11a   :  { %v1757_v59 = vsel %vm392_vm8, %v1756_v56, %v1752_v29  ;;  %v1330_v19 = vmul.f32 0.020408163, %v1150_v26  ;;  %v1297_v23 = vpop.xlane.xlu1 %1296  ;;  %v1988_v29 = vld [vmem:[%s6703_s3 + $0x300] sm:$0xff] }
 0x11b   :  { %v1604_v60 = vsel %vm399_vm9, %v1603_v43, %v1599_v17  ;;  %v1379_v40 = vmul.f32 0.020408163, %v1297_v23  ;;  %v2308_v54 = vsel %vm166_vm0, %v1988_v29, 0.0  ;;  %v2311_v17 = vsel %vm166_vm0, %v1989_v33, 0.0 }
 0x11c   :  { %v1519_v1 = vrot.slane %v1330_v19, %v4970_v15  ;;  %2117 = vadd.xlane.f32.xlu0 %v2116_v61  ;;  %v2032_v61 = vsel %vm166_vm0, %v1896_v27, 0.0  ;;  %v1926_v19 = vld [vmem:[%s6703_s3 + $0x110] sm:$0xff] }
 0x11d   :  { %v1246_v48 = vpop.xlane.xlu0 %1245  ;;  %v1761_v55 = vrot.slane %v1379_v40, %v4978_v5  ;;  %2222 = vadd.xlane.f32.xlu1 %v2221_v34  ;;  %v1977_v40 = vld [vmem:[%s6703_s3 + $0x2a8] sm:$0xff] }
 0x11e   :  { %v1520_v63 = vsel %vm392_vm8, %v1519_v1, %v1515_v6  ;;  %v1362_v52 = vmul.f32 0.020408163, %v1246_v48  ;;  %v1153_v31 = vpop.xlane.xlu1 %1152  ;;  %v2006_v6 = vld [vmem:[%s6703_s3 + $0x390] sm:$0xff]  ;;  %v2275_v47 = vsel %vm166_vm0, %v1977_v40, 0.0  ;;  %v2008_v40 = vld [vmem:[%s6703_s3 + $0x3a0] sm:$0xff] }
 0x11f   :  { %v1762_v14 = vsel %vm399_vm9, %v1761_v55, %v1757_v59  ;;  %v1331_v37 = vmul.f32 0.020408163, %v1153_v31  ;;  %v2362_v3 = vsel %vm166_vm0, %v2006_v6, 0.0  ;;  %v1960_v55 = vld [vmem:[%s6703_s3 + $0x220] sm:$0xff] }
 0x120   :  { %v1677_v11 = vrot.slane %v1362_v52, %v4970_v15  ;;  %2171 = vadd.xlane.f32.xlu0 %v2170_v53  ;;  %v2224_v6 = vsel %vm166_vm0, %v1960_v55, 0.0  ;;  %v1915_v55 = vld [vmem:[%s6703_s3 + $0xb8] sm:$0xff] }
 0x121   :  { %v696_v13 = vpop.xlane.xlu0 %695  ;;  %v1524_v4 = vrot.slane %v1331_v37, %v4978_v5  ;;  %2309 = vadd.xlane.f32.xlu1 %v2308_v54 }
 0x122   :  { %v1678_v42 = vsel %vm392_vm8, %v1677_v11, %v1673_v7  ;;  %v749_v2 = vmul.f32 0.0051020407, %v696_v13  ;;  %v1249_v16 = vpop.xlane.xlu1 %1248  ;;  %v1913_v7 = vld [vmem:[%s6703_s3 + $0xa8] sm:$0xff] }
 0x123   :  { %v1525_v10 = vsel %vm399_vm9, %v1524_v4, %v1520_v63  ;;  %v1363_v35 = vmul.f32 0.020408163, %v1249_v16  ;;  %v2083_v56 = vsel %vm166_vm0, %v1913_v7, 0.0  ;;  %v1990_v4 = vld [vmem:[%s6703_s3 + $0x310] sm:$0xff] }
 0x124   :  { %v949_v45 = vrot.slane %v749_v2, %v5044_v32  ;;  %2273 = vadd.xlane.f32.xlu0 %v2272_v8  ;;  %v2314_v7 = vsel %vm166_vm0, %v1990_v4, 0.0 }
 0x125   :  { %v1204_v25 = vpop.xlane.xlu0 %1203  ;;  %v1682_v49 = vrot.slane %v1363_v35, %v4978_v5  ;;  %2363 = vadd.xlane.f32.xlu1 %v2362_v3 }
 0x126   :  { %v5431_v39 = vsel %vm856_vm13, %v949_v45, %v945_v18  ;;  %v1348_v62 = vmul.f32 0.020408163, %v1204_v25  ;;  %v5437_v36 = vpop.xlane.xlu1 %699  ;;  %v1943_v18 = vld [vmem:[%s6703_s3 + $0x198] sm:$0xff] }
 0x127   :  { %v1683_v51 = vsel %vm399_vm9, %v1682_v49, %v1678_v42  ;;  %v2173_v23 = vsel %vm166_vm0, %v1943_v18, 0.0  ;;  %v1897_v49 = vld [vmem:[%s6703_s3 + $0x28] sm:$0xff] }
 0x128   :  { %v1608_v22 = vrot.slane %v1348_v62, %v4987_v57  ;;  %2312 = vadd.xlane.f32.xlu0 %v2311_v17  ;;  %v2035_v18 = vsel %vm166_vm0, %v1897_v49, 0.0 }
 0x129   :  { %v1300_v26 = vpop.xlane.xlu0 %1299  ;;  %2084 = vadd.xlane.f32.xlu1 %v2083_v56 }
 0x12a   :  { %v1609_v59 = vsel %vm6712_vm10, %v1608_v22, %v1604_v60  ;;  %v1380_v43 = vmul.f32 0.020408163, %v1300_v26  ;;  %v1207_v50 = vpop.xlane.xlu1 %1206  ;;  %v2122_v60 = vsel %vm166_vm0, %v1926_v19, 0.0  ;;  %v1927_v26 = vld [vmem:[%s6703_s3 + $0x118] sm:$0xff] }
 0x12b   :  { %v1349_v1 = vmul.f32 0.020408163, %v1207_v50  ;;  %v2125_v50 = vsel %vm166_vm0, %v1927_v26, 0.0 }
 0x12c   :  { %v1766_v34 = vrot.slane %v1380_v43, %v4987_v57  ;;  %2033 = vadd.xlane.f32.xlu0 %v2032_v61  ;;  %v1978_v43 = vld [vmem:[%s6703_s3 + $0x2b0] sm:$0xff] }
 0x12d   :  { %v1156_v29 = vpop.xlane.xlu0 %1155  ;;  %v1613_v53 = vrot.slane %v1349_v1, %v5044_v32  ;;  %2174 = vadd.xlane.f32.xlu1 %v2173_v23  ;;  %v1961_v23 = vld [vmem:[%s6703_s3 + $0x228] sm:$0xff]  ;;  %v2278_v1 = vsel %vm166_vm0, %v1978_v43, 0.0 }
 0x12e   :  { %v1767_v48 = vsel %vm6712_vm10, %v1766_v34, %v1762_v14  ;;  %v1332_v63 = vmul.f32 0.020408163, %v1156_v29  ;;  %v1303_v52 = vpop.xlane.xlu1 %1302  ;;  %v2007_v14 = vld [vmem:[%s6703_s3 + $0x398] sm:$0xff] }
 0x12f   :  { %v5463_v31 = vsel %vm856_vm13, %v1613_v53, %v1609_v59  ;;  %v1381_v11 = vmul.f32 0.020408163, %v1303_v52  ;;  %v2365_v33 = vsel %vm166_vm0, %v2007_v14, 0.0  ;;  %v2089_v14 = vsel %vm166_vm0, %v1915_v55, 0.0  ;;  %v1929_v55 = vld [vmem:[%s6703_s3 + $0x128] sm:$0xff] }
 0x130   :  { %v1529_v54 = vrot.slane %v1332_v63, %v4987_v57  ;;  %2123 = vadd.xlane.f32.xlu0 %v2122_v60  ;;  %v2227_v60 = vsel %vm166_vm0, %v1961_v23, 0.0  ;;  %v2368_v63 = vsel %vm166_vm0, %v2008_v40, 0.0  ;;  %v1899_v23 = vld [vmem:[%s6703_s3 + $0x38] sm:$0xff] }
 0x131   :  { %v1252_v37 = vpop.xlane.xlu0 %1251  ;;  %v1771_v8 = vrot.slane %v1381_v11, %v5044_v32  ;;  %2276 = vadd.xlane.f32.xlu1 %v2275_v47 }
 0x132   :  { %v1530_v13 = vsel %vm6712_vm10, %v1529_v54, %v1525_v10  ;;  %v1364_v42 = vmul.f32 0.020408163, %v1252_v37  ;;  %v1159_v2 = vpop.xlane.xlu1 %1158  ;;  %v1914_v10 = vld [vmem:[%s6703_s3 + $0xb0] sm:$0xff]  ;;  %v1945_v37 = vld [vmem:[%s6703_s3 + $0x1a8] sm:$0xff] }
 0x133   :  { %v5477_v16 = vsel %vm856_vm13, %v1771_v8, %v1767_v48  ;;  %v1333_v45 = vmul.f32 0.020408163, %v1159_v2  ;;  %v2086_v27 = vsel %vm166_vm0, %v1914_v10, 0.0  ;;  %v1991_v48 = vld [vmem:[%s6703_s3 + $0x318] sm:$0xff]  ;;  %v1898_v54 = vld [vmem:[%s6703_s3 + $0x30] sm:$0xff]  ;;  %v1928_v8 = vld [vmem:[%s6703_s3 + $0x120] sm:$0xff] }
 0x134   :  { %v1687_v3 = vrot.slane %v1364_v42, %v4987_v57  ;;  %2225 = vadd.xlane.f32.xlu0 %v2224_v6  ;;  %v2317_v47 = vsel %vm166_vm0, %v1991_v48, 0.0  ;;  %v2179_v4 = vsel %vm166_vm0, %v1945_v37, 0.0  ;;  %v1979_v2 = vld [vmem:[%s6703_s3 + $0x2b8] sm:$0xff] }
 0x135   :  { %v5483_v35 = vpop.xlane.xlu0 %703  ;;  %v1534_v17 = vrot.slane %v1333_v45, %v5044_v32  ;;  %2366 = vadd.xlane.f32.xlu1 %v2365_v33  ;;  %v1962_v45 = vld [vmem:[%s6703_s3 + $0x230] sm:$0xff]  ;;  %v1963_v37 = vld [vmem:[%s6703_s3 + $0x238] sm:$0xff] }
 0x136   :  { %v5487_v25 = vsel %vm6712_vm10, %v1687_v3, %v1683_v51  ;;  %v5493_v62 = vpop.xlane.xlu1 %1254  ;;  %v1944_v51 = vld [vmem:[%s6703_s3 + $0x1a0] sm:$0xff]  ;;  %v2128_v3 = vsel %vm166_vm0, %v1928_v8, 0.0  ;;  %v893_v8 = vadd.s32 4294967184, %v4924_v24  ;;  %vm905_vm10 = vcmask 1048512  }
 0x137   :  { %v5497_v56 = vsel %vm856_vm13, %v1534_v17, %v1530_v13  ;;  %v2176_v59 = vsel %vm166_vm0, %v1944_v51, 0.0  ;;  %v2038_v13 = vsel %vm166_vm0, %v1898_v54, 0.0  ;;  %v2009_v17 = vld [vmem:[%s6703_s3 + $0x3a8] sm:$0xff]  ;;  %v1992_v51 = vld [vmem:[%s6703_s3 + $0x320] sm:$0xff] }
 0x138   :  { %2315 = vadd.xlane.f32.xlu0 %v2314_v7  ;;  %v2281_v7 = vsel %vm166_vm0, %v1979_v2, 0.0  ;;  %v2371_v26 = vsel %vm166_vm0, %v2009_v17, 0.0  ;;  %v2131_v2 = vsel %vm166_vm0, %v1929_v55, 0.0  ;;  %v750_v17 = vmul.f32 0.0051020407, %v5437_v36 }
 0x139   :  { %v5502_v22 = vpop.xlane.xlu0 %1209  ;;  %2087 = vadd.xlane.f32.xlu1 %v2086_v27  ;;  %v2230_v27 = vsel %vm166_vm0, %v1962_v45, 0.0  ;;  %v900_v45 = vadd.s32 4294967176, %v4924_v24 }
 0x13a   :  { %v5508_v61 = vpop.xlane.xlu1 %707 }
 0x13b   :  { %v752_v36 = vmul.f32 0.0051020407, %v5508_v61 }
 0x13c   :  { %2036 = vadd.xlane.f32.xlu0 %v2035_v18 }
 0x13d   :  { %v5514_v19 = vpop.xlane.xlu0 %1305  ;;  %2177 = vadd.xlane.f32.xlu1 %v2176_v59  ;;  %v1916_v59 = vld [vmem:[%s6703_s3 + $0xc0] sm:$0xff] }
 0x13e   :  { %v5520_v34 = vpop.xlane.xlu1 %1212  ;;  %v2092_v40 = vsel %vm166_vm0, %v1916_v59, 0.0 }
 0x140   :  { %2126 = vadd.xlane.f32.xlu0 %v2125_v50  ;;  %v2320_v50 = vsel %vm166_vm0, %v1992_v51, 0.0  ;;  %v751_v51 = vmul.f32 0.0051020407, %v5483_v35  ;;  %v1930_v35 = vld [vmem:[%s6703_s3 + $0x130] sm:$0xff] }
 0x141   :  { %v5526_v29 = vpop.xlane.xlu0 %1161  ;;  %2279 = vadd.xlane.f32.xlu1 %v2278_v1  ;;  %v5673_v5 = vsel %vm166_vm0, %v1930_v35, 0.0 }
 0x142   :  { %v5532_v53 = vpop.xlane.xlu1 %1308 }
 0x144   :  { %2228 = vadd.xlane.f32.xlu0 %v2227_v60  ;;  %v1946_v60 = vld [vmem:[%s6703_s3 + $0x1b0] sm:$0xff] }
 0x145   :  { %v5538_v52 = vpop.xlane.xlu0 %1257  ;;  %2369 = vadd.xlane.f32.xlu1 %v2368_v63  ;;  %v2041_v63 = vsel %vm166_vm0, %v1899_v23, 0.0  ;;  %v2182_v54 = vsel %vm166_vm0, %v1946_v60, 0.0  ;;  %v1947_v23 = vld [vmem:[%s6703_s3 + $0x1b8] sm:$0xff] }
 0x146   :  { %v5544_v11 = vpop.xlane.xlu1 %1164 }
 0x148   :  { %2318 = vadd.xlane.f32.xlu0 %v2317_v47 }
 0x149   :  { %v5550_v6 = vpop.xlane.xlu0 %711  ;;  %2090 = vadd.xlane.f32.xlu1 %v2089_v14  ;;  %v1980_v14 = vld [vmem:[%s6703_s3 + $0x2c0] sm:$0xff] }
 0x14a   :  { %v5556_v42 = vpop.xlane.xlu1 %1260  ;;  %v2284_v59 = vsel %vm166_vm0, %v1980_v14, 0.0  ;;  %v753_v55 = vmul.f32 0.0051020407, %v5550_v6  ;;  %v5650_v14 = vsub.s32 %v900_v45, %v4929_v44  ;;  %v1994_v6 = vld [vmem:[%s6703_s3 + $0x330] sm:$0xff] }
 0x14b   :  { %v1918_v45 = vld [vmem:[%s6703_s3 + $0xd0] sm:$0xff]  ;;  %v5692_v35 = vsel %vm166_vm0, %v1994_v6, 0.0  ;;  %v1382_v6 = vmul.f32 0.020408163, %v5514_v19 }
 0x14c   :  { %2039 = vadd.xlane.f32.xlu0 %v2038_v13  ;;  %v2010_v13 = vld [vmem:[%s6703_s3 + $0x3b0] sm:$0xff]  ;;  %v969_v15 = vrot.slane %v753_v55, %v5084_v58  ;;  %v5699_v9 = vsel %vm166_vm0, %v1918_v45, 0.0 }
 0x14d   :  { %v5562_v33 = vpop.xlane.xlu0 %1215  ;;  %2180 = vadd.xlane.f32.xlu1 %v2179_v4  ;;  %v2374_v24 = vsel %vm166_vm0, %v2010_v13, 0.0  ;;  %v1964_v13 = vld [vmem:[%s6703_s3 + $0x240] sm:$0xff] }
 0x14e   :  { %v716_v10 = vpop.xlane.xlu1 %715 }
 0x150   :  { %2129 = vadd.xlane.f32.xlu0 %v2128_v3  ;;  %v1993_v3 = vld [vmem:[%s6703_s3 + $0x328] sm:$0xff] }
 0x151   :  { %v5572_v49 = vpop.xlane.xlu0 %1311  ;;  %2282 = vadd.xlane.f32.xlu1 %v2281_v7  ;;  %v1917_v7 = vld [vmem:[%s6703_s3 + $0xc8] sm:$0xff] }
 0x152   :  { %v5578_v18 = vpop.xlane.xlu1 %1218  ;;  %v2095_v60 = vsel %vm166_vm0, %v1917_v7, 0.0  ;;  %v959_v7 = vrot.slane %v751_v51, %v5057_v38 }
 0x154   :  { %2231 = vadd.xlane.f32.xlu0 %v2230_v27  ;;  %v1900_v27 = vld [vmem:[%s6703_s3 + $0x40] sm:$0xff] }
 0x155   :  { %v5584_v43 = vpop.xlane.xlu0 %1167  ;;  %2372 = vadd.xlane.f32.xlu1 %v2371_v26 }
 0x156   :  { %v5590_v1 = vpop.xlane.xlu1 %1314 }
 0x158   :  { %2321 = vadd.xlane.f32.xlu0 %v2320_v50  ;;  %v2233_v50 = vsel %vm166_vm0, %v1963_v37, 0.0  ;;  %v2044_v37 = vsel %vm166_vm0, %v1900_v27, 0.0 }
 0x159   :  { %v5596_v48 = vpop.xlane.xlu0 %1263  ;;  %2093 = vadd.xlane.f32.xlu1 %v2092_v40  ;;  %v2323_v40 = vsel %vm166_vm0, %v1993_v3, 0.0  ;;  %v754_v3 = vmul.f32 0.0051020407, %v716_v10  ;;  %v1901_v10 = vld [vmem:[%s6703_s3 + $0x48] sm:$0xff] }
 0x15a   :  { %v720_v47 = vpop.xlane.xlu1 %719 }
 0x15b   :  { %v755_v27 = vmul.f32 0.0051020407, %v720_v47  ;;  %v5686_v47 = vsel %vm166_vm0, %v1964_v13, 0.0  ;;  %v974_v13 = vrot.slane %v754_v3, %v5075_v21 }
 0x15c   :  { %2042 = vadd.xlane.f32.xlu0 %v2041_v63  ;;  %v1981_v63 = vld [vmem:[%s6703_s3 + $0x2c8] sm:$0xff] }
 0x15d   :  { %v656_v4 = vpop.xlane.xlu0 %655  ;;  %2183 = vadd.xlane.f32.xlu1 %v2182_v54  ;;  %v5645_v54 = vsub.s32 %v893_v8, %v4929_v44  ;;  %v954_v8 = vrot.slane %v750_v17, %v5035_v28  ;;  %v5664_v44 = vsel %vm166_vm0, %v1947_v23, 0.0  ;;  %v5676_v17 = vsel %vm166_vm0, %v1981_v63, 0.0 }
 0x15e   :  { %v5626_v26 = vpop.xlane.xlu1 %1221  ;;  %v964_v23 = vrot.slane %v752_v36, %v5049_v20  ;;  %v1365_v63 = vmul.f32 0.020408163, %v5493_v62  ;;  %v739_v12 = vmul.f32 0.0051020407, %v656_v4  ;;  %v5708_v62 = vsel %vm166_vm0, %v1901_v10, 0.0 }
 0x15f   :  { %v955_v36 = vsel %vm863_vm14, %v954_v8, %v5431_v39  ;;  %v979_v45 = vrot.slane %v755_v27, %v5645_v54  ;;  %v1351_v8 = vmul.f32 0.020408163, %v5520_v34  ;;  %v1383_v27 = vmul.f32 0.020408163, %v5532_v53 }
 0x160   :  { %2132 = vadd.xlane.f32.xlu0 %v2131_v2  ;;  %v2011_v2 = vld [vmem:[%s6703_s3 + $0x3b8] sm:$0xff]  ;;  %v960_v55 = vsel %vm870_vm15, %v959_v7, %v955_v36  ;;  %v1692_v10 = vrot.slane %v1365_v63, %v5044_v32  ;;  %v1334_v7 = vmul.f32 0.020408163, %v5526_v29  ;;  %v897_v19 = vrot.slane %v739_v12, %v5645_v54 }
 0x161   :  { %v5647_v61 = vpop.xlane.xlu0 %1170  ;;  %2285 = vadd.xlane.f32.xlu1 %v2284_v59  ;;  %v1948_v59 = vld [vmem:[%s6703_s3 + $0x1c0] sm:$0xff]  ;;  %v5689_v51 = vsel %vm166_vm0, %v2011_v2, 0.0  ;;  %v1350_v2 = vmul.f32 0.020408163, %v5502_v22  ;;  %v965_v39 = vsel %vm877_vm1, %v964_v23, %v960_v55  ;;  %v1366_v63 = vmul.f32 0.020408163, %v5538_v52 }
 0x162   :  { %v5670_v57 = vpop.xlane.xlu1 %1317  ;;  %v5711_v4 = vsel %vm166_vm0, %v1948_v59, 0.0  ;;  %v970_v22 = vsel %vm884_vm2, %v969_v15, %v965_v39  ;;  %v1623_v12 = vrot.slane %v1351_v8, %v5057_v38  ;;  %v1367_v36 = vmul.f32 0.020408163, %v5556_v42 }
 0x163   :  { %v975_v23 = vsel %vm891_vm3, %v974_v13, %v970_v22  ;;  %v1539_v55 = vrot.slane %v1334_v7, %v5035_v28  ;;  %v1384_v42 = vmul.f32 0.020408163, %v5572_v49  ;;  %v1353_v39 = vmul.f32 0.020408163, %v5578_v18 }
 0x164   :  { %2234 = vadd.xlane.f32.xlu0 %v2233_v50  ;;  %v1931_v50 = vld [vmem:[%s6703_s3 + $0x138] sm:$0xff]  ;;  %v980_v15 = vsel %vm898_vm12, %v979_v45, %v975_v23  ;;  %v1781_v45 = vrot.slane %v1383_v27, %v5057_v38  ;;  %v1697_v8 = vrot.slane %v1366_v63, %v5035_v28  ;;  %v1368_v7 = vmul.f32 0.020408163, %v5596_v48 }
 0x165   :  { %v5696_v41 = vpop.xlane.xlu0 %1266  ;;  %2375 = vadd.xlane.f32.xlu1 %v2374_v24  ;;  %v5720_v3 = vsel %vm166_vm0, %v1931_v50, 0.0  ;;  %v1776_v50 = vrot.slane %v1382_v6, %v5035_v28  ;;  %v899_v6 = vsel %vm898_vm12, %v897_v19, %v5110_v30  ;;  %v1354_v22 = vmul.f32 0.020408163, %v5626_v26 }
 0x166   :  { %v724_v0 = vpop.xlane.xlu1 %723  ;;  %v1633_v27 = vrot.slane %v1353_v39, %v5084_v58 }
 0x167   :  { %v756_v24 = vmul.f32 0.0051020407, %v724_v0  ;;  %v1618_v0 = vrot.slane %v1350_v2, %v5035_v28  ;;  %v1352_v2 = vmul.f32 0.020408163, %v5562_v33  ;;  %v5752_v33 = vmul.f32 0.020408163, %v5544_v11 }
 0x168   :  { %2324 = vadd.xlane.f32.xlu0 %v2323_v40  ;;  %v1777_v49 = vsel %vm863_vm14, %v1776_v50, %v5477_v16  ;;  %v1638_v63 = vrot.slane %v1354_v22, %v5075_v21 }
 0x169   :  { %v660_v59 = vpop.xlane.xlu0 %659  ;;  %v984_v34 = vrot.slane %v756_v24, %v5650_v14  ;;  %2096 = vadd.xlane.f32.xlu1 %v2095_v60  ;;  %v1693_v60 = vsel %vm856_vm13, %v1692_v10, %v5487_v25  ;;  %v1619_v25 = vsel %vm863_vm14, %v1618_v0, %v5463_v31  ;;  %v1385_v10 = vmul.f32 0.020408163, %v5590_v1 }
 0x16a   :  { %v740_v40 = vmul.f32 0.0051020407, %v660_v59  ;;  %v1225_v29 = vpop.xlane.xlu1 %1224  ;;  %v1624_v18 = vsel %vm870_vm15, %v1623_v12, %v1619_v25  ;;  %v1540_v31 = vsel %vm863_vm14, %v1539_v55, %v5497_v56  ;;  %v1628_v11 = vrot.slane %v1352_v2, %v5049_v20 }
 0x16b   :  { %v985_v13 = vsel %vm905_vm10, %v984_v34, %v980_v15  ;;  %v1782_v16 = vsel %vm870_vm15, %v1781_v45, %v1777_v49  ;;  %v1786_v59 = vrot.slane %v1384_v42, %v5049_v20  ;;  %v1386_v1 = vmul.f32 0.020408163, %v5670_v57 }
 0x16c   :  { %v904_v53 = vrot.slane %v740_v40, %v5650_v14  ;;  %2045 = vadd.xlane.f32.xlu0 %v2044_v37  ;;  %v1544_v56 = vrot.slane %v5752_v33, %v5057_v38  ;;  %v1355_v23 = vmul.f32 0.020408163, %v1225_v29  ;;  %v1336_v40 = vmul.f32 0.020408163, %v5584_v43 }
 0x16d   :  { %v1174_v52 = vpop.xlane.xlu0 %1173  ;;  %2186 = vadd.xlane.f32.xlu1 %v5664_v44  ;;  %v1702_v44 = vrot.slane %v1367_v36, %v5057_v38  ;;  %v1791_v0 = vrot.slane %v1385_v10, %v5084_v58  ;;  %v1629_v57 = vsel %vm877_vm1, %v1628_v11, %v1624_v18  ;;  %v1369_v15 = vmul.f32 0.020408163, %v5696_v41 }
 0x16e   :  { %v906_v37 = vsel %vm905_vm10, %v904_v53, %v899_v6  ;;  %v1321_v24 = vpop.xlane.xlu1 %1320  ;;  %v1787_v12 = vsel %vm877_vm1, %v1786_v59, %v1782_v16  ;;  %v1634_v36 = vsel %vm884_vm2, %v1633_v27, %v1629_v57  ;;  %v1796_v43 = vrot.slane %v1386_v1, %v5075_v21 }
 0x16f   :  { %v986_v30 = vsel %vm447_vm11, %v985_v13, %v906_v37  ;;  %v1387_v48 = vmul.f32 0.020408163, %v1321_v24  ;;  %v1643_v13 = vrot.slane %v1355_v23, %v5645_v54  ;;  %v1549_v41 = vrot.slane %v1336_v40, %v5049_v20 }
 0x170   :  { %2135 = vadd.xlane.f32.xlu0 %v5673_v5  ;;  %3732 = vmatmul.mubr.f32.vlgmr.msra.gmra.mrb[0].mxu1 %v986_v30  ;;  %v1698_v5 = vsel %vm863_vm14, %v1697_v8, %v1693_v60  ;;  %v1338_v60 = vmul.f32 0.020408163, %v1174_v52  ;;  %v1792_v6 = vsel %vm884_vm2, %v1791_v0, %v1787_v12 }
 0x171   :  { %v1270_v19 = vpop.xlane.xlu0 %1269  ;;  %2288 = vadd.xlane.f32.xlu1 %v5676_v17  ;;  %v1703_v26 = vsel %vm870_vm15, %v1702_v44, %v1698_v5  ;;  %v1707_v17 = vrot.slane %v1368_v7, %v5049_v20  ;;  %v1801_v55 = vrot.slane %v1387_v48, %v5645_v54  ;;  %v1797_v25 = vsel %vm891_vm3, %v1796_v43, %v1792_v6 }
 0x172   :  { %v1228_v34 = vpop.xlane.xlu1 %1227  ;;  %v1370_v53 = vmul.f32 0.020408163, %v1270_v19  ;;  %v1559_v24 = vrot.slane %v1338_v60, %v5075_v21  ;;  %v1545_v19 = vsel %vm870_vm15, %v1544_v56, %v1540_v31  ;;  %v1965_v31 = vld [vmem:[%s6703_s3 + $0x248] sm:$0xff] }
 0x173   :  { %v1356_v50 = vmul.f32 0.020408163, %v1228_v34  ;;  %v1708_v39 = vsel %vm877_vm1, %v1707_v17, %v1703_v26  ;;  %v1802_v44 = vsel %vm898_vm12, %v1801_v55, %v1797_v25  ;;  %v2012_v17 = vld [vmem:[%s6703_s3 + $0x3c0] sm:$0xff] }
 0x174   :  { %2237 = vadd.xlane.f32.xlu0 %v5686_v47  ;;  %v1337_v47 = vmul.f32 0.020408163, %v5647_v61  ;;  %v1712_v61 = vrot.slane %v1369_v15, %v5084_v58  ;;  %v1717_v8 = vrot.slane %v1370_v53, %v5075_v21  ;;  %v2239_v15 = vsel %vm166_vm0, %v1965_v31, 0.0  ;;  %v6734_v60 = vld [vmem:[#allocation3_spill] sm:$0xff] }
 0x175   :  { %v1177_v29 = vpop.xlane.xlu0 %1176  ;;  %2378 = vadd.xlane.f32.xlu1 %v5689_v51  ;;  %v1648_v45 = vrot.slane %v1356_v50, %v5650_v14  ;;  %v1639_v51 = vsel %vm891_vm3, %v1638_v63, %v1634_v36 }
 0x176   :  { %v1324_v2 = vpop.xlane.xlu1 %1323  ;;  %v1339_v37 = vmul.f32 0.020408163, %v1177_v29  ;;  %v1644_v18 = vsel %vm898_vm12, %v1643_v13, %v1639_v51  ;;  %v1713_v16 = vsel %vm884_vm2, %v1712_v61, %v1708_v39  ;;  %v2380_v13 = vsel %vm166_vm0, %v2012_v17, 0.0  ;;  %v1902_v61 = vld [vmem:[%s6703_s3 + $0x50] sm:$0xff] }
 0x177   :  { %v1388_v42 = vmul.f32 0.020408163, %v1324_v2  ;;  %v1649_v7 = vsel %vm905_vm10, %v1648_v45, %v1644_v18  ;;  %v1718_v5 = vsel %vm891_vm3, %v1717_v8, %v1713_v16 }
 0x178   :  { %2327 = vadd.xlane.f32.xlu0 %v5692_v35  ;;  %v1554_v35 = vrot.slane %v1337_v47, %v5084_v58  ;;  %v1564_v59 = vrot.slane %v1339_v37, %v5645_v54 }
 0x179   :  { %v1273_v52 = vpop.xlane.xlu0 %1272  ;;  %v1806_v33 = vrot.slane %v1388_v42, %v5650_v14  ;;  %2099 = vadd.xlane.f32.xlu1 %v5699_v9  ;;  %v1982_v9 = vld [vmem:[%s6703_s3 + $0x2d0] sm:$0xff] }
 0x17a   :  { %v1371_v30 = vmul.f32 0.020408163, %v1273_v52  ;;  %v1276_v49 = vpop.xlane.xlu1 %1275  ;;  %v2290_v26 = vsel %vm166_vm0, %v1982_v9, 0.0 }
 0x17b   :  { %v1372_v11 = vmul.f32 0.020408163, %v1276_v49  ;;  %v1807_v22 = vsel %vm905_vm10, %v1806_v33, %v1802_v44  ;;  %v1949_v33 = vld [vmem:[%s6703_s3 + $0x1c8] sm:$0xff]  ;;  %v1932_v44 = vld [vmem:[%s6703_s3 + $0x140] sm:$0xff] }
 0x17c   :  { %v1722_v10 = vrot.slane %v1371_v30, %v5645_v54  ;;  %2048 = vadd.xlane.f32.xlu0 %v5708_v62  ;;  %v1809_v1 = vsel %vm447_vm11, %v1807_v22, %v1649_v7  ;;  %v1550_v62 = vsel %vm877_vm1, %v1549_v41, %v1545_v19  ;;  %v1919_v41 = vld [vmem:[%s6703_s3 + $0xd8] sm:$0xff]  ;;  %v2140_v19 = vsel %vm166_vm0, %v1932_v44, 0.0 }
 0x17d   :  { %v1180_v27 = vpop.xlane.xlu0 %1179  ;;  %v1727_v23 = vrot.slane %v1372_v11, %v5650_v14  ;;  %2189 = vadd.xlane.f32.xlu1 %v5711_v4  ;;  %1876 = vmatprep.mubr.f32.mxu0 %v1809_v1  ;;  %v1555_v56 = vsel %vm884_vm2, %v1554_v35, %v1550_v62  ;;  %v2101_v52 = vsel %vm166_vm0, %v1919_v41, 0.0  ;;  %v2050_v35 = vsel %vm166_vm0, %v1902_v61, 0.0  ;;  %v1983_v22 = vld [vmem:[%s6703_s3 + $0x2d8] sm:$0xff]  ;;  %v1950_v61 = vld [vmem:[%s6703_s3 + $0x1d0] sm:$0xff] }
 0x17e   :  { %v1340_v48 = vmul.f32 0.020408163, %v1180_v27  ;;  %v2073_v34 = vpop.xlane.xlu1 %2072  ;;  %v1723_v40 = vsel %vm898_vm12, %v1722_v10, %v1718_v5  ;;  %v1560_v0 = vsel %vm891_vm3, %v1559_v24, %v1555_v56  ;;  %v2191_v11 = vsel %vm166_vm0, %v1949_v33, 0.0  ;;  %v1966_v27 = vld [vmem:[%s6703_s3 + $0x250] sm:$0xff]  ;;  %v2013_v56 = vld [vmem:[%s6703_s3 + $0x3c8] sm:$0xff] }
 0x17f   :  { %v2421_v57 = vmul.f32 0.0625, %v2073_v34  ;;  %v1728_v4 = vsel %vm905_vm10, %v1727_v23, %v1723_v40  ;;  %v1565_v29 = vsel %vm898_vm12, %v1564_v59, %v1560_v0  ;;  %v2293_v62 = vsel %vm166_vm0, %v1983_v22, 0.0  ;;  %v6735_v23 = vld [vmem:[#allocation4_spill] sm:$0xff] }
 0x180   :  { %v1569_v50 = vrot.slane %v1340_v48, %v5650_v14  ;;  %2138 = vadd.xlane.f32.xlu0 %v5720_v3  ;;  %v1995_v3 = vld [vmem:[%s6703_s3 + $0x338] sm:$0xff]  ;;  %v2383_v17 = vsel %vm166_vm0, %v2013_v56, 0.0 }
 0x181   :  { %v2070_v63 = vpop.xlane.xlu0 %2069  ;;  %v2817_v12 = vrot.slane %v2421_v57, %v4935_v46  ;;  %2291 = vadd.xlane.f32.xlu1 %v2290_v26  ;;  %v2329_v45 = vsel %vm166_vm0, %v1995_v3, 0.0  ;;  %v2242_v26 = vsel %vm166_vm0, %v1966_v27, 0.0  ;;  %v1996_v57 = vld [vmem:[%s6703_s3 + $0x340] sm:$0xff] }
 0x182   :  { %v2420_v36 = vmul.f32 0.0625, %v2070_v63  ;;  %v1570_v43 = vsel %vm905_vm10, %v1569_v50, %v1565_v29  ;;  %v2265_v47 = vpop.xlane.xlu1 %2264  ;;  %v2332_v3 = vsel %vm166_vm0, %v1996_v57, 0.0 }
 0x183   :  { %v1808_v53 = vsel %vm447_vm11, %v1728_v4, %v1570_v43  ;;  %v2485_v2 = vmul.f32 0.0625, %v2265_v47  ;;  %v6736_v47 = vld [vmem:[#allocation5_spill] sm:$0xff] }
 0x184   :  { %v2813_v55 = vrot.slane %v2420_v36, %v6734_v60  ;;  %2240 = vadd.xlane.f32.xlu0 %v2239_v15  ;;  %1877 = vmatmul.mubr.f32.vlgmr.msra.gmra.mrb[2].mxu0 %v1808_v53  ;;  %v1920_v36 = vld [vmem:[%s6703_s3 + $0xe0] sm:$0xff] }
 0x185   :  { %v2262_v6 = vpop.xlane.xlu0 %2261  ;;  %v3133_v39 = vrot.slane %v2485_v2, %v4935_v46  ;;  %2381 = vadd.xlane.f32.xlu1 %v2380_v13  ;;  %v1903_v2 = vld [vmem:[%s6703_s3 + $0x58] sm:$0xff] }
 0x186   :  { %v2818_v42 = vsel %vm364_vm4, %v2817_v12, %v2813_v55  ;;  %v2484_v51 = vmul.f32 0.0625, %v2262_v6  ;;  %v2025_v37 = vpop.xlane.xlu1 %2024  ;;  %v2104_v6 = vsel %vm166_vm0, %v1920_v36, 0.0  ;;  %v6737_v36 = vld [vmem:[#allocation6_spill] sm:$0xff] }
 0x187   :  { %v2405_v8 = vmul.f32 0.0625, %v2025_v37 }
 0x188   :  { %v3129_v25 = vrot.slane %v2484_v51, %v6734_v60  ;;  %2330 = vadd.xlane.f32.xlu0 %v2329_v45 }
 0x189   :  { %v2022_v30 = vpop.xlane.xlu0 %2021  ;;  %v2738_v49 = vrot.slane %v2405_v8, %v4935_v46  ;;  %2102 = vadd.xlane.f32.xlu1 %v2101_v52 }
 0x18a   :  { %v3134_v24 = vsel %vm364_vm4, %v3133_v39, %v3129_v25  ;;  %v2404_v18 = vmul.f32 0.0625, %v2022_v30  ;;  %v2214_v10 = vpop.xlane.xlu1 %2213  ;;  %v2053_v25 = vsel %vm166_vm0, %v1903_v2, 0.0 }
 0x18b   :  { %v2468_v5 = vmul.f32 0.0625, %v2214_v10  ;;  %v1984_v10 = vld [vmem:[%s6703_s3 + $0x2e0] sm:$0xff] }
 0x18c   :  { %v2734_v7 = vrot.slane %v2404_v18, %v6734_v60  ;;  %2051 = vadd.xlane.f32.xlu0 %v2050_v35  ;;  %v1933_v35 = vld [vmem:[%s6703_s3 + $0x148] sm:$0xff]  ;;  %v2296_v27 = vsel %vm166_vm0, %v1984_v10, 0.0 }
 0x18d   :  { %v2076_v9 = vpop.xlane.xlu0 %2075  ;;  %2192 = vadd.xlane.f32.xlu1 %v2191_v11  ;;  %v3050_v63 = vrot.slane %v2468_v5, %v6734_v60 }
 0x18e   :  { %v2739_v16 = vsel %vm364_vm4, %v2738_v49, %v2734_v7  ;;  %v2422_v59 = vmul.f32 0.0625, %v2076_v9  ;;  %v2268_v1 = vpop.xlane.xlu1 %2267  ;;  %v2194_v49 = vsel %vm166_vm0, %v1950_v61, 0.0  ;;  %v2143_v7 = vsel %vm166_vm0, %v1933_v35, 0.0 }
 0x18f   :  { %v2486_v31 = vmul.f32 0.0625, %v2268_v1 }
 0x190   :  { %v2822_v48 = vrot.slane %v2422_v59, %v6735_v23  ;;  %2141 = vadd.xlane.f32.xlu0 %v2140_v19 }
 0x191   :  { %v2217_v34 = vpop.xlane.xlu0 %2216  ;;  %v3138_v0 = vrot.slane %v2486_v31, %v6735_v23  ;;  %2294 = vadd.xlane.f32.xlu1 %v2293_v62 }
 0x192   :  { %v2823_v40 = vsel %vm371_vm5, %v2822_v48, %v2818_v42  ;;  %v2469_v50 = vmul.f32 0.0625, %v2217_v34  ;;  %v2079_v4 = vpop.xlane.xlu1 %2078  ;;  %v2014_v48 = vld [vmem:[%s6703_s3 + $0x3d0] sm:$0xff] }
 0x193   :  { %v3139_v15 = vsel %vm371_vm5, %v3138_v0, %v3134_v24  ;;  %v2423_v12 = vmul.f32 0.0625, %v2079_v4  ;;  %v1997_v0 = vld [vmem:[%s6703_s3 + $0x348] sm:$0xff]  ;;  %v2386_v57 = vsel %vm166_vm0, %v2014_v48, 0.0 }
 0x194   :  { %v3054_v29 = vrot.slane %v2469_v50, %v4935_v46  ;;  %2243 = vadd.xlane.f32.xlu0 %v2242_v26 }
 0x195   :  { %v2028_v43 = vpop.xlane.xlu0 %2027  ;;  %v2827_v13 = vrot.slane %v2423_v12, %v6736_v47  ;;  %2384 = vadd.xlane.f32.xlu1 %v2383_v17 }
 0x196   :  { %v3055_v53 = vsel %vm364_vm4, %v3054_v29, %v3050_v63  ;;  %v2406_v55 = vmul.f32 0.0625, %v2028_v43  ;;  %v2169_v41 = vpop.xlane.xlu1 %2168  ;;  %v1921_v63 = vld [vmem:[%s6703_s3 + $0xe8] sm:$0xff]  ;;  %v2335_v29 = vsel %vm166_vm0, %v1997_v0, 0.0 }
 0x197   :  { %v2828_v45 = vsel %vm378_vm6, %v2827_v13, %v2823_v40  ;;  %v2453_v51 = vmul.f32 0.0625, %v2169_v41 }
 0x198   :  { %v2743_v42 = vrot.slane %v2406_v55, %v6735_v23  ;;  %v5899_v39 = vpop.f32.mrb[0].mxu0  ;;  %2333 = vadd.xlane.f32.xlu0 %v2332_v3  ;;  %v2107_v55 = vsel %vm166_vm0, %v1921_v63, 0.0 }
 0x199   :  { %v3698_v37 = vpop.f32.mrb[1].mxu0  ;;  %v2166_v52 = vpop.xlane.xlu0 %2165  ;;  %v2975_v33 = vrot.slane %v2453_v51, %v4935_v46  ;;  %2105 = vadd.xlane.f32.xlu1 %v2104_v6 }
 0x19a   :  { %v2744_v8 = vsel %vm371_vm5, %v2743_v42, %v2739_v16  ;;  %v2452_v30 = vmul.f32 0.0625, %v2166_v52  ;;  %v2271_v24 = vpop.xlane.xlu1 %2270  ;;  %v1967_v16 = vld [vmem:[%s6703_s3 + $0x258] sm:$0xff] }
 0x19b   :  { %v2487_v44 = vmul.f32 0.0625, %v2271_v24  ;;  %v2245_v56 = vsel %vm166_vm0, %v1967_v16, 0.0  ;;  %v1951_v42 = vld [vmem:[%s6703_s3 + $0x1d8] sm:$0xff] }
 0x19c   :  { %v2971_v18 = vrot.slane %v2452_v30, %v6734_v60  ;;  %2054 = vadd.xlane.f32.xlu0 %v2053_v25  ;;  %v2197_v30 = vsel %vm166_vm0, %v1951_v42, 0.0 }
 0x19d   :  { %v2220_v11 = vpop.xlane.xlu0 %2219  ;;  %v3143_v9 = vrot.slane %v2487_v44, %v6736_v47  ;;  %2195 = vadd.xlane.f32.xlu1 %v2194_v49 }
 0x19e   :  { %v5917_v22 = vsel %vm364_vm4, %v2975_v33, %v2971_v18  ;;  %v2470_v19 = vmul.f32 0.0625, %v2220_v11  ;;  %v2361_v59 = vpop.xlane.xlu1 %2360 }
 0x19f   :  { %v5925_v1 = vsel %vm378_vm6, %v3143_v9, %v3139_v15  ;;  %v2517_v5 = vmul.f32 0.0625, %v2361_v59 }
 0x1a0   :  { %v3059_v62 = vrot.slane %v2470_v19, %v6735_v23  ;;  %2144 = vadd.xlane.f32.xlu0 %v2143_v7  ;;  %v1968_v7 = vld [vmem:[%s6703_s3 + $0x260] sm:$0xff] }
 0x1a1   :  { %v2358_v31 = vpop.xlane.xlu0 %2357  ;;  %v3291_v26 = vrot.slane %v2517_v5, %v4935_v46  ;;  %2297 = vadd.xlane.f32.xlu1 %v2296_v27  ;;  %v2015_v27 = vld [vmem:[%s6703_s3 + $0x3d8] sm:$0xff]  ;;  %v2248_v5 = vsel %vm166_vm0, %v1968_v7, 0.0 }
 0x1a2   :  { %v3060_v34 = vsel %vm371_vm5, %v3059_v62, %v3055_v53  ;;  %v2516_v40 = vmul.f32 0.0625, %v2358_v31  ;;  %v2082_v50 = vpop.xlane.xlu1 %2081  ;;  %v1904_v53 = vld [vmem:[%s6703_s3 + $0x60] sm:$0xff] }
 0x1a3   :  { %v2424_v17 = vmul.f32 0.0625, %v2082_v50  ;;  %v2056_v61 = vsel %vm166_vm0, %v1904_v53, 0.0 }
 0x1a4   :  { %v3287_v4 = vrot.slane %v2516_v40, %v6734_v60  ;;  %2246 = vadd.xlane.f32.xlu0 %v2245_v56  ;;  %v1998_v56 = vld [vmem:[%s6703_s3 + $0x350] sm:$0xff] }
 0x1a5   :  { %v2031_v15 = vpop.xlane.xlu0 %2030  ;;  %v2832_v43 = vrot.slane %v2424_v17, %v6737_v36  ;;  %2387 = vadd.xlane.f32.xlu1 %v2386_v57  ;;  %v1922_v57 = vld [vmem:[%s6703_s3 + $0xf0] sm:$0xff] }
 0x1a6   :  { %v3292_v12 = vsel %vm364_vm4, %v3291_v26, %v3287_v4  ;;  %v2407_v3 = vmul.f32 0.0625, %v2031_v15  ;;  %v2121_v13 = vpop.xlane.xlu1 %2120  ;;  %v2389_v26 = vsel %vm166_vm0, %v2015_v27, 0.0 }
 0x1a7   :  { %v5950_v2 = vsel %vm385_vm7, %v2832_v43, %v2828_v45  ;;  %v2437_v6 = vmul.f32 0.0625, %v2121_v13  ;;  %v1934_v45 = vld [vmem:[%s6703_s3 + $0x150] sm:$0xff] }
 0x1a8   :  { %v2748_v41 = vrot.slane %v2407_v3, %v6736_v47  ;;  %2336 = vadd.xlane.f32.xlu0 %v2335_v29  ;;  %v2146_v18 = vsel %vm166_vm0, %v1934_v45, 0.0  ;;  %v1905_v29 = vld [vmem:[%s6703_s3 + $0x68] sm:$0xff]  ;;  %v2110_v3 = vsel %vm166_vm0, %v1922_v57, 0.0 }
 0x1a9   :  { %v2118_v51 = vpop.xlane.xlu0 %2117  ;;  %v2896_v52 = vrot.slane %v2437_v6, %v4935_v46  ;;  %2108 = vadd.xlane.f32.xlu1 %v2107_v55  ;;  %v2059_v42 = vsel %vm166_vm0, %v1905_v29, 0.0 }
 0x1aa   :  { %v5958_v37 = vsel %vm378_vm6, %v2748_v41, %v2744_v8  ;;  %v2436_v25 = vmul.f32 0.0625, %v2118_v51  ;;  %v2223_v33 = vpop.xlane.xlu1 %2222  ;;  %v1985_v8 = vld [vmem:[%s6703_s3 + $0x2e8] sm:$0xff] }
 0x1ab   :  { %v2471_v24 = vmul.f32 0.0625, %v2223_v33  ;;  %v2299_v19 = vsel %vm166_vm0, %v1985_v8, 0.0 }
 0x1ac   :  { %v2892_v35 = vrot.slane %v2436_v25, %v6734_v60  ;;  %2057 = vadd.xlane.f32.xlu0 %v2056_v61  ;;  %v6738_v61 = vld [vmem:[#allocation7_spill] sm:$0xff] }
 0x1ad   :  { %v2172_v49 = vpop.xlane.xlu0 %2171  ;;  %v3064_v10 = vrot.slane %v2471_v24, %v6736_v47  ;;  %2198 = vadd.xlane.f32.xlu1 %v2197_v30 }
 0x1ae   :  { %v5971_v44 = vsel %vm364_vm4, %v2896_v52, %v2892_v35  ;;  %v2454_v11 = vmul.f32 0.0625, %v2172_v49  ;;  %v2310_v9 = vpop.xlane.xlu1 %2309  ;;  %v1986_v35 = vld [vmem:[%s6703_s3 + $0x2f0] sm:$0xff] }
 0x1af   :  { %v5979_v16 = vsel %vm378_vm6, %v3064_v10, %v3060_v34  ;;  %v2500_v40 = vmul.f32 0.0625, %v2310_v9 }
 0x1b0   :  { %v2980_v59 = vrot.slane %v2454_v11, %v6735_v23  ;;  %2147 = vadd.xlane.f32.xlu0 %v2146_v18  ;;  %v2302_v11 = vsel %vm166_vm0, %v1986_v35, 0.0 }
 0x1b1   :  { %v2274_v62 = vpop.xlane.xlu0 %2273  ;;  %2300 = vadd.xlane.f32.xlu1 %v2299_v19  ;;  %v3208_v53 = vrot.slane %v2500_v40, %v6734_v60  ;;  %v1935_v60 = vld [vmem:[%s6703_s3 + $0x158] sm:$0xff]  ;;  %v2016_v19 = vld [vmem:[%s6703_s3 + $0x3e0] sm:$0xff] }
 0x1b2   :  { %v2981_v48 = vsel %vm371_vm5, %v2980_v59, %v5917_v22  ;;  %v2488_v31 = vmul.f32 0.0625, %v2274_v62  ;;  %v2364_v34 = vpop.xlane.xlu1 %2363  ;;  %v2338_v22 = vsel %vm166_vm0, %v1998_v56, 0.0  ;;  %v2149_v8 = vsel %vm166_vm0, %v1935_v60, 0.0  ;;  %v1923_v40 = vld [vmem:[%s6703_s3 + $0xf8] sm:$0xff] }
 0x1b3   :  { %v2518_v50 = vmul.f32 0.0625, %v2364_v34 }
 0x1b4   :  { %v3148_v0 = vrot.slane %v2488_v31, %v6737_v36  ;;  %2249 = vadd.xlane.f32.xlu0 %v2248_v5  ;;  %v1999_v5 = vld [vmem:[%s6703_s3 + $0x358] sm:$0xff] }
 0x1b5   :  { %v2313_v4 = vpop.xlane.xlu0 %2312  ;;  %v3296_v63 = vrot.slane %v2518_v50, %v6735_v23  ;;  %2390 = vadd.xlane.f32.xlu1 %v2389_v26  ;;  %v2341_v50 = vsel %vm166_vm0, %v1999_v5, 0.0 }
 0x1b6   :  { %v3149_v17 = vsel %vm385_vm7, %v3148_v0, %v5925_v1  ;;  %v2501_v15 = vmul.f32 0.0625, %v2313_v4  ;;  %v2085_v43 = vpop.xlane.xlu1 %2084  ;;  %v1952_v1 = vld [vmem:[%s6703_s3 + $0x1e0] sm:$0xff] }
 0x1b7   :  { %v3297_v13 = vsel %vm371_vm5, %v3296_v63, %v3292_v12  ;;  %v2425_v41 = vmul.f32 0.0625, %v2085_v43  ;;  %v2200_v12 = vsel %vm166_vm0, %v1952_v1, 0.0 }
 0x1b8   :  { %v3212_v55 = vrot.slane %v2501_v15, %v4935_v46  ;;  %2339 = vadd.xlane.f32.xlu0 %v2338_v22  ;;  %v2113_v15 = vsel %vm166_vm0, %v1923_v40, 0.0  ;;  %v2533_v40 = vld [vmem:[%s6704_s10 + $0x8] sm:$0xff] }
 0x1b9   :  { %v2034_v6 = vpop.xlane.xlu0 %2033  ;;  %v2837_v52 = vrot.slane %v2425_v41, %v6738_v61  ;;  %2111 = vadd.xlane.f32.xlu1 %v2110_v3 }
 0x1ba   :  { %v3213_v51 = vsel %vm364_vm4, %v3212_v55, %v3208_v53  ;;  %v2408_v25 = vmul.f32 0.0625, %v2034_v6  ;;  %v2175_v46 = vpop.xlane.xlu1 %2174  ;;  %v6739_v6 = vld [vmem:[#allocation8_spill] sm:$0xff]  ;;  %vm6741_vm4 = vcmask 523712  }
 0x1bb   :  { %v2838_v45 = vsel %vm392_vm8, %v2837_v52, %v5950_v2  ;;  %v2455_v30 = vmul.f32 0.0625, %v2175_v46  ;;  %v1969_v2 = vld [vmem:[%s6703_s3 + $0x268] sm:$0xff] }
 0x1bc   :  { %v2753_v33 = vrot.slane %v2408_v25, %v6737_v36  ;;  %2060 = vadd.xlane.f32.xlu0 %v2059_v42 }
 0x1bd   :  { %v2124_v24 = vpop.xlane.xlu0 %2123  ;;  %v2985_v18 = vrot.slane %v2455_v30, %v6736_v47  ;;  %2201 = vadd.xlane.f32.xlu1 %v2200_v12 }
 0x1be   :  { %v2754_v49 = vsel %vm385_vm7, %v2753_v33, %v5958_v37  ;;  %v2277_v10 = vpop.xlane.xlu1 %2276  ;;  %v2251_v37 = vsel %vm166_vm0, %v1969_v2, 0.0  ;;  %v2438_v53 = vmul.f32 0.0625, %v2124_v24  ;;  %v1970_v2 = vld [vmem:[%s6703_s3 + $0x270] sm:$0xff] }
 0x1bf   :  { %v2986_v7 = vsel %vm378_vm6, %v2985_v18, %v2981_v48  ;;  %v2489_v9 = vmul.f32 0.0625, %v2277_v10  ;;  %v2392_v48 = vsel %vm166_vm0, %v2016_v19, 0.0 }
 0x1c0   :  { %2150 = vadd.xlane.f32.xlu0 %v2149_v8  ;;  %v2901_v30 = vrot.slane %v2438_v53, %v6735_v23 }
 0x1c1   :  { %v2226_v59 = vpop.xlane.xlu0 %2225  ;;  %v3153_v27 = vrot.slane %v2489_v9, %v6738_v61  ;;  %2303 = vadd.xlane.f32.xlu1 %v2302_v11 }
 0x1c2   :  { %v2472_v62 = vmul.f32 0.0625, %v2226_v59  ;;  %v2367_v31 = vpop.xlane.xlu1 %2366  ;;  %v2902_v59 = vsel %vm371_vm5, %v2901_v30, %v5971_v44  ;;  %v2000_v44 = vld [vmem:[%s6703_s3 + $0x360] sm:$0xff] }
 0x1c3   :  { %v6042_v56 = vsel %vm392_vm8, %v3153_v27, %v3149_v17  ;;  %v2519_v26 = vmul.f32 0.0625, %v2367_v31  ;;  %v1906_v17 = vld [vmem:[%s6703_s3 + $0x70] sm:$0xff]  ;;  %v2254_v27 = vsel %vm166_vm0, %v1970_v2, 0.0 }
 0x1c4   :  { %v3069_v34 = vrot.slane %v2472_v62, %v6737_v36  ;;  %2252 = vadd.xlane.f32.xlu0 %v2251_v37  ;;  %v2062_v41 = vsel %vm166_vm0, %v1906_v17, 0.0  ;;  %v2548_v62 = vld [vmem:[%s6704_s10 + $0x80] sm:$0xff]  ;;  %v6740_v2 = vld [vmem:[#allocation9_spill] sm:$0xff] }
 0x1c5   :  { %v2316_v0 = vpop.xlane.xlu0 %2315  ;;  %v3301_v4 = vrot.slane %v2519_v26, %v6736_v47  ;;  %2393 = vadd.xlane.f32.xlu1 %v2392_v48  ;;  %v2532_v26 = vld [vmem:[%s6704_s10] sm:$0xff] }
 0x1c6   :  { %v6051_v57 = vsel %vm385_vm7, %v3069_v34, %v5979_v16  ;;  %v2502_v22 = vmul.f32 0.0625, %v2316_v0  ;;  %v2088_v63 = vpop.xlane.xlu1 %2087  ;;  %v1953_v16 = vld [vmem:[%s6703_s3 + $0x1e8] sm:$0xff] }
 0x1c7   :  { %v6059_v29 = vsel %vm378_vm6, %v3301_v4, %v3297_v13  ;;  %v2426_v3 = vmul.f32 0.0625, %v2088_v63  ;;  %v1936_v13 = vld [vmem:[%s6703_s3 + $0x160] sm:$0xff]  ;;  %v2203_v60 = vsel %vm166_vm0, %v1953_v16, 0.0  ;;  %v3804_v4 = vpack.c.bf16 %v2533_v40, %v2532_v26  ;;  %v2550_v16 = vld [vmem:[%s6704_s10 + $0x90] sm:$0xff] }
 0x1c8   :  { %v3217_v43 = vrot.slane %v2502_v22, %v6735_v23  ;;  %2342 = vadd.xlane.f32.xlu0 %v2341_v50  ;;  %v2152_v24 = vsel %vm166_vm0, %v1936_v13, 0.0  ;;  %v2534_v13 = vld [vmem:[%s6704_s10 + $0x10] sm:$0xff] }
 0x1c9   :  { %v2037_v55 = vpop.xlane.xlu0 %2036  ;;  %v2842_v42 = vrot.slane %v2426_v3, %v6739_v6  ;;  %2114 = vadd.xlane.f32.xlu1 %v2113_v15  ;;  %v1937_v15 = vld [vmem:[%s6703_s3 + $0x168] sm:$0xff]  ;;  %v2344_v3 = vsel %vm166_vm0, %v2000_v44, 0.0  ;;  %v2554_v26 = vld [vmem:[%s6704_s10 + $0xb0] sm:$0xff] }
 0x1ca   :  { %v6067_v1 = vsel %vm371_vm5, %v3217_v43, %v3213_v51  ;;  %v2409_v52 = vmul.f32 0.0625, %v2037_v55  ;;  %v2178_v25 = vpop.xlane.xlu1 %2177  ;;  %v1987_v51 = vld [vmem:[%s6703_s3 + $0x2f8] sm:$0xff]  ;;  %vm6742_vm5 = vmmov %vm6741_vm4 }
 0x1cb   :  { %v6075_v46 = vsel %vm399_vm9, %v2842_v42, %v2838_v45  ;;  %v2456_v33 = vmul.f32 0.0625, %v2178_v25  ;;  %v2305_v11 = vsel %vm166_vm0, %v1987_v51, 0.0  ;;  %v1907_v42 = vld [vmem:[%s6703_s3 + $0x78] sm:$0xff] }
 0x1cc   :  { %v2758_v12 = vrot.slane %v2409_v52, %v6738_v61  ;;  %2063 = vadd.xlane.f32.xlu0 %v2062_v41  ;;  %v2535_v25 = vld [vmem:[%s6704_s10 + $0x18] sm:$0xff] }
 0x1cd   :  { %v2127_v35 = vpop.xlane.xlu0 %2126  ;;  %v2990_v18 = vrot.slane %v2456_v33, %v6737_v36  ;;  %2204 = vadd.xlane.f32.xlu1 %v2203_v60 }
 0x1ce   :  { %v6084_v8 = vsel %vm392_vm8, %v2758_v12, %v2754_v49  ;;  %v2439_v45 = vmul.f32 0.0625, %v2127_v35  ;;  %v2280_v10 = vpop.xlane.xlu1 %2279  ;;  %v2017_v49 = vld [vmem:[%s6703_s3 + $0x3e8] sm:$0xff]  ;;  %v3808_v12 = vpack.c.bf16 %v2535_v25, %v2534_v13  ;;  %v1971_v35 = vld [vmem:[%s6703_s3 + $0x278] sm:$0xff] }
 0x1cf   :  { %v6092_v9 = vsel %vm385_vm7, %v2990_v18, %v2986_v7  ;;  %v2490_v19 = vmul.f32 0.0625, %v2280_v10  ;;  %v2549_v7 = vld [vmem:[%s6704_s10 + $0x88] sm:$0xff]  ;;  %v2395_v50 = vsel %vm166_vm0, %v2017_v49, 0.0  ;;  %v2065_v18 = vsel %vm166_vm0, %v1907_v42, 0.0  ;;  %v2536_v49 = vld [vmem:[%s6704_s10 + $0x20] sm:$0xff]  ;;  %v1938_v42 = vld [vmem:[%s6703_s3 + $0x170] sm:$0xff] }
 0x1d0   :  { %v2906_v23 = vrot.slane %v2439_v45, %v6736_v47  ;;  %2153 = vadd.xlane.f32.xlu0 %v2152_v24  ;;  %v3802_v34 = vpack.c.bf16 %v2549_v7, %v2548_v62  ;;  %v2552_v45 = vld [vmem:[%s6704_s10 + $0xa0] sm:$0xff]  ;;  %v2557_v25 = vld [vmem:[%s6704_s10 + $0xc8] sm:$0xff] }
 0x1d1   :  { %v2229_v37 = vpop.xlane.xlu0 %2228  ;;  %v3158_v31 = vrot.slane %v2490_v19, %v6739_v6  ;;  %2306 = vadd.xlane.f32.xlu1 %v2305_v11 }
 0x1d2   :  { %v6108_v5 = vsel %vm378_vm6, %v2906_v23, %v2902_v59  ;;  %v2473_v48 = vmul.f32 0.0625, %v2229_v37  ;;  %v2370_v0 = vpop.xlane.xlu1 %2369  ;;  %3803 = vmatprep.subr.bf16.mxu1 %v3802_v34  ;;  %v1954_v23 = vld [vmem:[%s6703_s3 + $0x1f0] sm:$0xff]  ;;  %v2537_v59 = vld [vmem:[%s6704_s10 + $0x28] sm:$0xff] }
 0x1d3   :  { %v6123_v22 = vsel %vm399_vm9, %v3158_v31, %v6042_v56  ;;  %v2520_v63 = vmul.f32 0.0625, %v2370_v0  ;;  %3805 = vmatpush3.bf16.msra.mxu1 %v3804_v4  ;;  %v2551_v56 = vld [vmem:[%s6704_s10 + $0x98] sm:$0xff]  ;;  %v2206_v34 = vsel %vm166_vm0, %v1954_v23, 0.0  ;;  %v2001_v4 = vld [vmem:[%s6703_s3 + $0x368] sm:$0xff] }
 0x1d4   :  { %v3074_v17 = vrot.slane %v2473_v48, %v6738_v61  ;;  %2255 = vadd.xlane.f32.xlu0 %v2254_v27  ;;  %v3806_v52 = vpack.c.bf16 %v2551_v56, %v2550_v16  ;;  %v3812_v27 = vpack.c.bf16 %v2537_v59, %v2536_v49  ;;  %v2018_v48 = vld [vmem:[%s6703_s3 + $0x3f0] sm:$0xff]  ;;  %v2347_v13 = vsel %vm166_vm0, %v2001_v4, 0.0  ;;  %v2565_v23 = vld [vmem:[%s6704_s10 + $0x108] sm:$0xff] }
 0x1d5   :  { %v2319_v43 = vpop.xlane.xlu0 %2318  ;;  %v3306_v55 = vrot.slane %v2520_v63, %v6737_v36  ;;  %2396 = vadd.xlane.f32.xlu1 %v2395_v50  ;;  %v2538_v63 = vld [vmem:[%s6704_s10 + $0x30] sm:$0xff] }
 0x1d6   :  { %v6138_v53 = vsel %vm392_vm8, %v3074_v17, %v6051_v57  ;;  %v2503_v41 = vmul.f32 0.0625, %v2319_v43  ;;  %v2091_v60 = vpop.xlane.xlu1 %2090  ;;  %v2155_v57 = vsel %vm166_vm0, %v1937_v15, 0.0  ;;  %3807 = vmatprep.subr.bf16.mxu1 %v3806_v52  ;;  %v2539_v15 = vld [vmem:[%s6704_s10 + $0x38] sm:$0xff]  ;;  %v2542_v4 = vld [vmem:[%s6704_s10 + $0x50] sm:$0xff] }
 0x1d7   :  { %v6153_v33 = vsel %vm385_vm7, %v3306_v55, %v6059_v29  ;;  %v2427_v30 = vmul.f32 0.0625, %v2091_v60  ;;  %3809 = vmatpush3.bf16.msra.mxu1 %v3808_v12  ;;  %v2553_v29 = vld [vmem:[%s6704_s10 + $0xa8] sm:$0xff]  ;;  %v2580_v60 = vld [vmem:[%s6704_s10 + $0x180] sm:$0xff] }
 0x1d8   :  { %v3222_v51 = vrot.slane %v2503_v41, %v6736_v47  ;;  %2345 = vadd.xlane.f32.xlu0 %v2344_v3  ;;  %v3810_v19 = vpack.c.bf16 %v2553_v29, %v2552_v45  ;;  %v3816_v3 = vpack.c.bf16 %v2539_v15, %v2538_v63  ;;  %v1955_v41 = vld [vmem:[%s6703_s3 + $0x1f8] sm:$0xff] }
 0x1d9   :  { %v2040_v24 = vpop.xlane.xlu0 %2039  ;;  %v2847_v10 = vrot.slane %v2427_v30, %v6740_v2  ;;  %2156 = vadd.xlane.f32.xlu1 %v2155_v57 }
 0x1da   :  { %v6168_v47 = vsel %vm378_vm6, %v3222_v51, %v6067_v1  ;;  %v2410_v11 = vmul.f32 0.0625, %v2040_v24  ;;  %v2181_v37 = vpop.xlane.xlu1 %2180  ;;  %v2257_v1 = vsel %vm166_vm0, %v1971_v35, 0.0  ;;  %3811 = vmatprep.subr.bf16.mxu1 %v3810_v19  ;;  %v2581_v35 = vld [vmem:[%s6704_s10 + $0x188] sm:$0xff]  ;;  %v2540_v24 = vld [vmem:[%s6704_s10 + $0x40] sm:$0xff]  ;;  %vm6743_vm6 = vmmov %vm6741_vm4 }
 0x1db   :  { %v6183_v62 = vsel %vm6741_vm4, %v2847_v10, %v6075_v46  ;;  %v2457_v31 = vmul.f32 0.0625, %v2181_v37  ;;  %3813 = vmatpush3.bf16.msra.mxu1 %v3812_v27  ;;  %v2555_v46 = vld [vmem:[%s6704_s10 + $0xb8] sm:$0xff]  ;;  %v3834_v29 = vpack.c.bf16 %v2581_v35, %v2580_v60  ;;  %v2584_v60 = vld [vmem:[%s6704_s10 + $0x1a0] sm:$0xff] }
 0x1dc   :  { %v2763_v7 = vrot.slane %v2410_v11, %v6739_v6  ;;  %2066 = vadd.xlane.f32.xlu0 %v2065_v18  ;;  %v3814_v17 = vpack.c.bf16 %v2555_v46, %v2554_v26  ;;  %v2541_v18 = vld [vmem:[%s6704_s10 + $0x48] sm:$0xff]  ;;  %v2564_v11 = vld [vmem:[%s6704_s10 + $0x100] sm:$0xff]  ;;  %v2019_v37 = vld [vmem:[%s6703_s3 + $0x3f8] sm:$0xff] }
 0x1dd   :  { %v2130_v44 = vpop.xlane.xlu0 %2129  ;;  %v2995_v0 = vrot.slane %v2457_v31, %v6738_v61  ;;  %2258 = vadd.xlane.f32.xlu1 %v2257_v1  ;;  %v3820_v10 = vpack.c.bf16 %v2541_v18, %v2540_v24  ;;  %v2002_v1 = vld [vmem:[%s6703_s3 + $0x370] sm:$0xff]  ;;  %v3836_v27 = vpack.c.bf16 %v2565_v23, %v2564_v11  ;;  %v2158_v31 = vsel %vm166_vm0, %v1938_v42, 0.0  ;;  %3835 = vmatprep.subr.bf16.mxu0 %v3834_v29  ;;  %v2003_v42 = vld [vmem:[%s6703_s3 + $0x378] sm:$0xff]  ;;  %v2585_v24 = vld [vmem:[%s6704_s10 + $0x1a8] sm:$0xff] }
 0x1de   :  { %v6198_v40 = vsel %vm399_vm9, %v2763_v7, %v6084_v8  ;;  %v2440_v50 = vmul.f32 0.0625, %v2130_v44  ;;  %v2283_v43 = vpop.xlane.xlu1 %2282  ;;  %v2398_v8 = vsel %vm166_vm0, %v2018_v48, 0.0  ;;  %3815 = vmatprep.subr.bf16.mxu1 %v3814_v17  ;;  %v2559_v48 = vld [vmem:[%s6704_s10 + $0xd8] sm:$0xff]  ;;  %v2582_v44 = vld [vmem:[%s6704_s10 + $0x190] sm:$0xff]  ;;  %v2401_v63 = vsel %vm166_vm0, %v2019_v37, 0.0  ;;  %v2544_v18 = vld [vmem:[%s6704_s10 + $0x60] sm:$0xff] }
 0x1df   :  { %v6213_v16 = vsel %vm392_vm8, %v2995_v0, %v6092_v9  ;;  %v2491_v55 = vmul.f32 0.0625, %v2283_v43  ;;  %3817 = vmatpush3.bf16.msra.mxu1 %v3816_v3  ;;  %v2556_v9 = vld [vmem:[%s6704_s10 + $0xc0] sm:$0xff]  ;;  %3837 = vmatpush3.bf16.msra.mxu0 %v3836_v27  ;;  %v2543_v17 = vld [vmem:[%s6704_s10 + $0x58] sm:$0xff]  ;;  %v3842_v29 = vpack.c.bf16 %v2585_v24, %v2584_v60  ;;  %v2569_v23 = vld [vmem:[%s6704_s10 + $0x128] sm:$0xff] }
 0x1e0   :  { %v2911_v56 = vrot.slane %v2440_v50, %v6737_v36  ;;  %2207 = vadd.xlane.f32.xlu0 %v2206_v34  ;;  %v3818_v30 = vpack.c.bf16 %v2557_v25, %v2556_v9  ;;  %v2583_v50 = vld [vmem:[%s6704_s10 + $0x198] sm:$0xff]  ;;  %v3824_v43 = vpack.c.bf16 %v2543_v17, %v2542_v4  ;;  %v2350_v25 = vsel %vm166_vm0, %v2002_v1, 0.0  ;;  %v2568_v11 = vld [vmem:[%s6704_s10 + $0x120] sm:$0xff] }
 0x1e1   :  { %v2232_v52 = vpop.xlane.xlu0 %2231  ;;  %v3163_v12 = vrot.slane %v2491_v55, %v6740_v2  ;;  %2399 = vadd.xlane.f32.xlu1 %v2398_v8  ;;  %v3838_v15 = vpack.c.bf16 %v2583_v50, %v2582_v44  ;;  %v2566_v8 = vld [vmem:[%s6704_s10 + $0x110] sm:$0xff]  ;;  %v2567_v3 = vld [vmem:[%s6704_s10 + $0x118] sm:$0xff]  ;;  %v3844_v1 = vpack.c.bf16 %v2569_v23, %v2568_v11 }
 0x1e2   :  { %v6234_v57 = vsel %vm385_vm7, %v2911_v56, %v6108_v5  ;;  %v2474_v51 = vmul.f32 0.0625, %v2232_v52  ;;  %v2373_v45 = vpop.xlane.xlu1 %2372  ;;  %v2209_v5 = vsel %vm166_vm0, %v1955_v41, 0.0  ;;  %3819 = vmatprep.subr.bf16.mxu1 %v3818_v30  ;;  %v1939_v52 = vld [vmem:[%s6703_s3 + $0x178] sm:$0xff]  ;;  %v2546_v50 = vld [vmem:[%s6704_s10 + $0x70] sm:$0xff] }
 0x1e3   :  { %v6255_v19 = vsel %vm6742_vm5, %v3163_v12, %v6123_v22  ;;  %v2521_v59 = vmul.f32 0.0625, %v2373_v45  ;;  %3821 = vmatpush3.bf16.msra.mxu1 %v3820_v10  ;;  %v2558_v22 = vld [vmem:[%s6704_s10 + $0xd0] sm:$0xff]  ;;  %3839 = vmatprep.subr.bf16.mxu0 %v3838_v15  ;;  %v2545_v45 = vld [vmem:[%s6704_s10 + $0x68] sm:$0xff]  ;;  %v2547_v4 = vld [vmem:[%s6704_s10 + $0x78] sm:$0xff] }
 0x1e4   :  { %v3079_v49 = vrot.slane %v2474_v51, %v6739_v6  ;;  %2348 = vadd.xlane.f32.xlu0 %v2347_v13  ;;  %v3822_v0 = vpack.c.bf16 %v2559_v48, %v2558_v22  ;;  %v3840_v13 = vpack.c.bf16 %v2567_v3, %v2566_v8  ;;  %v3828_v10 = vpack.c.bf16 %v2545_v45, %v2544_v18  ;;  %v2586_v22 = vld [vmem:[%s6704_s10 + $0x1b0] sm:$0xff]  ;;  %v2571_v15 = vld [vmem:[%s6704_s10 + $0x138] sm:$0xff] }
 0x1e5   :  { %v2322_v7 = vpop.xlane.xlu0 %2321  ;;  %v3311_v26 = vrot.slane %v2521_v59, %v6738_v61  ;;  %2210 = vadd.xlane.f32.xlu1 %v2209_v5  ;;  %v2353_v5 = vsel %vm166_vm0, %v2003_v42, 0.0  ;;  %v2588_v42 = vld [vmem:[%s6704_s10 + $0x1c0] sm:$0xff]  ;;  %v2590_v18 = vld [vmem:[%s6704_s10 + $0x1d0] sm:$0xff]  ;;  %v2591_v45 = vld [vmem:[%s6704_s10 + $0x1d8] sm:$0xff] }
 0x1e6   :  { %v6276_v34 = vsel %vm399_vm9, %v3079_v49, %v6138_v53  ;;  %v2504_v46 = vmul.f32 0.0625, %v2322_v7  ;;  %v2094_v53 = vpop.xlane.xlu1 %2093  ;;  %3823 = vmatprep.subr.bf16.mxu1 %v3822_v0  ;;  %3841 = vmatpush3.bf16.msra.mxu0 %v3840_v13  ;;  %v2161_v7 = vsel %vm166_vm0, %v1939_v52, 0.0  ;;  %v2587_v0 = vld [vmem:[%s6704_s10 + $0x1b8] sm:$0xff]  ;;  %v2589_v52 = vld [vmem:[%s6704_s10 + $0x1c8] sm:$0xff]  ;;  %vm6744_vm0 = vmmov %vm6741_vm4 }
 0x1e7   :  { %v6297_v56 = vsel %vm392_vm8, %v3311_v26, %v6153_v33  ;;  %v2428_v41 = vmul.f32 0.0625, %v2094_v53  ;;  %3825 = vmatpush3.bf16.msra.mxu1 %v3824_v43  ;;  %v2561_v33 = vld [vmem:[%s6704_s10 + $0xe8] sm:$0xff]  ;;  %3843 = vmatprep.subr.bf16.mxu0 %v3842_v29  ;;  %v3846_v17 = vpack.c.bf16 %v2587_v0, %v2586_v22  ;;  %v3832_v53 = vpack.c.bf16 %v2547_v4, %v2546_v50  ;;  %v2575_v11 = vld [vmem:[%s6704_s10 + $0x158] sm:$0xff]  ;;  %vm6748_vm4 = vmmov %vm6744_vm0 }
 0x1e8   :  { %v3227_v55 = vrot.slane %v2504_v46, %v6737_v36  ;;  %2159 = vadd.xlane.f32.xlu0 %v2158_v31  ;;  %v2560_v36 = vld [vmem:[%s6704_s10 + $0xe0] sm:$0xff]  ;;  %v2562_v31 = vld [vmem:[%s6704_s10 + $0xf0] sm:$0xff] }
 0x1e9   :  { %v2043_v9 = vpop.xlane.xlu0 %2042  ;;  %v2852_v51 = vrot.slane %v2428_v41, %v5044_v32  ;;  %2402 = vadd.xlane.f32.xlu1 %v2401_v63  ;;  %v3826_v35 = vpack.c.bf16 %v2561_v33, %v2560_v36  ;;  %v2570_v63 = vld [vmem:[%s6704_s10 + $0x130] sm:$0xff]  ;;  %v2572_v36 = vld [vmem:[%s6704_s10 + $0x140] sm:$0xff]  ;;  %v2573_v33 = vld [vmem:[%s6704_s10 + $0x148] sm:$0xff] }
 0x1ea   :  { %v6318_v12 = vsel %vm385_vm7, %v3227_v55, %v6168_v47  ;;  %v2411_v30 = vmul.f32 0.0625, %v2043_v9  ;;  %v2184_v47 = vpop.xlane.xlu1 %2183  ;;  %3845 = vmatpush3.bf16.msra.mxu0 %v3844_v1  ;;  %v3848_v55 = vpack.c.bf16 %v2571_v15, %v2570_v63  ;;  %vm6745_vm7 = vmmov %vm6744_vm0 }
 0x1eb   :  { %v6339_v49 = vsel %vm856_vm13, %v2852_v51, %v6183_v62  ;;  %v2458_v37 = vmul.f32 0.0625, %v2184_v47  ;;  %3827 = vmatprep.subr.bf16.mxu1 %v3826_v35  ;;  %v2563_v62 = vld [vmem:[%s6704_s10 + $0xf8] sm:$0xff]  ;;  %3847 = vmatprep.subr.bf16.mxu0 %v3846_v17  ;;  %v3852_v51 = vpack.c.bf16 %v2573_v33, %v2572_v36  ;;  %v2594_v17 = vld [vmem:[%s6704_s10 + $0x1f0] sm:$0xff] }
 0x1ec   :  { %v2768_v59 = vrot.slane %v2411_v30, %v6740_v2  ;;  %2351 = vadd.xlane.f32.xlu0 %v2350_v25  ;;  %3829 = vmatpush3.bf16.msra.mxu1 %v3828_v10  ;;  %v3830_v46 = vpack.c.bf16 %v2563_v62, %v2562_v31  ;;  %v3850_v25 = vpack.c.bf16 %v2589_v52, %v2588_v42  ;;  %v2574_v10 = vld [vmem:[%s6704_s10 + $0x150] sm:$0xff]  ;;  %v2593_v31 = vld [vmem:[%s6704_s10 + $0x1e8] sm:$0xff] }
 0x1ed   :  { %v2133_v27 = vpop.xlane.xlu0 %2132  ;;  %v3000_v44 = vrot.slane %v2458_v37, %v6739_v6  ;;  %2354 = vadd.xlane.f32.xlu1 %v2353_v5 }
 0x1ee   :  { %v6354_v48 = vsel %vm6743_vm6, %v2768_v59, %v6198_v40  ;;  %v2441_v26 = vmul.f32 0.0625, %v2133_v27  ;;  %v2286_v40 = vpop.xlane.xlu1 %2285  ;;  %3831 = vmatprep.subr.bf16.mxu1 %v3830_v46  ;;  %3849 = vmatpush3.bf16.msra.mxu0 %v3848_v55  ;;  %v3856_v59 = vpack.c.bf16 %v2575_v11, %v2574_v10  ;;  %v2579_v55 = vld [vmem:[%s6704_s10 + $0x178] sm:$0xff] }
 0x1ef   :  { %v6374_v43 = vsel %vm399_vm9, %v3000_v44, %v6213_v16  ;;  %v2492_v3 = vmul.f32 0.0625, %v2286_v40  ;;  %3851 = vmatprep.subr.bf16.mxu0 %v3850_v25 }
 0x1f0   :  { %v2916_v8 = vrot.slane %v2441_v26, %v6738_v61  ;;  %2162 = vadd.xlane.f32.xlu0 %v2161_v7  ;;  %3833 = vmatpush3.bf16.msra.mxu1 %v3832_v53  ;;  %v2592_v7 = vld [vmem:[%s6704_s10 + $0x1e0] sm:$0xff]  ;;  %v2577_v26 = vld [vmem:[%s6704_s10 + $0x168] sm:$0xff]  ;;  %v2595_v53 = vld [vmem:[%s6704_s10 + $0x1f8] sm:$0xff] }
 0x1f1   :  { %v2235_v41 = vpop.xlane.xlu0 %2234  ;;  %v3168_v13 = vrot.slane %v2492_v3, %v5044_v32  ;;  %v2578_v3 = vld [vmem:[%s6704_s10 + $0x170] sm:$0xff] }
 0x1f2   :  { %v6385_v16 = vsel %vm392_vm8, %v2916_v8, %v6234_v57  ;;  %v2475_v9 = vmul.f32 0.0625, %v2235_v41  ;;  %v2376_v60 = vpop.xlane.xlu1 %2375  ;;  %3853 = vmatpush3.bf16.msra.mxu0 %v3852_v51  ;;  %v3864_v42 = vpack.c.bf16 %v2579_v55, %v2578_v3 }
 0x1f3   :  { %v3169_v30 = vsel %vm856_vm13, %v3168_v13, %v6255_v19  ;;  %v2522_v35 = vmul.f32 0.0625, %v2376_v60  ;;  %v3854_v19 = vpack.c.bf16 %v2591_v45, %v2590_v18 }
 0x1f4   :  { %v3084_v57 = vrot.slane %v2475_v9, %v6740_v2 }
 0x1f5   :  { %v2325_v24 = vpop.xlane.xlu0 %2324  ;;  %v3316_v5 = vrot.slane %v2522_v35, %v6739_v6  ;;  %3855 = vmatprep.subr.bf16.mxu0 %v3854_v19 }
 0x1f6   :  { %v3085_v47 = vsel %vm6744_vm0, %v3084_v57, %v6276_v34  ;;  %v2505_v29 = vmul.f32 0.0625, %v2325_v24  ;;  %v2097_v23 = vpop.xlane.xlu1 %2096  ;;  %3857 = vmatpush3.bf16.msra.mxu0 %v3856_v59 }
 0x1f7   :  { %v3317_v37 = vsel %vm399_vm9, %v3316_v5, %v6297_v56  ;;  %v2429_v1 = vmul.f32 0.0625, %v2097_v23  ;;  %v3858_v56 = vpack.c.bf16 %v2593_v31, %v2592_v7 }
 0x1f8   :  { %v3232_v34 = vrot.slane %v2505_v29, %v6738_v61  ;;  %v2576_v61 = vld [vmem:[%s6704_s10 + $0x160] sm:$0xff] }
 0x1f9   :  { %v2046_v27 = vpop.xlane.xlu0 %2045  ;;  %v2857_v22 = vrot.slane %v2429_v1, %v5035_v28  ;;  %v3860_v0 = vpack.c.bf16 %v2577_v26, %v2576_v61  ;;  %3859 = vmatprep.subr.bf16.mxu0 %v3858_v56 }
 0x1fa   :  { %v3233_v62 = vsel %vm392_vm8, %v3232_v34, %v6318_v12  ;;  %v2412_v44 = vmul.f32 0.0625, %v2046_v27  ;;  %v2187_v46 = vpop.xlane.xlu1 %2186  ;;  %vm6746_vm8 = vmmov %vm6744_vm0 }
 0x1fb   :  { %v2858_v50 = vsel %vm863_vm14, %v2857_v22, %v6339_v49  ;;  %v2459_v4 = vmul.f32 0.0625, %v2187_v46  ;;  %3861 = vmatpush3.bf16.msra.mxu0 %v3860_v0  ;;  %v3862_v49 = vpack.c.bf16 %v2595_v53, %v2594_v17 }
 0x1fc   :  { %v2773_v12 = vrot.slane %v2412_v44, %v5044_v32 }
 0x1fd   :  { %v2136_v40 = vpop.xlane.xlu0 %2135  ;;  %v3005_v15 = vrot.slane %v2459_v4, %v6740_v2  ;;  %3863 = vmatprep.subr.bf16.mxu0 %v3862_v49 }
 0x1fe   :  { %v2774_v63 = vsel %vm856_vm13, %v2773_v12, %v6354_v48  ;;  %v2442_v8 = vmul.f32 0.0625, %v2136_v40  ;;  %v2289_v41 = vpop.xlane.xlu1 %2288 }
 0x1ff   :  { %v3006_v52 = vsel %vm6745_vm7, %v3005_v15, %v6374_v43  ;;  %v2493_v13 = vmul.f32 0.0625, %v2289_v41  ;;  %3865 = vmatpush3.bf16.msra.mxu0 %v3864_v42 }
 0x200   :  { %v2921_v48 = vrot.slane %v2442_v8, %v6739_v6 }
 0x201   :  { %v2238_v9 = vpop.xlane.xlu0 %2237  ;;  %v3173_v36 = vrot.slane %v2493_v13, %v5035_v28 }
 0x202   :  { %v2922_v25 = vsel %vm399_vm9, %v2921_v48, %v6385_v16  ;;  %v2476_v33 = vmul.f32 0.0625, %v2238_v9  ;;  %v2379_v60 = vpop.xlane.xlu1 %2378 }
 0x203   :  { %v3174_v51 = vsel %vm863_vm14, %v3173_v36, %v3169_v30  ;;  %v2523_v35 = vmul.f32 0.0625, %v2379_v60 }
 0x204   :  { %v3089_v57 = vrot.slane %v2476_v33, %v5044_v32 }
 0x205   :  { %v2328_v24 = vpop.xlane.xlu0 %2327  ;;  %v3321_v18 = vrot.slane %v2523_v35, %v6740_v2 }
 0x206   :  { %v3090_v43 = vsel %vm856_vm13, %v3089_v57, %v3085_v47  ;;  %v2506_v45 = vmul.f32 0.0625, %v2328_v24  ;;  %v2100_v5 = vpop.xlane.xlu1 %2099 }
 0x207   :  { %v3322_v29 = vsel %vm6746_vm8, %v3321_v18, %v3317_v37  ;;  %v2430_v19 = vmul.f32 0.0625, %v2100_v5 }
 0x208   :  { %v3237_v16 = vrot.slane %v2506_v45, %v6739_v6 }
 0x209   :  { %v2049_v10 = vpop.xlane.xlu0 %2048  ;;  %v2862_v30 = vrot.slane %v2430_v19, %v5057_v38 }
 0x20a   :  { %v3238_v11 = vsel %vm399_vm9, %v3237_v16, %v3233_v62  ;;  %v2413_v23 = vmul.f32 0.0625, %v2049_v10  ;;  %v2190_v59 = vpop.xlane.xlu1 %2189  ;;  %vm6747_vm9 = vmmov %vm6744_vm0 }
 0x20b   :  { %v2863_v34 = vsel %vm870_vm15, %v2862_v30, %v2858_v50  ;;  %v2460_v1 = vmul.f32 0.0625, %v2190_v59 }
 0x20c   :  { %v2778_v47 = vrot.slane %v2413_v23, %v5035_v28 }
 0x20d   :  { %v2139_v27 = vpop.xlane.xlu0 %2138  ;;  %v3010_v37 = vrot.slane %v2460_v1, %v5044_v32 }
 0x20e   :  { %v2779_v7 = vsel %vm863_vm14, %v2778_v47, %v2774_v63  ;;  %v2443_v31 = vmul.f32 0.0625, %v2139_v27  ;;  %v2292_v6 = vpop.xlane.xlu1 %2291 }
 0x20f   :  { %v3011_v22 = vsel %vm856_vm13, %v3010_v37, %v3006_v52  ;;  %v2494_v44 = vmul.f32 0.0625, %v2292_v6 }
 0x210   :  { %v2926_v62 = vrot.slane %v2443_v31, %v6740_v2 }
 0x211   :  { %v2241_v56 = vpop.xlane.xlu0 %2240  ;;  %v3178_v26 = vrot.slane %v2494_v44, %v5057_v38 }
 0x212   :  { %v2927_v61 = vsel %vm6747_vm9, %v2926_v62, %v2922_v25  ;;  %v2477_v46 = vmul.f32 0.0625, %v2241_v56  ;;  %v2382_v0 = vpop.xlane.xlu1 %2381 }
 0x213   :  { %v6471_v50 = vsel %vm870_vm15, %v3178_v26, %v3174_v51  ;;  %v2524_v4 = vmul.f32 0.0625, %v2382_v0 }
 0x214   :  { %v3094_v12 = vrot.slane %v2477_v46, %v5035_v28 }
 0x215   :  { %v2331_v40 = vpop.xlane.xlu0 %2330  ;;  %v3326_v53 = vrot.slane %v2524_v4, %v5044_v32 }
 0x216   :  { %v3095_v17 = vsel %vm863_vm14, %v3094_v12, %v3090_v43  ;;  %v2507_v63 = vmul.f32 0.0625, %v2331_v40  ;;  %v2103_v15 = vpop.xlane.xlu1 %2102 }
 0x217   :  { %v3327_v8 = vsel %vm856_vm13, %v3326_v53, %v3322_v29  ;;  %v2431_v3 = vmul.f32 0.0625, %v2103_v15 }
 0x218   :  { %v3242_v49 = vrot.slane %v2507_v63, %v6740_v2 }
 0x219   :  { %v2052_v55 = vpop.xlane.xlu0 %2051  ;;  %v2867_v42 = vrot.slane %v2431_v3, %v5049_v20 }
 0x21a   :  { %v3243_v41 = vsel %vm6748_vm4, %v3242_v49, %v3238_v11  ;;  %v2414_v52 = vmul.f32 0.0625, %v2052_v55  ;;  %v2193_v48 = vpop.xlane.xlu1 %2192 }
 0x21b   :  { %v6481_v13 = vsel %vm877_vm1, %v2867_v42, %v2863_v34  ;;  %v2461_v25 = vmul.f32 0.0625, %v2193_v48 }
 0x21c   :  { %v2783_v9 = vrot.slane %v2414_v52, %v5057_v38  ;;  %v3541_v52 = vld [vmem:[%s6707_s12] ss:$0 sm:$0xff] }
 0x21d   :  { %v2142_v36 = vpop.xlane.xlu0 %2141  ;;  %v3015_v2 = vrot.slane %v2461_v25, %v5035_v28 }
 0x21e   :  { %v6485_v33 = vsel %vm870_vm15, %v2783_v9, %v2779_v7  ;;  %v2444_v60 = vmul.f32 0.0625, %v2142_v36  ;;  %v6488_v51 = vpop.xlane.xlu1 %2294 }
 0x21f   :  { %v3016_v57 = vsel %vm863_vm14, %v3015_v2, %v3011_v22 }
 0x220   :  { %v2931_v35 = vrot.slane %v2444_v60, %v5044_v32 }
 0x221   :  { %v2244_v24 = vpop.xlane.xlu0 %2243 }
 0x222   :  { %v2932_v43 = vsel %vm856_vm13, %v2931_v35, %v2927_v61  ;;  %v2478_v18 = vmul.f32 0.0625, %v2244_v24  ;;  %v2385_v45 = vpop.xlane.xlu1 %2384 }
 0x223   :  { %v2525_v29 = vmul.f32 0.0625, %v2385_v45 }
 0x224   :  { %v3099_v5 = vrot.slane %v2478_v18, %v5057_v38 }
 0x225   :  { %v2334_v16 = vpop.xlane.xlu0 %2333  ;;  %v3331_v10 = vrot.slane %v2525_v29, %v5035_v28 }
 0x226   :  { %v6495_v19 = vsel %vm870_vm15, %v3099_v5, %v3095_v17  ;;  %v2508_v11 = vmul.f32 0.0625, %v2334_v16  ;;  %v2106_v30 = vpop.xlane.xlu1 %2105  ;;  %v3539_v17 = vld [vmem:[%s6705_s5] ss:$0 sm:$0xff] }
 0x227   :  { %v6499_v23 = vsel %vm863_vm14, %v3331_v10, %v3327_v8  ;;  %v519_v15 = vadd.f32 %v3539_v17, %v5899_v39  ;;  %v3543_v39 = vld [vmem:[%s6707_s12 + $0x1] ss:$0 sm:$0xff]  ;;  %v2495_v10 = vmul.f32 0.0625, %v6488_v51  ;;  %v3545_v51 = vld [vmem:[%s6707_s12 + $0x2] ss:$0 sm:$0xff] }
 0x228   :  { %v3247_v59 = vrot.slane %v2508_v11, %v5044_v32  ;;  %v3544_v11 = vld [vmem:[%s6708_s9] ss:$0 sm:$0xff] }
 0x229   :  { %v6502_v34 = vpop.xlane.xlu0 %2054  ;;  %v522_v55 = vmax.f32 %v519_v15, 0.0  ;;  %v3183_v17 = vrot.slane %v2495_v10, %v5049_v20 }
 0x22a   :  { %v3248_v47 = vsel %vm856_vm13, %v3247_v59, %v3243_v41  ;;  %v2196_v1 = vpop.xlane.xlu1 %2195 }
 0x22b   :  { %v2462_v27 = vmul.f32 0.0625, %v2196_v1  ;;  %v530_v36 = vmul.f32 %v3541_v52, %v522_v55 }
 0x22d   :  { %v2145_v7 = vpop.xlane.xlu0 %2144  ;;  %v3020_v37 = vrot.slane %v2462_v27, %v5057_v38 }
 0x22e   :  { %v2445_v31 = vmul.f32 0.0625, %v2145_v7  ;;  %v2298_v6 = vpop.xlane.xlu1 %2297 }
 0x22f   :  { %v6507_v22 = vsel %vm870_vm15, %v3020_v37, %v3016_v57  ;;  %v2496_v1 = vmul.f32 0.0625, %v2298_v6 }
 0x230   :  { %v2936_v62 = vrot.slane %v2445_v31, %v5035_v28 }
 0x231   :  { %v6510_v44 = vpop.xlane.xlu0 %2246 }
 0x232   :  { %v6513_v32 = vsel %vm863_vm14, %v2936_v62, %v2932_v43  ;;  %v6515_v56 = vpop.xlane.xlu1 %2387 }
 0x235   :  { %v2337_v61 = vpop.xlane.xlu0 %2336 }
 0x236   :  { %v2509_v26 = vmul.f32 0.0625, %v2337_v61  ;;  %v2109_v46 = vpop.xlane.xlu1 %2108 }
 0x237   :  { %v2433_v37 = vmul.f32 0.0625, %v2109_v46 }
 0x238   :  { %v3252_v0 = vrot.slane %v2509_v26, %v5035_v28  ;;  %v3542_v28 = vld [vmem:[%s6706_s7] ss:$0 sm:$0xff] }
 0x239   :  { %v6518_v12 = vpop.xlane.xlu0 %2057  ;;  %v2877_v46 = vrot.slane %v2433_v37, %v5075_v21 }
 0x23a   :  { %v6521_v4 = vsel %vm863_vm14, %v3252_v0, %v3248_v47  ;;  %v6523_v40 = vpop.xlane.xlu1 %2198  ;;  %v2432_v47 = vmul.f32 0.0625, %v2106_v30  ;;  %v3188_v30 = vrot.slane %v2496_v1, %v5084_v58  ;;  %v2415_v1 = vmul.f32 0.0625, %v6502_v34 }
 0x23b   :  { %v2416_v37 = vmul.f32 0.0625, %v6518_v12 }
 0x23d   :  { %v6528_v53 = vpop.xlane.xlu0 %2147 }
 0x23e   :  { %v2301_v63 = vpop.xlane.xlu1 %2300 }
 0x23f   :  { %v2497_v31 = vmul.f32 0.0625, %v2301_v63 }
 0x241   :  { %v6531_v8 = vpop.xlane.xlu0 %2249  ;;  %v3193_v63 = vrot.slane %v2497_v31, %v5075_v21 }
 0x242   :  { %v6536_v3 = vpop.xlane.xlu1 %2390  ;;  %v2480_v31 = vmul.f32 0.0625, %v6531_v8 }
 0x243   :  { %v1054_v49 = vpop.f32.mrb[0].mxu1 }
 0x244   :  { %v1055_v41 = vadd.f32 %v3542_v28, %v1054_v49  ;;  %v3733_v42 = vpop.f32.mrb[1].mxu1  ;;  %v2872_v28 = vrot.slane %v2432_v47, %v5084_v58  ;;  %v3109_v12 = vrot.slane %v2480_v31, %v5084_v58 }
 0x245   :  { %v6544_v48 = vpop.xlane.xlu0 %2339 }
 0x246   :  { %v1058_v9 = vmax.f32 %v1055_v41, 0.0  ;;  %v2112_v25 = vpop.xlane.xlu1 %2111 }
 0x247   :  { %v2434_v62 = vmul.f32 0.0625, %v2112_v25 }
 0x248   :  { %v1066_v2 = vmul.f32 %v3543_v39, %v1058_v9  ;;  %v3184_v39 = vsel %vm877_vm1, %v3183_v17, %v6471_v50 }
 0x249   :  { %v2061_v60 = vpop.xlane.xlu0 %2060  ;;  %v2882_v55 = vrot.slane %v2434_v62, %v5645_v54 }
 0x24a   :  { %v1067_v57 = vadd.f32 %v1066_v2, %v530_v36  ;;  %v6546_v35 = vpop.xlane.xlu1 %2201  ;;  %v2873_v36 = vsel %vm884_vm2, %v2872_v28, %v6481_v13  ;;  %v3189_v2 = vsel %vm884_vm2, %v3188_v30, %v3184_v39  ;;  %v2479_v13 = vmul.f32 0.0625, %v6510_v44 }
 0x24b   :  { %v3194_v10 = vsel %vm891_vm3, %v3193_v63, %v3189_v2  ;;  %v2788_v44 = vrot.slane %v2415_v1, %v5049_v20  ;;  %v2793_v30 = vrot.slane %v2416_v37, %v5084_v58 }
 0x24c   :  { %v3104_v28 = vrot.slane %v2479_v13, %v5049_v20 }
 0x24d   :  { %v6548_v24 = vpop.xlane.xlu0 %2150 }
 0x24e   :  { %v2304_v43 = vpop.xlane.xlu1 %2303 }
 0x24f   :  { %v2498_v61 = vmul.f32 0.0625, %v2304_v43 }
 0x251   :  { %v2253_v18 = vpop.xlane.xlu0 %2252  ;;  %v3198_v41 = vrot.slane %v2498_v61, %v5645_v54 }
 0x252   :  { %v6550_v45 = vpop.xlane.xlu1 %2393  ;;  %v2481_v17 = vmul.f32 0.0625, %v2253_v18  ;;  %v2526_v18 = vmul.f32 0.0625, %v6515_v56 }
 0x253   :  { %v3199_v47 = vsel %vm898_vm12, %v3198_v41, %v3194_v10  ;;  %v2528_v1 = vmul.f32 0.0625, %v6550_v45 }
 0x254   :  { %v3336_v10 = vrot.slane %v2526_v18, %v5057_v38 }
 0x255   :  { %v6552_v5 = vpop.xlane.xlu0 %2342 }
 0x256   :  { %v2115_v16 = vpop.xlane.xlu1 %2114  ;;  %v3337_v45 = vsel %vm870_vm15, %v3336_v10, %v6499_v23 }
 0x257   :  { %v3607_v29 = vpop.f32.mrb[2].mxu0  ;;  %v2435_v15 = vmul.f32 0.0625, %v2115_v16  ;;  %v2878_v16 = vsel %vm891_vm3, %v2877_v46, %v2873_v36  ;;  %v3114_v46 = vrot.slane %v2481_v17, %v5075_v21  ;;  %v2510_v36 = vmul.f32 0.0625, %v6544_v48 }
 0x258   :  { %v3608_v59 = vpop.f32.mrb[3].mxu0  ;;  %v2883_v50 = vsel %vm898_vm12, %v2882_v55, %v2878_v16  ;;  %v2464_v16 = vmul.f32 0.0625, %v6546_v35  ;;  %v2446_v48 = vmul.f32 0.0625, %v6528_v53 }
 0x259   :  { %v3609_v27 = vadd.f32 %v3608_v59, %v3607_v29  ;;  %v2064_v7 = vpop.xlane.xlu0 %2063  ;;  %v2887_v9 = vrot.slane %v2435_v15, %v5650_v14 }
 0x25a   :  { %v6558_v0 = vpop.xlane.xlu1 %2204  ;;  %v3030_v17 = vrot.slane %v2464_v16, %v5084_v58 }
 0x25b   :  { %v1879_v26 = vadd.f32 %v3609_v27, %v3544_v11  ;;  %v2888_v27 = vsel %vm905_vm10, %v2887_v9, %v2883_v50  ;;  %v2465_v37 = vmul.f32 0.0625, %v6558_v0  ;;  %v2941_v0 = vrot.slane %v2446_v48, %v5057_v38 }
 0x25d   :  { %v1882_v6 = vmax.f32 %v1879_v26, 0.0  ;;  %v6566_v49 = vpop.xlane.xlu0 %2153  ;;  %v2417_v26 = vmul.f32 0.0625, %v2061_v60 }
 0x25e   :  { %v2307_v52 = vpop.xlane.xlu1 %2306  ;;  %v2448_v18 = vmul.f32 0.0625, %v6566_v49 }
 0x25f   :  { %v1890_v42 = vmul.f32 %v3545_v51, %v1882_v6  ;;  %v2499_v25 = vmul.f32 0.0625, %v2307_v52  ;;  %v2418_v51 = vmul.f32 0.0625, %v2064_v7  ;;  %v2798_v6 = vrot.slane %v2417_v26, %v5075_v21 }
 0x260   :  { %v2463_v7 = vmul.f32 0.0625, %v6523_v40  ;;  %v3105_v52 = vsel %vm877_vm1, %v3104_v28, %v6495_v19  ;;  %v2527_v40 = vmul.f32 0.0625, %v6536_v3  ;;  %v3257_v26 = vrot.slane %v2510_v36, %v5057_v38 }
 0x261   :  { %v2256_v43 = vpop.xlane.xlu0 %2255  ;;  %v6578_v29 = vadd.f32 %v1890_v42, %v1067_v57  ;;  %v3203_v11 = vrot.slane %v2499_v25, %v5650_v14  ;;  %v2803_v63 = vrot.slane %v2418_v51, %v5645_v54  ;;  %v2789_v42 = vsel %vm877_vm1, %v2788_v44, %v6485_v33 }
 0x262   :  { %v2397_v59 = vpop.xlane.xlu1 %2396  ;;  %v2482_v15 = vmul.f32 0.0625, %v2256_v43  ;;  %v2794_v25 = vsel %vm884_vm2, %v2793_v30, %v2789_v42  ;;  %v3110_v56 = vsel %vm884_vm2, %v3109_v12, %v3105_v52  ;;  %v2447_v28 = vmul.f32 0.0625, %v6548_v24 }
 0x263   :  { %v3204_v57 = vsel %vm905_vm10, %v3203_v11, %v3199_v47  ;;  %v2799_v43 = vsel %vm891_vm3, %v2798_v6, %v2794_v25  ;;  %v3115_v33 = vsel %vm891_vm3, %v3114_v46, %v3110_v56  ;;  %v3025_v11 = vrot.slane %v2463_v7, %v5049_v20 }
 0x264   :  { %v3364_v61 = vsel %vm447_vm11, %v3204_v57, %v2888_v27  ;;  %v3119_v55 = vrot.slane %v2482_v15, %v5645_v54  ;;  %v2804_v50 = vsel %vm898_vm12, %v2803_v63, %v2799_v43  ;;  %v3341_v27 = vrot.slane %v2527_v40, %v5049_v20 }
 0x265   :  { %v6591_v62 = vpop.xlane.xlu0 %2345  ;;  %3435 = vmatprep.mubr.f32.mxu1 %v3364_v61  ;;  %v2511_v57 = vmul.f32 0.0625, %v6552_v5  ;;  %v2529_v53 = vmul.f32 0.0625, %v2397_v59  ;;  %v3026_v51 = vsel %vm877_vm1, %v3025_v11, %v6507_v22  ;;  %v3346_v30 = vrot.slane %v2528_v1, %v5084_v58 }
 0x266   :  { %v6594_v34 = vpop.xlane.xlu1 %2156  ;;  %v3120_v47 = vsel %vm898_vm12, %v3119_v55, %v3115_v33  ;;  %v3035_v6 = vrot.slane %v2465_v37, %v5075_v21  ;;  %v2512_v23 = vmul.f32 0.0625, %v6591_v62  ;;  %v3258_v22 = vsel %vm870_vm15, %v3257_v26, %v6521_v4 }
 0x267   :  { %v3262_v59 = vrot.slane %v2511_v57, %v5049_v20  ;;  %v3351_v38 = vrot.slane %v2529_v53, %v5075_v21  ;;  %v2449_v7 = vmul.f32 0.0625, %v6594_v34  ;;  %v2946_v62 = vrot.slane %v2447_v28, %v5049_v20 }
 0x268   :  { %v3267_v49 = vrot.slane %v2512_v23, %v5084_v58 }
 0x269   :  { %v2067_v8 = vpop.xlane.xlu0 %2066  ;;  %v2956_v43 = vrot.slane %v2449_v7, %v5075_v21 }
 0x26a   :  { %v2419_v60 = vmul.f32 0.0625, %v2067_v8  ;;  %v2259_v41 = vpop.xlane.xlu1 %2258  ;;  %v3342_v8 = vsel %vm877_vm1, %v3341_v27, %v3337_v45  ;;  %v19_v45 = vstv %s6709_s13 }
 0x26b   :  { %v2483_v9 = vmul.f32 0.0625, %v2259_v41  ;;  %v3347_v42 = vsel %vm884_vm2, %v3346_v30, %v3342_v8  ;;  %20 = vst [vmem:[#allocation2] sm:$0x1] %v19_v45  ;;  %v3547_v8 = vld [vmem:[%s6707_s12 + $0x3] ss:$0 sm:$0xff] }
 0x26c   :  { %v2808_v39 = vrot.slane %v2419_v60, %v5650_v14  ;;  %v3031_v60 = vsel %vm884_vm2, %v3030_v17, %v3026_v51  ;;  %v3352_v56 = vsel %vm891_vm3, %v3351_v38, %v3347_v42 }
 0x26d   :  { %v2208_v2 = vpop.xlane.xlu0 %2207  ;;  %v3124_v19 = vrot.slane %v2483_v9, %v5650_v14  ;;  %v3036_v9 = vsel %vm891_vm3, %v3035_v6, %v3031_v60 }
 0x26e   :  { %v2400_v3 = vpop.xlane.xlu1 %2399  ;;  %v2809_v13 = vsel %vm905_vm10, %v2808_v39, %v2804_v50  ;;  %v2466_v15 = vmul.f32 0.0625, %v2208_v2  ;;  %v3263_v39 = vsel %vm877_vm1, %v3262_v59, %v3258_v22  ;;  %v2951_v2 = vrot.slane %v2448_v18, %v5084_v58 }
 0x26f   :  { %v3125_v35 = vsel %vm905_vm10, %v3124_v19, %v3120_v47  ;;  %v2530_v44 = vmul.f32 0.0625, %v2400_v3  ;;  %v2942_v3 = vsel %vm870_vm15, %v2941_v0, %v6513_v32  ;;  %v3268_v48 = vsel %vm884_vm2, %v3267_v49, %v3263_v39 }
 0x270   :  { %v3363_v61 = vsel %vm447_vm11, %v3125_v35, %v2809_v13  ;;  %v3040_v63 = vrot.slane %v2466_v15, %v5645_v54  ;;  %v2947_v13 = vsel %vm877_vm1, %v2946_v62, %v2942_v3 }
 0x271   :  { %v2349_v31 = vpop.xlane.xlu0 %2348  ;;  %3436 = vmatmul.mubr.f32.vlgmr.msra.gmra.mrb[2].mxu1 %v3363_v61  ;;  %v3356_v55 = vrot.slane %v2530_v44, %v5645_v54  ;;  %v2952_v37 = vsel %vm884_vm2, %v2951_v2, %v2947_v13 }
 0x272   :  { %v2211_v5 = vpop.xlane.xlu1 %2210  ;;  %v2513_v24 = vmul.f32 0.0625, %v2349_v31  ;;  %v3041_v33 = vsel %vm898_vm12, %v3040_v63, %v3036_v9  ;;  %v2957_v32 = vsel %vm891_vm3, %v2956_v43, %v2952_v37  ;;  %v3548_v22 = vld [vmem:[#allocation2] ss:$0 sm:$0xff] }
 0x273   :  { %v2467_v12 = vmul.f32 0.0625, %v2211_v5  ;;  %v3357_v19 = vsel %vm898_vm12, %v3356_v55, %v3352_v56 }
 0x274   :  { %v3272_v40 = vrot.slane %v2513_v24, %v5075_v21 }
 0x275   :  { %v2160_v46 = vpop.xlane.xlu0 %2159  ;;  %v3045_v4 = vrot.slane %v2467_v12, %v5650_v14 }
 0x276   :  { %v2403_v41 = vpop.xlane.xlu1 %2402  ;;  %v2450_v25 = vmul.f32 0.0625, %v2160_v46  ;;  %v3273_v35 = vsel %vm891_vm3, %v3272_v40, %v3268_v48 }
 0x277   :  { %v2531_v52 = vmul.f32 0.0625, %v2403_v41  ;;  %v3046_v50 = vsel %vm905_vm10, %v3045_v4, %v3041_v33 }
 0x278   :  { %v2961_v58 = vrot.slane %v2450_v25, %v5645_v54 }
 0x279   :  { %v2352_v34 = vpop.xlane.xlu0 %2351  ;;  %v3361_v36 = vrot.slane %v2531_v52, %v5650_v14 }
 0x27a   :  { %v2514_v20 = vmul.f32 0.0625, %v2352_v34  ;;  %v2355_v16 = vpop.xlane.xlu1 %2354  ;;  %v2962_v26 = vsel %vm898_vm12, %v2961_v58, %v2957_v32 }
 0x27b   :  { %v2515_v11 = vmul.f32 0.0625, %v2355_v16  ;;  %v3362_v47 = vsel %vm905_vm10, %v3361_v36, %v3357_v19 }
 0x27c   :  { %v3277_v10 = vrot.slane %v2514_v20, %v5645_v54  ;;  %v3366_v1 = vsel %vm447_vm11, %v3362_v47, %v3046_v50 }
 0x27d   :  { %v2163_v21 = vpop.xlane.xlu0 %2162  ;;  %v3282_v27 = vrot.slane %v2515_v11, %v5650_v14  ;;  %3505 = vmatprep.mubr.f32.mxu0 %v3366_v1 }
 0x27e   :  { %v2451_v57 = vmul.f32 0.0625, %v2163_v21  ;;  %v3278_v31 = vsel %vm898_vm12, %v3277_v10, %v3273_v35 }
 0x27f   :  { %v3283_v54 = vsel %vm905_vm10, %v3282_v27, %v3278_v31 }
 0x280   :  { %v2966_v61 = vrot.slane %v2451_v57, %v5650_v14  ;;  %v3546_v14 = vld [vmem:[%s6710_s11] ss:$0 sm:$0xff] }
 0x282   :  { %v2967_v17 = vsel %vm905_vm10, %v2966_v61, %v2962_v26  ;;  %vm3521_vm10 = vcmask 1041408  }
 0x283   :  { %v3365_v53 = vsel %vm447_vm11, %v3283_v54, %v2967_v17  ;;  %vm3533_vm11 = vcmask 1024  }
 0x284   :  { %3506 = vmatmul.mubr.f32.vlgmr.msra.gmra.mrb[4].mxu0 %v3365_v53 }
 0x344   :  { %v3642_v51 = vpop.f32.mrb[2].mxu1 }
 0x345   :  { %v3643_v15 = vpop.f32.mrb[3].mxu1 }
 0x346   :  { %v3644_v44 = vadd.f32 %v3643_v15, %v3642_v51 }
 0x348   :  { %v3438_v28 = vadd.f32 %v3644_v44, %v3546_v14 }
 0x357   :  { %v3677_v5 = vpop.f32.mrb[4].mxu0 }
 0x358   :  { %v3678_v0 = vpop.f32.mrb[5].mxu0 }
 0x359   :  { %v3679_v30 = vadd.f32 %v3678_v0, %v3677_v5 }
 0x35b   :  { %v3508_v12 = vadd.f32 %v3679_v30, %v3438_v28 }
 0x35d   :  { %v3511_v59 = vmax.f32 %v3508_v12, 0.0 }
 0x35f   :  { %v3519_v6 = vmul.f32 %v3547_v8, %v3511_v59 }
 0x361   :  { %v3520_v23 = vadd.f32 %v3519_v6, %v6578_v29 }
 0x363   :  { %v3522_v46 = vsel %vm3521_vm10, %v3520_v23, 0.0 }
 0x364   :  { %3523 = vadd.xlane.f32.xlu0 %v3522_v46 }
 0x3f1   :  { %v3524_v60 = vpop.xlane.xlu0 %3523 }
 0x3f2   :  { %v3532_v38 = vadd.f32 %v3548_v22, %v3524_v60 }
 0x3f4   :  { %3534 = vst.msk [vmem:[%s6711_s14] sm:$0x3] %vm3533_vm11, %v3532_v38 }

</bundles_post_ra>
